<compile_context>
chip_gen: v7x
topology: tpu7x:2x2x1
jax: 0.10.0
libtpu: 0.0.40
codegen_flags: <defaults>
</compile_context>

<pallas_src>
import functools
import math

import numpy as np
import jax
import jax.numpy as jnp
from jax import lax
from jax.experimental import pallas as pl
from jax.experimental.pallas import tpu as pltpu

SEQ_LEN = 60   # att_sig in the PyTorch module is a fixed 60x60 mask -> L must be 60
LN_EPS = 1e-5  # torch.nn.LayerNorm default eps


def _build_att_sig(kernel_size: int) -> np.ndarray:
    """Replicates the att_sig construction from transformer_mutis.__init__."""
    x = np.arange(60, dtype=np.float64)
    sig = math.sqrt(kernel_size)
    rows = [np.exp(-(x - u) ** 2 / (2.0 * sig ** 2)) / (math.sqrt(2.0 * math.pi) * sig)
            for u in range(60)]
    att = np.stack(rows, axis=0).astype(np.float32)
    # NOTE: PyTorch code does `att_sig * (1 / att_sig.sum(1))` WITHOUT keepdim,
    # which broadcasts the inverse row-sums over the LAST axis. Reproduce exactly.
    att = att * (1.0 / att.sum(axis=1))
    return att


def _transformer_kernel(x_ref, mask_ref, whead_ref,
                        ln1g_ref, ln1b_ref, w1_ref, w2_ref,
                        ln2g_ref, ln2b_ref, out_ref, loss_ref,
                        *, batch, seq_len, n_heads, d_k, d_model):
    B, L, H, D = batch, seq_len, n_heads, d_model
    x = x_ref[...]                       # [B*L, D] f32 (residual path stays f32)
    mask = mask_ref[...]                 # [L, L]  f32

    inv_d = jnp.float32(1.0 / D)

    def layer_norm(v, g, b):
        # one-pass variance: E[x^2] - mu^2 (clamped >= 0); rsqrt hits the EUP slot
        s = jnp.sum(v, axis=-1, keepdims=True)
        sq = jnp.sum(v * v, axis=-1, keepdims=True)
        mu = s * inv_d
        var = jnp.maximum(sq * inv_d - mu * mu, 0.0)
        return (v - mu) * lax.rsqrt(var + LN_EPS) * g + b

    # ---- head-major fused projection -----------------------------------------
    # whead_ref[n] = [ Wq_h/sqrt(dk) | Wk_h | Wv_h @ Wfc_h ]  for n = b*H + h.
    # Broadcasting tokens over heads is whole-tile copies (no lane shuffles); one
    # batched bf16 GEMM then yields Q, K and V@fc already head-major -> no
    # token-major <-> head-major transpose is ever needed.
    x_bf = x.astype(jnp.bfloat16)
    x_bh = jnp.broadcast_to(x_bf.reshape(B, 1, L, D),
                            (B, H, L, D)).reshape(B * H, L, D)       # [B*H, L, D] bf16
    fused = jnp.einsum('nld,ndc->nlc', x_bh, whead_ref[...],
                       preferred_element_type=jnp.float32)           # [B*H, L, 2dk+D]
    fused = fused.astype(jnp.bfloat16)   # single bf16 cast before head use

    # ---- attention + Gaussian-mask MSE loss, per batch element ----------------
    # (H heads at a time keeps live f32 [*,L,L] temporaries small.)
    ctx_parts = []
    loss = jnp.float32(0.0)
    for b in range(B):
        blk = fused[b * H:(b + 1) * H]                 # [H, L, 2dk+D] (major slice)
        q = blk[:, :, :d_k]                            # [H, L, dk]
        k = blk[:, :, d_k:2 * d_k]                     # [H, L, dk]
        v = blk[:, :, 2 * d_k:]                        # [H, L, D]  (already @ W_fc)

        # 1/sqrt(d_k) is folded into Wq on the host -> plain Q K^T here.
        scores = jnp.einsum('hqd,hkd->hqk', q, k,
                            preferred_element_type=jnp.float32)      # [H, L, L] f32
        m = jnp.max(scores, axis=-1, keepdims=True)
        ex = jnp.exp(scores - m)
        denom = jnp.sum(ex, axis=-1, keepdims=True)
        attn = ex * pl.reciprocal(denom, approx=True)                # [H, L, L] f32

        diff = attn - mask[None, :, :]       # fixed Gaussian mask, broadcast over H
        loss = loss + jnp.sum(diff * diff)

        # output projection folded per head: sum_h A_h @ (V_h @ Wfc_h)
        ctx = jnp.einsum('hqk,hko->hqo', attn.astype(jnp.bfloat16), v,
                         preferred_element_type=jnp.float32)         # [H, L, D]
        ctx_parts.append(jnp.sum(ctx, axis=0))                       # [L, D]

    attn_out = jnp.concatenate(ctx_parts, axis=0)                    # [B*L, D]

    # ---- residual + LayerNorm, then PoswiseFeedForwardNet ---------------------
    y = layer_norm(attn_out + x, ln1g_ref[...], ln1b_ref[...])

    hidden = jnp.maximum(
        jnp.dot(y.astype(jnp.bfloat16), w1_ref[...],
                preferred_element_type=jnp.float32), 0.0)            # [B*L, 2D]
    ffn = jnp.dot(hidden.astype(jnp.bfloat16), w2_ref[...],
                  preferred_element_type=jnp.float32)                # [B*L, D]
    out_ref[...] = layer_norm(ffn + y, ln2g_ref[...], ln2b_ref[...])
    loss_ref[0] = loss


def transformer_mutis_forward(x, params, mask, *, n_heads, d_k):
    B, L, D = x.shape
    d_ff = params['w1'].shape[1]

    # ---- host-side weight prep (constant folding, free) -----------------------
    inv_sqrt_dk = 1.0 / np.sqrt(d_k)
    wq_s = params['wq'] * inv_sqrt_dk                       # fold 1/sqrt(dk) into Wq
    blocks = []
    for h in range(n_heads):
        sl = slice(h * d_k, (h + 1) * d_k)
        wvfc_h = params['wv'][:, sl] @ params['wfc'][sl, :]            # [D, D] f32
        blocks.append(jnp.concatenate(
            [wq_s[:, sl], params['wk'][:, sl], wvfc_h], axis=1))       # [D, 2dk+D]
    w_head = jnp.stack(blocks, axis=0)                                 # [H, D, 2dk+D]
    w_head_bh = jnp.tile(w_head, (B, 1, 1)).astype(jnp.bfloat16)       # [B*H, D, 2dk+D]

    w1 = params['w1'].astype(jnp.bfloat16)                             # [D, 2D]
    w2 = params['w2'].astype(jnp.bfloat16)                             # [2D, D]

    x_flat = x.reshape(B * L, D)                                       # free reshape

    kernel = functools.partial(_transformer_kernel, batch=B, seq_len=L,
                               n_heads=n_heads, d_k=d_k, d_model=D)

    vmem = pl.BlockSpec(memory_space=pltpu.MemorySpace.VMEM)
    out, loss = pl.pallas_call(
        kernel,
        out_shape=(jax.ShapeDtypeStruct((B * L, D), jnp.float32),
                   jax.ShapeDtypeStruct((1,), jnp.float32)),
        in_specs=[vmem] * 9,
        out_specs=(vmem,
                   pl.BlockSpec(memory_space=pltpu.MemorySpace.SMEM)),
        compiler_params=pltpu.CompilerParams(vmem_limit_bytes=4 << 20),
    )(x_flat, mask, w_head_bh,
      params['ln1_g'], params['ln1_b'], w1, w2,
      params['ln2_g'], params['ln2_b'])
    return out.reshape(B, L, D), loss[0]


def _reference_forward(x, params, mask, *, n_heads, d_k):
    """Pure-JAX f32 reference replicating the PyTorch forward (verification)."""
    B, L, D = x.shape

    def layer_norm(v, g, b):
        mu = jnp.mean(v, axis=-1, keepdims=True)
        var = jnp.mean((v - mu) ** 2, axis=-1, keepdims=True)
        return (v - mu) / jnp.sqrt(var + LN_EPS) * g + b

    def split_heads(t):
        return jnp.transpose(t.reshape(B, L, n_heads, d_k), (0, 2, 1, 3))

    Q = split_heads(x @ params['wq'])
    K = split_heads(x @ params['wk'])
    V = split_heads(x @ params['wv'])
    scores = jnp.einsum('bhqd,bhkd->bhqk', Q, K) / np.sqrt(d_k)
    attn = jax.nn.softmax(scores, axis=-1)
    diff = attn - mask[None, None, :, :]
    loss = jnp.sum(diff * diff)
    context = jnp.einsum('bhqk,bhkd->bhqd', attn, V)
    context = jnp.transpose(context, (0, 2, 1, 3)).reshape(B, L, n_heads * d_k)
    y = layer_norm(context @ params['wfc'] + x, params['ln1_g'], params['ln1_b'])
    ffn = jnp.maximum(y @ params['w1'], 0.0) @ params['w2']
    out = layer_norm(ffn + y, params['ln2_g'], params['ln2_b'])
    return out, loss


if __name__ == "__main__":
    # Module hyper-parameters (small, consistent with the forward pass)
    kernel_size = 3
    d_model = 32
    d_k = 8
    n_heads = 4
    d_ff = 2 * d_model
    B, L = 2, SEQ_LEN   # seq_len must be 60 to broadcast against the 60x60 att_sig

    key = jax.random.PRNGKey(0)
    k_x, k_q, k_k, k_v, k_fc, k_1, k_2 = jax.random.split(key, 7)

    def init(k, shape):
        fan_in = shape[0]
        return jax.random.normal(k, shape, dtype=jnp.float32) / np.sqrt(fan_in)

    params = {
        'wq': init(k_q, (d_model, d_k * n_heads)),
        'wk': init(k_k, (d_model, d_k * n_heads)),
        'wv': init(k_v, (d_model, d_k * n_heads)),
        'wfc': init(k_fc, (n_heads * d_k, d_model)),
        'w1': init(k_1, (d_model, d_ff)),
        'w2': init(k_2, (d_ff, d_model)),
        # LayerNorms: PyTorch default init (weight=1, bias=0); kept as (1, D)
        'ln1_g': jnp.ones((1, d_model), jnp.float32),
        'ln1_b': jnp.zeros((1, d_model), jnp.float32),
        'ln2_g': jnp.ones((1, d_model), jnp.float32),
        'ln2_b': jnp.zeros((1, d_model), jnp.float32),
    }

    mask = jnp.asarray(_build_att_sig(kernel_size))          # [60, 60]
    x = jax.random.normal(k_x, (B, L, d_model), dtype=jnp.float32)

    out, loss = transformer_mutis_forward(x, params, mask, n_heads=n_heads, d_k=d_k)
    out = jax.block_until_ready(out)
    loss = jax.block_until_ready(loss)

    # Verify against the pure-JAX f32 reference (kernel uses bf16 MXU operands,
    # so tolerances are bf16-level).
    out_ref, loss_ref = _reference_forward(x, params, mask, n_heads=n_heads, d_k=d_k)
    np.testing.assert_allclose(np.asarray(out), np.asarray(out_ref),
                               rtol=3e-2, atol=2e-2)
    np.testing.assert_allclose(float(loss), float(loss_ref), rtol=3e-2, atol=1e-2)

    print("KERNEL_OK")
</pallas_src>

<mosaic_0001>
module attributes {stable_mosaic.version = 11 : i64} {
  func.func @_transformer_kernel(%arg0: memref<120x32xf32, #tpu.memory_space<vmem>>, %arg1: memref<60x60xf32, #tpu.memory_space<vmem>>, %arg2: memref<8x32x48xbf16, #tpu.memory_space<vmem>>, %arg3: memref<1x32xf32, #tpu.memory_space<vmem>>, %arg4: memref<1x32xf32, #tpu.memory_space<vmem>>, %arg5: memref<32x64xbf16, #tpu.memory_space<vmem>>, %arg6: memref<64x32xbf16, #tpu.memory_space<vmem>>, %arg7: memref<1x32xf32, #tpu.memory_space<vmem>>, %arg8: memref<1x32xf32, #tpu.memory_space<vmem>>, %arg9: memref<120x32xf32, #tpu.memory_space<vmem>>, %arg10: memref<1xf32, #tpu.memory_space<smem>>) attributes {dimension_semantics = [], scalar_prefetch = 0 : i64, scratch_operands = 0 : i64, tpu.core_type = #tpu.core_type<tc>} {
    %c0 = arith.constant 0 : index
    %c0_0 = arith.constant 0 : index
    %0 = vector.load %arg0[%c0, %c0_0] : memref<120x32xf32, #tpu.memory_space<vmem>>, vector<120x32xf32>
    %c0_1 = arith.constant 0 : index
    %c0_2 = arith.constant 0 : index
    %1 = vector.load %arg1[%c0_1, %c0_2] : memref<60x60xf32, #tpu.memory_space<vmem>>, vector<60x60xf32>
    %2 = arith.truncf %0 : vector<120x32xf32> to vector<120x32xbf16>
    %3 = vector.shape_cast %2 : vector<120x32xbf16> to vector<2x1x60x32xbf16>
    %4 = vector.shape_cast %3 : vector<2x1x60x32xbf16> to vector<2x1x60x32xbf16>
    %5 = vector.broadcast %4 : vector<2x1x60x32xbf16> to vector<2x4x60x32xbf16>
    %6 = vector.shape_cast %5 : vector<2x4x60x32xbf16> to vector<8x60x32xbf16>
    %c0_3 = arith.constant 0 : index
    %c0_4 = arith.constant 0 : index
    %c0_5 = arith.constant 0 : index
    %7 = vector.load %arg2[%c0_3, %c0_4, %c0_5] : memref<8x32x48xbf16, #tpu.memory_space<vmem>>, vector<8x32x48xbf16>
    "tpu.trace_start"() <{level = 10 : i32, message = "nld,ndc->nlc"}> : () -> ()
    %cst = arith.constant dense<0.000000e+00> : vector<8x60x48xf32>
    %8 = tpu.matmul %6, %7, %cst {dimension_numbers = #tpu.dot_dimension_numbers<[2], [1], [1], [2], [0, 0, 0, 1, 1, 2], [0], [0]>} : vector<8x60x32xbf16>, vector<8x32x48xbf16>, vector<8x60x48xf32> -> vector<8x60x48xf32>
    "tpu.trace_stop"() : () -> ()
    %9 = arith.truncf %8 : vector<8x60x48xf32> to vector<8x60x48xbf16>
    %10 = vector.extract_strided_slice %9 {offsets = [0, 0, 0], sizes = [4, 60, 48], strides = [1, 1, 1]} : vector<8x60x48xbf16> to vector<4x60x48xbf16>
    %11 = vector.extract_strided_slice %10 {offsets = [0, 0, 0], sizes = [4, 60, 8], strides = [1, 1, 1]} : vector<4x60x48xbf16> to vector<4x60x8xbf16>
    %12 = vector.extract_strided_slice %10 {offsets = [0, 0, 8], sizes = [4, 60, 8], strides = [1, 1, 1]} : vector<4x60x48xbf16> to vector<4x60x8xbf16>
    %13 = vector.extract_strided_slice %10 {offsets = [0, 0, 16], sizes = [4, 60, 32], strides = [1, 1, 1]} : vector<4x60x48xbf16> to vector<4x60x32xbf16>
    "tpu.trace_start"() <{level = 10 : i32, message = "hqd,hkd->hqk"}> : () -> ()
    %cst_6 = arith.constant dense<0.000000e+00> : vector<4x60x60xf32>
    %14 = tpu.matmul %11, %12, %cst_6 {dimension_numbers = #tpu.dot_dimension_numbers<[2], [2], [1], [1], [0, 0, 0, 1, 1, 1], [0], [0]>} : vector<4x60x8xbf16>, vector<4x60x8xbf16>, vector<4x60x60xf32> -> vector<4x60x60xf32>
    "tpu.trace_stop"() : () -> ()
    %cst_7 = arith.constant dense<0xFF800000> : vector<4x60xf32>
    %15 = vector.multi_reduction <maximumf>, %14, %cst_7 [2] : vector<4x60x60xf32> to vector<4x60xf32>
    %16 = vector.shape_cast %15 : vector<4x60xf32> to vector<4x60x1xf32>
    %17 = vector.broadcast %16 : vector<4x60x1xf32> to vector<4x60x60xf32>
    %18 = arith.subf %14, %17 : vector<4x60x60xf32>
    %19 = math.exp %18 : vector<4x60x60xf32>
    %cst_8 = arith.constant dense<0.000000e+00> : vector<4x60xf32>
    %20 = vector.multi_reduction <add>, %19, %cst_8 [2] : vector<4x60x60xf32> to vector<4x60xf32>
    %21 = vector.shape_cast %20 : vector<4x60xf32> to vector<4x60x1xf32>
    %22 = tpu.reciprocal %21 {approx = true} : vector<4x60x1xf32> -> vector<4x60x1xf32>
    %23 = vector.broadcast %22 : vector<4x60x1xf32> to vector<4x60x60xf32>
    %24 = arith.mulf %19, %23 : vector<4x60x60xf32>
    %25 = vector.shape_cast %1 : vector<60x60xf32> to vector<1x60x60xf32>
    %26 = vector.broadcast %25 : vector<1x60x60xf32> to vector<4x60x60xf32>
    %27 = arith.subf %24, %26 : vector<4x60x60xf32>
    %28 = arith.mulf %27, %27 : vector<4x60x60xf32>
    %29 = vector.shape_cast %28 : vector<4x60x60xf32> to vector<1x4x60x60xf32>
    %cst_9 = arith.constant dense<0.000000e+00> : vector<1xf32>
    %30 = vector.multi_reduction <add>, %29, %cst_9 [1, 2, 3] : vector<1x4x60x60xf32> to vector<1xf32>
    %31 = vector.shape_cast %30 : vector<1xf32> to vector<1x1x1x1xf32>
    %32 = vector.extract %31[0, 0, 0, 0] : f32 from vector<1x1x1x1xf32>
    %cst_10 = arith.constant 0.000000e+00 : f32
    %33 = arith.addf %cst_10, %32 : f32
    %34 = arith.truncf %24 : vector<4x60x60xf32> to vector<4x60x60xbf16>
    "tpu.trace_start"() <{level = 10 : i32, message = "hqk,hko->hqo"}> : () -> ()
    %cst_11 = arith.constant dense<0.000000e+00> : vector<4x60x32xf32>
    %35 = tpu.matmul %34, %13, %cst_11 {dimension_numbers = #tpu.dot_dimension_numbers<[2], [1], [1], [2], [0, 0, 0, 1, 1, 2], [0], [0]>} : vector<4x60x60xbf16>, vector<4x60x32xbf16>, vector<4x60x32xf32> -> vector<4x60x32xf32>
    "tpu.trace_stop"() : () -> ()
    %cst_12 = arith.constant dense<0.000000e+00> : vector<60x32xf32>
    %36 = vector.multi_reduction <add>, %35, %cst_12 [0] : vector<4x60x32xf32> to vector<60x32xf32>
    %37 = vector.extract_strided_slice %9 {offsets = [4, 0, 0], sizes = [4, 60, 48], strides = [1, 1, 1]} : vector<8x60x48xbf16> to vector<4x60x48xbf16>
    %38 = vector.extract_strided_slice %37 {offsets = [0, 0, 0], sizes = [4, 60, 8], strides = [1, 1, 1]} : vector<4x60x48xbf16> to vector<4x60x8xbf16>
    %39 = vector.extract_strided_slice %37 {offsets = [0, 0, 8], sizes = [4, 60, 8], strides = [1, 1, 1]} : vector<4x60x48xbf16> to vector<4x60x8xbf16>
    %40 = vector.extract_strided_slice %37 {offsets = [0, 0, 16], sizes = [4, 60, 32], strides = [1, 1, 1]} : vector<4x60x48xbf16> to vector<4x60x32xbf16>
    "tpu.trace_start"() <{level = 10 : i32, message = "hqd,hkd->hqk"}> : () -> ()
    %cst_13 = arith.constant dense<0.000000e+00> : vector<4x60x60xf32>
    %41 = tpu.matmul %38, %39, %cst_13 {dimension_numbers = #tpu.dot_dimension_numbers<[2], [2], [1], [1], [0, 0, 0, 1, 1, 1], [0], [0]>} : vector<4x60x8xbf16>, vector<4x60x8xbf16>, vector<4x60x60xf32> -> vector<4x60x60xf32>
    "tpu.trace_stop"() : () -> ()
    %cst_14 = arith.constant dense<0xFF800000> : vector<4x60xf32>
    %42 = vector.multi_reduction <maximumf>, %41, %cst_14 [2] : vector<4x60x60xf32> to vector<4x60xf32>
    %43 = vector.shape_cast %42 : vector<4x60xf32> to vector<4x60x1xf32>
    %44 = vector.broadcast %43 : vector<4x60x1xf32> to vector<4x60x60xf32>
    %45 = arith.subf %41, %44 : vector<4x60x60xf32>
    %46 = math.exp %45 : vector<4x60x60xf32>
    %cst_15 = arith.constant dense<0.000000e+00> : vector<4x60xf32>
    %47 = vector.multi_reduction <add>, %46, %cst_15 [2] : vector<4x60x60xf32> to vector<4x60xf32>
    %48 = vector.shape_cast %47 : vector<4x60xf32> to vector<4x60x1xf32>
    %49 = tpu.reciprocal %48 {approx = true} : vector<4x60x1xf32> -> vector<4x60x1xf32>
    %50 = vector.broadcast %49 : vector<4x60x1xf32> to vector<4x60x60xf32>
    %51 = arith.mulf %46, %50 : vector<4x60x60xf32>
    %52 = vector.shape_cast %1 : vector<60x60xf32> to vector<1x60x60xf32>
    %53 = vector.broadcast %52 : vector<1x60x60xf32> to vector<4x60x60xf32>
    %54 = arith.subf %51, %53 : vector<4x60x60xf32>
    %55 = arith.mulf %54, %54 : vector<4x60x60xf32>
    %56 = vector.shape_cast %55 : vector<4x60x60xf32> to vector<1x4x60x60xf32>
    %cst_16 = arith.constant dense<0.000000e+00> : vector<1xf32>
    %57 = vector.multi_reduction <add>, %56, %cst_16 [1, 2, 3] : vector<1x4x60x60xf32> to vector<1xf32>
    %58 = vector.shape_cast %57 : vector<1xf32> to vector<1x1x1x1xf32>
    %59 = vector.extract %58[0, 0, 0, 0] : f32 from vector<1x1x1x1xf32>
    %60 = arith.addf %33, %59 : f32
    %61 = arith.truncf %51 : vector<4x60x60xf32> to vector<4x60x60xbf16>
    "tpu.trace_start"() <{level = 10 : i32, message = "hqk,hko->hqo"}> : () -> ()
    %cst_17 = arith.constant dense<0.000000e+00> : vector<4x60x32xf32>
    %62 = tpu.matmul %61, %40, %cst_17 {dimension_numbers = #tpu.dot_dimension_numbers<[2], [1], [1], [2], [0, 0, 0, 1, 1, 2], [0], [0]>} : vector<4x60x60xbf16>, vector<4x60x32xbf16>, vector<4x60x32xf32> -> vector<4x60x32xf32>
    "tpu.trace_stop"() : () -> ()
    %cst_18 = arith.constant dense<0.000000e+00> : vector<60x32xf32>
    %63 = vector.multi_reduction <add>, %62, %cst_18 [0] : vector<4x60x32xf32> to vector<60x32xf32>
    %64 = tpu.concatenate %36, %63 in 0 : vector<60x32xf32>, vector<60x32xf32> -> vector<120x32xf32>
    %65 = arith.addf %64, %0 : vector<120x32xf32>
    %c0_19 = arith.constant 0 : index
    %c0_20 = arith.constant 0 : index
    %66 = vector.load %arg3[%c0_19, %c0_20] : memref<1x32xf32, #tpu.memory_space<vmem>>, vector<1x32xf32>
    %c0_21 = arith.constant 0 : index
    %c0_22 = arith.constant 0 : index
    %67 = vector.load %arg4[%c0_21, %c0_22] : memref<1x32xf32, #tpu.memory_space<vmem>>, vector<1x32xf32>
    %cst_23 = arith.constant dense<0.000000e+00> : vector<120xf32>
    %68 = vector.multi_reduction <add>, %65, %cst_23 [1] : vector<120x32xf32> to vector<120xf32>
    %69 = vector.shape_cast %68 : vector<120xf32> to vector<120x1xf32>
    %70 = arith.mulf %65, %65 : vector<120x32xf32>
    %cst_24 = arith.constant dense<0.000000e+00> : vector<120xf32>
    %71 = vector.multi_reduction <add>, %70, %cst_24 [1] : vector<120x32xf32> to vector<120xf32>
    %72 = vector.shape_cast %71 : vector<120xf32> to vector<120x1xf32>
    %cst_25 = arith.constant 3.125000e-02 : f32
    %73 = vector.broadcast %cst_25 : f32 to vector<120x1xf32>
    %74 = arith.mulf %69, %73 : vector<120x1xf32>
    %cst_26 = arith.constant 3.125000e-02 : f32
    %75 = vector.broadcast %cst_26 : f32 to vector<120x1xf32>
    %76 = arith.mulf %72, %75 : vector<120x1xf32>
    %77 = arith.mulf %74, %74 : vector<120x1xf32>
    %78 = arith.subf %76, %77 : vector<120x1xf32>
    %cst_27 = arith.constant 0.000000e+00 : f32
    %79 = vector.broadcast %cst_27 : f32 to vector<120x1xf32>
    %80 = arith.maximumf %78, %79 : vector<120x1xf32>
    %81 = vector.broadcast %74 : vector<120x1xf32> to vector<120x32xf32>
    %82 = arith.subf %65, %81 : vector<120x32xf32>
    %cst_28 = arith.constant 9.99999974E-6 : f32
    %83 = vector.broadcast %cst_28 : f32 to vector<120x1xf32>
    %84 = arith.addf %80, %83 : vector<120x1xf32>
    %85 = math.rsqrt %84 : vector<120x1xf32>
    %86 = vector.broadcast %85 : vector<120x1xf32> to vector<120x32xf32>
    %87 = arith.mulf %82, %86 : vector<120x32xf32>
    %88 = vector.broadcast %66 : vector<1x32xf32> to vector<120x32xf32>
    %89 = arith.mulf %87, %88 : vector<120x32xf32>
    %90 = vector.broadcast %67 : vector<1x32xf32> to vector<120x32xf32>
    %91 = arith.addf %89, %90 : vector<120x32xf32>
    %92 = arith.truncf %91 : vector<120x32xf32> to vector<120x32xbf16>
    %c0_29 = arith.constant 0 : index
    %c0_30 = arith.constant 0 : index
    %93 = vector.load %arg5[%c0_29, %c0_30] : memref<32x64xbf16, #tpu.memory_space<vmem>>, vector<32x64xbf16>
    %cst_31 = arith.constant dense<0.000000e+00> : vector<120x64xf32>
    %94 = tpu.matmul %92, %93, %cst_31 {dimension_numbers = #tpu.dot_dimension_numbers<[1], [0], [0], [1], [0, 0, 1, 1], [], []>} : vector<120x32xbf16>, vector<32x64xbf16>, vector<120x64xf32> -> vector<120x64xf32>
    %cst_32 = arith.constant 0.000000e+00 : f32
    %95 = vector.broadcast %cst_32 : f32 to vector<120x64xf32>
    %96 = arith.maximumf %94, %95 : vector<120x64xf32>
    %97 = arith.truncf %96 : vector<120x64xf32> to vector<120x64xbf16>
    %c0_33 = arith.constant 0 : index
    %c0_34 = arith.constant 0 : index
    %98 = vector.load %arg6[%c0_33, %c0_34] : memref<64x32xbf16, #tpu.memory_space<vmem>>, vector<64x32xbf16>
    %cst_35 = arith.constant dense<0.000000e+00> : vector<120x32xf32>
    %99 = tpu.matmul %97, %98, %cst_35 {dimension_numbers = #tpu.dot_dimension_numbers<[1], [0], [0], [1], [0, 0, 1, 1], [], []>} : vector<120x64xbf16>, vector<64x32xbf16>, vector<120x32xf32> -> vector<120x32xf32>
    %100 = arith.addf %99, %91 : vector<120x32xf32>
    %c0_36 = arith.constant 0 : index
    %c0_37 = arith.constant 0 : index
    %101 = vector.load %arg7[%c0_36, %c0_37] : memref<1x32xf32, #tpu.memory_space<vmem>>, vector<1x32xf32>
    %c0_38 = arith.constant 0 : index
    %c0_39 = arith.constant 0 : index
    %102 = vector.load %arg8[%c0_38, %c0_39] : memref<1x32xf32, #tpu.memory_space<vmem>>, vector<1x32xf32>
    %cst_40 = arith.constant dense<0.000000e+00> : vector<120xf32>
    %103 = vector.multi_reduction <add>, %100, %cst_40 [1] : vector<120x32xf32> to vector<120xf32>
    %104 = vector.shape_cast %103 : vector<120xf32> to vector<120x1xf32>
    %105 = arith.mulf %100, %100 : vector<120x32xf32>
    %cst_41 = arith.constant dense<0.000000e+00> : vector<120xf32>
    %106 = vector.multi_reduction <add>, %105, %cst_41 [1] : vector<120x32xf32> to vector<120xf32>
    %107 = vector.shape_cast %106 : vector<120xf32> to vector<120x1xf32>
    %cst_42 = arith.constant 3.125000e-02 : f32
    %108 = vector.broadcast %cst_42 : f32 to vector<120x1xf32>
    %109 = arith.mulf %104, %108 : vector<120x1xf32>
    %cst_43 = arith.constant 3.125000e-02 : f32
    %110 = vector.broadcast %cst_43 : f32 to vector<120x1xf32>
    %111 = arith.mulf %107, %110 : vector<120x1xf32>
    %112 = arith.mulf %109, %109 : vector<120x1xf32>
    %113 = arith.subf %111, %112 : vector<120x1xf32>
    %cst_44 = arith.constant 0.000000e+00 : f32
    %114 = vector.broadcast %cst_44 : f32 to vector<120x1xf32>
    %115 = arith.maximumf %113, %114 : vector<120x1xf32>
    %116 = vector.broadcast %109 : vector<120x1xf32> to vector<120x32xf32>
    %117 = arith.subf %100, %116 : vector<120x32xf32>
    %cst_45 = arith.constant 9.99999974E-6 : f32
    %118 = vector.broadcast %cst_45 : f32 to vector<120x1xf32>
    %119 = arith.addf %115, %118 : vector<120x1xf32>
    %120 = math.rsqrt %119 : vector<120x1xf32>
    %121 = vector.broadcast %120 : vector<120x1xf32> to vector<120x32xf32>
    %122 = arith.mulf %117, %121 : vector<120x32xf32>
    %123 = vector.broadcast %101 : vector<1x32xf32> to vector<120x32xf32>
    %124 = arith.mulf %122, %123 : vector<120x32xf32>
    %125 = vector.broadcast %102 : vector<1x32xf32> to vector<120x32xf32>
    %126 = arith.addf %124, %125 : vector<120x32xf32>
    %c0_46 = arith.constant 0 : index
    %c0_47 = arith.constant 0 : index
    %127 = vector.load %arg9[%c0_46, %c0_47] : memref<120x32xf32, #tpu.memory_space<vmem>>, vector<120x32xf32>
    tpu.vector_store %arg9[%c0_46, %c0_47], %126 {strides = array<i32>} : memref<120x32xf32, #tpu.memory_space<vmem>>, vector<120x32xf32>,
    %c0_48 = arith.constant 0 : index
    %128 = memref.load %arg10[%c0_48] : memref<1xf32, #tpu.memory_space<smem>>
    memref.store %60, %arg10[%c0_48] : memref<1xf32, #tpu.memory_space<smem>>
    return
  }
}

</mosaic_0001>

<bundles_post_ra>
// kernel: tpu_custom_call.1
= control target key start
LH: loop header
LB: loop body
LE: loop exit
PB: predicated region body
PF: predicated region fallthrough
CT: control target
= control target key end

     0   :  { %16 = vsyncpa [#allocation3], 0  ;;  %s8181_s0 = inlined_call_operand.vmem [shape: f32[120,32], index: 0, kind: input, shape index: {}]   ;;  %s8182_s1 = inlined_call_operand.vmem [shape: f32[60,60], index: 1, kind: input, shape index: {}]   ;;  %s8183_s2 = inlined_call_operand.vmem [shape: bf16[8,32,48], index: 2, kind: input, shape index: {}]   ;;  %s8184_s3 = inlined_call_operand.vmem [shape: f32[1,32], index: 3, kind: input, shape index: {}]   ;;  %s8185_s4 = inlined_call_operand.vmem [shape: f32[1,32], index: 4, kind: input, shape index: {}]   ;;  %s8186_s5 = inlined_call_operand.hbm [shape: bf16[32,64], index: 5, kind: input, shape index: {}]   ;;  %s8187_s6 = inlined_call_operand.vmem [shape: bf16[64,32], index: 6, kind: input, shape index: {}]   ;;  %s8188_s7 = inlined_call_operand.vmem [shape: f32[1,32], index: 7, kind: input, shape index: {}]   ;;  %s8189_s8 = inlined_call_operand.vmem [shape: f32[1,32], index: 8, kind: input, shape index: {}]   ;;  %s8190_s9 = inlined_call_operand.vmem [shape: f32[120,32], index: 9, kind: output, shape index: {0}]   ;;  %s8191_s10 = inlined_call_operand.hbm [shape: f32[1], index: 10, kind: output, shape index: {1}]  }
   0x1   :  { %17 = vsyncpa [#allocation4], 0  ;;  %s5876_s13 = smov [#allocation2]   ;;  %s5840_s17 = scalar_lea.hbm %s8186_s5, 256 }
   0x2   :  { %s33_s14 = sshll.u32 %s5876_s13, 4  ;;  %p5841_p0 = scmp.ne.s32.totalorder %s8186_s5, %s5840_s17  ;;  %s34_s14 = int_to_ptr.vmem [resolvable:$true] %s33_s14 }
   0x3   :  { %p5844_p1 = scmp.lt.u32.totalorder %s5840_s17, %s8186_s5 }
   0x5   :  { %p5846_p2 = pnand %p5844_p1, %p5841_p0 }
   0x7   :  { %5849 = shalt.err (!%p5846_p2)
}
   0x8   :  { %s5850_s22 = scalar_lea.vmem %s34_s14, 256  ;;  %p5855_p4 = scmp.lt.s32.totalorder %s34_s14, %s34_s14 }
   0x9   :  { %p5851_p3 = scmp.ne.s32.totalorder %s34_s14, %s5850_s22  ;;  %p5856_p5 = scmp.lt.s32.totalorder %s5850_s22, %s5850_s22 }
   0xb   :  { %p5857_p6 = por %p5856_p5, %p5855_p4 }
   0xd   :  { %p5858_p7 = pnand %p5857_p6, %p5851_p3 }
   0xf   :  { %5861 = shalt.err (!%p5858_p7)
}
  0x10   :  { %s5877_s23 = smov 64   ;;  %s5878_s24 = smov 4  }
  0x11   :  { %39 = dma.hbm_to_vmem [thread:$0]  %s8186_s5, 256, %s34_s14, [#allocation3], %s5877_s23, %s5877_s23, %s5878_s24  }
  0x12   :  { %5872 = dma.done.wait [#allocation3], 256  }
  0x13   :  { %5873 = vsyncadd [#allocation3], 4294967040  ;;  %v5879_v0 = vmov 1983009808   ;;  %v93_v2 = vlaneseq  ;;  %v5479_v5 = vld [vmem:[%s8183_s2] sm:$0xff]   ;;  %v5480_v6 = vld [vmem:[%s8183_s2 + $0x10] sm:$0xff]  }
  0x14   :  { %v91_v1 = vunpack.c.l.s4 %v5879_v0  ;;  %5032 = vmatprep.subr.bf16.mxu0 %v5479_v5  ;;  %v5481_v7 = vld [vmem:[%s8183_s2 + $0x8] sm:$0xff]   ;;  %5044 = vmatprep.subr.bf16.mxu1 %v5480_v6  ;;  %v5482_v8 = vld [vmem:[%s8183_s2 + $0x18] sm:$0xff]   ;;  %v50_v10 = vld [vmem:[%s8181_s0] sm:$0xff]  ;;  %vm327_vm0 = vcmask 261120   ;;  %vm1067_vm1 = vcmask 64512   ;;  %s5881_s26 = smov 112  }
  0x15   :  { %v94_v4 = vshrl.u32 %v93_v2, 7  ;;  %5033 = vmatpush3.bf16.msra.mxu0 %v5479_v5  ;;  %5045 = vmatpush3.bf16.msra.mxu1 %v5480_v6  ;;  %v51_v11 = vld [vmem:[%s8181_s0 + $0x8] sm:$0xff]  ;;  %v52_v12 = vld [vmem:[%s8181_s0 + $0x10] sm:$0xff]  ;;  %v53_v15 = vld [vmem:[%s8181_s0 + $0x18] sm:$0xff]  ;;  %vm1990_vm2 = vcmask 1045504   ;;  %vm1460_vm3 = vcmask 490496  }
  0x16   :  { %v92_v3 = vunpack.c.0.s8 %v91_v1  ;;  %5034 = vmatprep.subr.bf16.mxu0 %v5481_v7  ;;  %5046 = vmatprep.subr.bf16.mxu1 %v5482_v8  ;;  %v73_v13 = vpack.c.bf16 %v51_v11, %v50_v10  ;;  %v4689_v14 = vpack.c.bf16 %v51_v11, %v51_v11  ;;  %v54_v16 = vld [vmem:[%s8181_s0 + $0x20] sm:$0xff]  ;;  %v55_v17 = vld [vmem:[%s8181_s0 + $0x28] sm:$0xff]  ;;  %v74_v18 = vpack.c.bf16 %v53_v15, %v52_v12  ;;  %v56_v22 = vld [vmem:[%s8181_s0 + $0x30] sm:$0xff]  ;;  %s5862_s20 = scalar_lea.hbm %s8191_s10, 16 }
  0x17   :  { %v4690_v19 = vpack.c.bf16 %v53_v15, %v53_v15  ;;  %v75_v20 = vpack.c.bf16 %v55_v17, %v54_v16  ;;  %v4691_v21 = vpack.c.bf16 %v55_v17, %v55_v17  ;;  %v57_v23 = vld [vmem:[%s8181_s0 + $0x38] sm:$0xff]  ;;  %v5483_v27 = vld [vmem:[%s8183_s2 + $0x20] sm:$0xff]   ;;  %v5484_v32 = vld [vmem:[%s8183_s2 + $0x30] sm:$0xff]   ;;  %vm1482_vm4 = vcmask 486400   ;;  %p5863_p8 = scmp.ne.s32.totalorder %s8191_s10, %s5862_s20  ;;  %p5866_p9 = scmp.lt.u32.totalorder %s5862_s20, %s8191_s10 }
  0x18   :  { %v5962_v9 = vsub.s32 %v92_v3, %v94_v4  ;;  %v76_v26 = vpack.c.bf16 %v57_v23, %v56_v22  ;;  %v4692_v35 = vpack.c.bf16 %v57_v23, %v57_v23  ;;  %v5485_v59 = vld [vmem:[%s8183_s2 + $0x28] sm:$0xff]   ;;  %v58_v60 = vld [vmem:[%s8181_s0 + $0x40] sm:$0xff]  ;;  %v5486_v62 = vld [vmem:[%s8183_s2 + $0x38] sm:$0xff]   ;;  %vm2381_vm5 = vcmask 257024  }
  0x19   :  { %5035 = vmatpush3.bf16.msra.mxu0 %v5481_v7  ;;  %5047 = vmatpush3.bf16.msra.mxu1 %v5482_v8  ;;  %v59_v61 = vld [vmem:[%s8181_s0 + $0x48] sm:$0xff]  ;;  %v5487_v1 = vld [vmem:[%s8183_s2 + $0x40] sm:$0xff]   ;;  %v5488_v2 = vld [vmem:[%s8183_s2 + $0x50] sm:$0xff]   ;;  %vm3726_vm6 = vcmask 1043456   ;;  %vm4249_vm7 = vcmask 523264   ;;  %p5868_p10 = pnand %p5866_p9, %p5863_p8 }
  0x1a   :  { %v96_v24 = vrot.slane %v73_v13, %v5962_v9  ;;  %v103_v25 = vrot.slane %v4689_v14, %v5962_v9  ;;  %v113_v28 = vrot.slane %v74_v18, %v5962_v9  ;;  %v120_v29 = vrot.slane %v4690_v19, %v5962_v9  ;;  %5056 = vmatprep.subr.bf16.mxu0 %v5483_v27  ;;  %v60_v4 = vld [vmem:[%s8181_s0 + $0x50] sm:$0xff]  ;;  %v61_v5 = vld [vmem:[%s8181_s0 + $0x58] sm:$0xff]  ;;  %v62_v7 = vld [vmem:[%s8181_s0 + $0x60] sm:$0xff] }
  0x1b   :  { %v130_v30 = vrot.slane %v75_v20, %v5962_v9  ;;  %v137_v31 = vrot.slane %v4691_v21, %v5962_v9  ;;  %v147_v36 = vrot.slane %v76_v26, %v5962_v9  ;;  %5068 = vmatprep.subr.bf16.mxu1 %v5484_v32  ;;  %v154_v50 = vrot.slane %v4692_v35, %v5962_v9  ;;  %v63_v8 = vld [vmem:[%s8181_s0 + $0x68] sm:$0xff]  ;;  %v5490_v26 = vld [vmem:[%s8183_s2 + $0x58] sm:$0xff]   ;;  %v5491_v35 = vld [vmem:[%s8183_s2 + $0x60] sm:$0xff]  }
  0x1c   :  { %v104_v33 = vcombine.high %v96_v24, %v96_v24  ;;  %v105_v34 = vcombine.high %v103_v25, %v103_v25  ;;  %v121_v37 = vcombine.high %v113_v28, %v113_v28  ;;  %v122_v38 = vcombine.high %v120_v29, %v120_v29 }
  0x1d   :  { %v138_v39 = vcombine.high %v130_v30, %v130_v30  ;;  %v139_v40 = vcombine.high %v137_v31, %v137_v31  ;;  %v155_v43 = vcombine.high %v147_v36, %v147_v36  ;;  %v313_v0 = vrot.slane %v154_v50, %v5962_v9 }
  0x1e   :  { %v248_v41 = vcombine.low %v96_v24, %v104_v33  ;;  %v249_v42 = vcombine.low %v103_v25, %v105_v34  ;;  %v265_v44 = vcombine.low %v113_v28, %v121_v37  ;;  %v266_v45 = vcombine.low %v120_v29, %v122_v38  ;;  %v5489_v24 = vld [vmem:[%s8183_s2 + $0x48] sm:$0xff]   ;;  %v64_v33 = vld [vmem:[%s8181_s0 + $0x70] sm:$0xff] }
  0x1f   :  { %v282_v46 = vcombine.low %v130_v30, %v138_v39  ;;  %v283_v47 = vcombine.low %v137_v31, %v139_v40  ;;  %v299_v51 = vcombine.low %v147_v36, %v155_v43  ;;  %v77_v3 = vpack.c.bf16 %v59_v61, %v58_v60  ;;  %v5492_v36 = vld [vmem:[%s8183_s2 + $0x70] sm:$0xff]  }
  0x20   :  { %v256_v48 = vrot.slane %v248_v41, %v5962_v9  ;;  %v263_v49 = vrot.slane %v249_v42, %v5962_v9  ;;  %v273_v52 = vrot.slane %v265_v44, %v5962_v9  ;;  %v280_v53 = vrot.slane %v266_v45, %v5962_v9 }
  0x21   :  { %v290_v54 = vrot.slane %v282_v46, %v5962_v9  ;;  %v297_v55 = vrot.slane %v283_v47, %v5962_v9  ;;  %v306_v63 = vrot.slane %v299_v51, %v5962_v9  ;;  %v4693_v10 = vpack.c.bf16 %v59_v61, %v59_v61 }
  0x22   :  { %v264_v56 = vcombine.low %v256_v48, %v263_v49  ;;  %v281_v57 = vcombine.low %v273_v52, %v280_v53  ;;  %v164_v11 = vrot.slane %v77_v3, %v5962_v9  ;;  %v78_v12 = vpack.c.bf16 %v61_v5, %v60_v4  ;;  %v5493_v52 = vld [vmem:[%s8183_s2 + $0x68] sm:$0xff]  }
  0x23   :  { %v298_v58 = vcombine.low %v290_v54, %v297_v55  ;;  %v314_v6 = vcombine.low %v306_v63, %v313_v0  ;;  %v156_v13 = vcombine.high %v154_v50, %v154_v50  ;;  %v171_v14 = vrot.slane %v4693_v10, %v5962_v9  ;;  %v5494_v55 = vld [vmem:[%s8183_s2 + $0x78] sm:$0xff]   ;;  %s5880_s2 = smov 120  }
  0x24   :  { %5036 = vmatprep.mubr.msk.bf16.mxu0 %vm327_vm0, %v264_v56  ;;  %5048 = vmatprep.mubr.msk.bf16.mxu1 %vm327_vm0, %v264_v56  ;;  %v172_v15 = vcombine.high %v164_v11, %v164_v11  ;;  %v79_v16 = vpack.c.bf16 %v63_v8, %v62_v7  ;;  %v4694_v17 = vpack.c.bf16 %v61_v5, %v61_v5 }
  0x25   :  { %5037 = vmatmul.mubr.msk.bf16.vlgmr.msra.gmra.mrb[0].mxu0 %vm327_vm0, %v281_v57  ;;  %5049 = vmatmul.mubr.msk.bf16.vlgmr.msra.gmra.mrb[0].mxu1 %vm327_vm0, %v281_v57  ;;  %v181_v18 = vrot.slane %v78_v12, %v5962_v9  ;;  %v636_v19 = vcombine.low %v156_v13, %v164_v11  ;;  %v4695_v21 = vpack.c.bf16 %v63_v8, %v63_v8 }
  0x26   :  { %5040 = vmatprep.mubr.msk.bf16.mxu0 %vm327_vm0, %v298_v58  ;;  %5052 = vmatprep.mubr.msk.bf16.mxu1 %vm327_vm0, %v298_v58  ;;  %v637_v20 = vcombine.low %v172_v15, %v171_v14  ;;  %v198_v22 = vrot.slane %v79_v16, %v5962_v9  ;;  %v188_v23 = vrot.slane %v4694_v17, %v5962_v9 }
  0x27   :  { %5057 = vmatpush3.bf16.msra.mxu0 %v5483_v27  ;;  %5069 = vmatpush3.bf16.msra.mxu1 %v5484_v32  ;;  %v189_v25 = vcombine.high %v181_v18, %v181_v18  ;;  %v173_v27 = vcombine.high %v171_v14, %v171_v14  ;;  %v644_v28 = vrot.slane %v636_v19, %v5962_v9 }
  0x28   :  { %5058 = vmatprep.subr.bf16.mxu0 %v5485_v59  ;;  %5070 = vmatprep.subr.bf16.mxu1 %v5486_v62  ;;  %v190_v29 = vcombine.high %v188_v23, %v188_v23  ;;  %v651_v30 = vrot.slane %v637_v20, %v5962_v9  ;;  %v205_v31 = vrot.slane %v4695_v21, %v5962_v9 }
  0x29   :  { %v206_v32 = vcombine.high %v198_v22, %v198_v22  ;;  %v654_v34 = vcombine.low %v189_v25, %v188_v23  ;;  %v653_v37 = vcombine.low %v173_v27, %v181_v18  ;;  %v80_v38 = vpack.c.bf16 %v64_v33, %v64_v33 }
  0x2a   :  { %v652_v39 = vcombine.low %v644_v28, %v651_v30  ;;  %v670_v40 = vcombine.low %v190_v29, %v198_v22  ;;  %v207_v44 = vcombine.high %v205_v31, %v205_v31 }
  0x2b   :  { %5059 = vmatpush3.bf16.msra.mxu0 %v5485_v59  ;;  %5071 = vmatpush3.bf16.msra.mxu1 %v5486_v62  ;;  %v671_v41 = vcombine.low %v206_v32, %v205_v31  ;;  %v668_v42 = vrot.slane %v654_v34, %v5962_v9  ;;  %v661_v43 = vrot.slane %v653_v37, %v5962_v9 }
  0x2c   :  { %5080 = vmatprep.subr.bf16.mxu0 %v5487_v1  ;;  %5092 = vmatprep.subr.bf16.mxu1 %v5488_v2  ;;  %v214_v45 = vrot.slane %v80_v38, %v5962_v9  ;;  %v678_v46 = vrot.slane %v670_v40, %v5962_v9 }
  0x2d   :  { %5041 = vmatmul.mubr.msk.bf16.gmra.mrb[4].mxu0 %vm327_vm0, %v314_v6  ;;  %5053 = vmatmul.mubr.msk.bf16.gmra.mrb[4].mxu1 %vm327_vm0, %v314_v6  ;;  %v685_v47 = vrot.slane %v671_v41, %v5962_v9  ;;  %v669_v48 = vcombine.low %v661_v43, %v668_v42 }
  0x2e   :  { %5060 = vmatprep.mubr.msk.bf16.mxu0 %vm327_vm0, %v264_v56  ;;  %5072 = vmatprep.mubr.msk.bf16.mxu1 %vm327_vm0, %v264_v56  ;;  %v215_v49 = vcombine.high %v214_v45, %v214_v45  ;;  %v687_v50 = vcombine.low %v207_v44, %v214_v45 }
  0x2f   :  { %v686_v51 = vcombine.low %v678_v46, %v685_v47 }
  0x30   :  { %v694_v53 = vrot.slane %v687_v50, %v5962_v9  ;;  %v701_v54 = vrot.slane %v215_v49, %v5962_v9 }
  0x32   :  { %v702_v56 = vcombine.low %v694_v53, %v701_v54 }
  0x35   :  { %5061 = vmatmul.mubr.msk.bf16.vlgmr.msra.gmra.mrb[8].mxu0 %vm327_vm0, %v281_v57  ;;  %5073 = vmatmul.mubr.msk.bf16.vlgmr.msra.gmra.mrb[8].mxu1 %vm327_vm0, %v281_v57 }
  0x36   :  { %5064 = vmatprep.mubr.msk.bf16.mxu0 %vm327_vm0, %v298_v58  ;;  %5076 = vmatprep.mubr.msk.bf16.mxu1 %vm327_vm0, %v298_v58 }
  0x37   :  { %5081 = vmatpush3.bf16.msra.mxu0 %v5487_v1  ;;  %5093 = vmatpush3.bf16.msra.mxu1 %v5488_v2 }
  0x38   :  { %5082 = vmatprep.subr.bf16.mxu0 %v5489_v24  ;;  %5094 = vmatprep.subr.bf16.mxu1 %v5490_v26 }
  0x3b   :  { %5083 = vmatpush3.bf16.msra.mxu0 %v5489_v24  ;;  %5095 = vmatpush3.bf16.msra.mxu1 %v5490_v26 }
  0x3c   :  { %5104 = vmatprep.subr.bf16.mxu0 %v5491_v35  ;;  %5116 = vmatprep.subr.bf16.mxu1 %v5492_v36 }
  0x3d   :  { %5065 = vmatmul.mubr.msk.bf16.gmra.mrb[12].mxu0 %vm327_vm0, %v314_v6  ;;  %5077 = vmatmul.mubr.msk.bf16.gmra.mrb[12].mxu1 %vm327_vm0, %v314_v6 }
  0x3e   :  { %5084 = vmatprep.mubr.msk.bf16.mxu0 %vm327_vm0, %v652_v39  ;;  %5096 = vmatprep.mubr.msk.bf16.mxu1 %vm327_vm0, %v652_v39 }
  0x45   :  { %5085 = vmatmul.mubr.msk.bf16.vlgmr.msra.gmra.mrb[16].mxu0 %vm327_vm0, %v669_v48  ;;  %5097 = vmatmul.mubr.msk.bf16.vlgmr.msra.gmra.mrb[16].mxu1 %vm327_vm0, %v669_v48 }
  0x46   :  { %5088 = vmatprep.mubr.msk.bf16.mxu0 %vm327_vm0, %v686_v51  ;;  %5105 = vmatpush3.bf16.msra.mxu0 %v5491_v35 }
  0x47   :  { %5100 = vmatprep.mubr.msk.bf16.mxu1 %vm327_vm0, %v686_v51  ;;  %5106 = vmatprep.subr.bf16.mxu0 %v5493_v52 }
  0x48   :  { %5117 = vmatpush3.bf16.msra.mxu1 %v5492_v36 }
  0x49   :  { %5118 = vmatprep.subr.bf16.mxu1 %v5494_v55 }
  0x4a   :  { %5107 = vmatpush3.bf16.msra.mxu0 %v5493_v52 }
  0x4c   :  { %5119 = vmatpush3.bf16.msra.mxu1 %v5494_v55 }
  0x4d   :  { %5089 = vmatmul.mubr.msk.bf16.gmra.mrb[20].mxu0 %vm327_vm0, %v702_v56  ;;  %5101 = vmatmul.mubr.msk.bf16.gmra.mrb[20].mxu1 %vm327_vm0, %v702_v56 }
  0x4e   :  { %5108 = vmatprep.mubr.msk.bf16.mxu0 %vm327_vm0, %v652_v39  ;;  %5120 = vmatprep.mubr.msk.bf16.mxu1 %vm327_vm0, %v652_v39 }
  0x55   :  { %5109 = vmatmul.mubr.msk.bf16.vlgmr.msra.gmra.mrb[24].mxu0 %vm327_vm0, %v669_v48  ;;  %5121 = vmatmul.mubr.msk.bf16.vlgmr.msra.gmra.mrb[24].mxu1 %vm327_vm0, %v669_v48 }
  0x56   :  { %5112 = vmatprep.mubr.msk.bf16.mxu0 %vm327_vm0, %v686_v51  ;;  %5124 = vmatprep.mubr.msk.bf16.mxu1 %vm327_vm0, %v686_v51 }
  0x5d   :  { %5113 = vmatmul.mubr.msk.bf16.gmra.mrb[28].mxu0 %vm327_vm0, %v702_v56  ;;  %5125 = vmatmul.mubr.msk.bf16.gmra.mrb[28].mxu1 %vm327_vm0, %v702_v56 }
  0xf8   :  { %v5038_v9 = vpop.f32.mrb[0].mxu0  ;;  %v5050_v57 = vpop.f32.mrb[0].mxu1 }
  0xf9   :  { %v374_v58 = vpop.f32.mrb[1].mxu0  ;;  %v451_v59 = vpop.f32.mrb[1].mxu1 }
  0xfa   :  { %v5039_v60 = vpop.f32.mrb[2].mxu0  ;;  %v5051_v61 = vpop.f32.mrb[2].mxu1 }
  0xfb   :  { %v6108_v62 = vpack.c.bf16 %v5039_v60, %v5038_v9  ;;  %v377_v63 = vpop.f32.mrb[3].mxu0  ;;  %v6110_v0 = vpack.c.bf16 %v5051_v61, %v5050_v57  ;;  %v454_v1 = vpop.f32.mrb[3].mxu1 }
  0xfc   :  { %v1023_v2 = vpack.c.bf16 %v377_v63, %v374_v58  ;;  %v1027_v3 = vpack.c.bf16 %v454_v1, %v451_v59 }
  0xfd   :  { %1061 = vrot.lane.b32.xlu1 %v6108_v62, %s5880_s2 }
  0xfe   :  { %1059 = vrot.lane.b32.xlu0 %v1023_v2, %s5880_s2  ;;  %5136 = vmatprep.mubr.msk.bf16.mxu0 %vm1067_vm1, %v1023_v2 }
  0xff   :  { %5152 = vmatprep.mubr.msk.bf16.mxu1 %vm1067_vm1, %v1027_v3 }
 0x100   :  { %v5042_v4 = vpop.f32.mrb[4].mxu0  ;;  %v5054_v5 = vpop.f32.mrb[4].mxu1 }
 0x101   :  { %v467_v6 = vpop.f32.mrb[5].mxu1  ;;  %1163 = vrot.lane.b32.xlu1 %v6110_v0, %s5880_s2  ;;  %v390_v7 = vpop.f32.mrb[5].mxu0 }
 0x102   :  { %v5055_v8 = vpop.f32.mrb[6].mxu1  ;;  %1161 = vrot.lane.b32.xlu0 %v1027_v3, %s5880_s2  ;;  %v5043_v10 = vpop.f32.mrb[6].mxu0 }
 0x103   :  { %v6120_v11 = vpack.c.bf16 %v5055_v8, %v5054_v5  ;;  %v6122_v12 = vpack.c.bf16 %v5043_v10, %v5042_v4  ;;  %v393_v13 = vpop.f32.mrb[7].mxu0  ;;  %v470_v14 = vpop.f32.mrb[7].mxu1 }
 0x104   :  { %v6124_v15 = vpack.c.bf16 %v393_v13, %v390_v7  ;;  %v6126_v16 = vpack.c.bf16 %v470_v14, %v467_v6 }
 0x106   :  { %1165 = vrot.lane.b32.xlu1 %v6126_v16, %s5880_s2  ;;  %1063 = vrot.lane.b32.xlu0 %v6124_v15, %s5880_s2 }
 0x108   :  { %v5062_v17 = vpop.f32.mrb[8].mxu0  ;;  %v5074_v18 = vpop.f32.mrb[8].mxu1 }
 0x109   :  { %v528_v19 = vpop.f32.mrb[9].mxu0  ;;  %v605_v20 = vpop.f32.mrb[9].mxu1 }
 0x10a   :  { %v5075_v21 = vpop.f32.mrb[10].mxu1  ;;  %1167 = vrot.lane.b32.xlu1 %v6120_v11, %s5880_s2  ;;  %1065 = vrot.lane.b32.xlu0 %v6122_v12, %s5880_s2  ;;  %v5063_v22 = vpop.f32.mrb[10].mxu0 }
 0x10b   :  { %v6136_v23 = vpack.c.bf16 %v5075_v21, %v5074_v18  ;;  %v6138_v24 = vpack.c.bf16 %v5063_v22, %v5062_v17  ;;  %v531_v25 = vpop.f32.mrb[11].mxu0  ;;  %v608_v26 = vpop.f32.mrb[11].mxu1 }
 0x10c   :  { %v6140_v27 = vpack.c.bf16 %v531_v25, %v528_v19  ;;  %v6142_v28 = vpack.c.bf16 %v608_v26, %v605_v20 }
 0x10e   :  { %1363 = vrot.lane.b32.xlu1 %v6142_v28, %s5880_s2  ;;  %1262 = vrot.lane.b32.xlu0 %v6140_v27, %s5880_s2 }
 0x110   :  { %v5066_v29 = vpop.f32.mrb[12].mxu0  ;;  %v5078_v30 = vpop.f32.mrb[12].mxu1 }
 0x111   :  { %v544_v31 = vpop.f32.mrb[13].mxu0  ;;  %v621_v32 = vpop.f32.mrb[13].mxu1 }
 0x112   :  { %v5079_v33 = vpop.f32.mrb[14].mxu1  ;;  %1365 = vrot.lane.b32.xlu1 %v6136_v23, %s5880_s2  ;;  %1264 = vrot.lane.b32.xlu0 %v6138_v24, %s5880_s2  ;;  %v5067_v34 = vpop.f32.mrb[14].mxu0 }
 0x113   :  { %v6152_v35 = vpack.c.bf16 %v5079_v33, %v5078_v30  ;;  %v6154_v36 = vpack.c.bf16 %v5067_v34, %v5066_v29  ;;  %v547_v37 = vpop.f32.mrb[15].mxu0  ;;  %v624_v38 = vpop.f32.mrb[15].mxu1 }
 0x114   :  { %v6156_v39 = vpack.c.bf16 %v547_v37, %v544_v31  ;;  %v6158_v40 = vpack.c.bf16 %v624_v38, %v621_v32 }
 0x116   :  { %1367 = vrot.lane.b32.xlu1 %v6158_v40, %s5880_s2  ;;  %1266 = vrot.lane.b32.xlu0 %v6156_v39, %s5880_s2 }
 0x118   :  { %v5086_v41 = vpop.f32.mrb[16].mxu0  ;;  %v5098_v42 = vpop.f32.mrb[16].mxu1 }
 0x119   :  { %v761_v43 = vpop.f32.mrb[17].mxu0  ;;  %v838_v44 = vpop.f32.mrb[17].mxu1 }
 0x11a   :  { %1369 = vrot.lane.b32.xlu1 %v6152_v35, %s5880_s2  ;;  %1268 = vrot.lane.b32.xlu0 %v6154_v36, %s5880_s2  ;;  %v5087_v45 = vpop.f32.mrb[18].mxu0  ;;  %v5099_v46 = vpop.f32.mrb[18].mxu1 }
 0x11b   :  { %v6196_v47 = vpack.c.bf16 %v5087_v45, %v5086_v41  ;;  %v6198_v48 = vpack.c.bf16 %v5099_v46, %v5098_v42  ;;  %v764_v49 = vpop.f32.mrb[19].mxu0  ;;  %v841_v50 = vpop.f32.mrb[19].mxu1 }
 0x11c   :  { %v6200_v51 = vpack.c.bf16 %v764_v49, %v761_v43  ;;  %v6202_v53 = vpack.c.bf16 %v841_v50, %v838_v44 }
 0x11e   :  { %1967 = vrot.lane.b32.xlu1 %v1023_v2, %s5881_s26  ;;  %1969 = vrot.lane.b32.xlu0 %v6108_v62, %s5881_s26 }
 0x120   :  { %v5090_v52 = vpop.f32.mrb[20].mxu0  ;;  %v5102_v54 = vpop.f32.mrb[20].mxu1 }
 0x121   :  { %v777_v55 = vpop.f32.mrb[21].mxu0  ;;  %v854_v56 = vpop.f32.mrb[21].mxu1 }
 0x122   :  { %2059 = vrot.lane.b32.xlu1 %v1027_v3, %s5881_s26  ;;  %2061 = vrot.lane.b32.xlu0 %v6110_v0, %s5881_s26  ;;  %v5091_v9 = vpop.f32.mrb[22].mxu0  ;;  %v5103_v57 = vpop.f32.mrb[22].mxu1 }
 0x123   :  { %v6208_v58 = vpack.c.bf16 %v5091_v9, %v5090_v52  ;;  %v780_v59 = vpop.f32.mrb[23].mxu0  ;;  %v6210_v60 = vpack.c.bf16 %v5103_v57, %v5102_v54  ;;  %v857_v61 = vpop.f32.mrb[23].mxu1 }
 0x124   :  { %v6212_v63 = vpack.c.bf16 %v780_v59, %v777_v55  ;;  %v6214_v2 = vpack.c.bf16 %v857_v61, %v854_v56 }
 0x125   :  { %8226 = vst [vmem:[#allocation8_spill] sm:$0xff] %v6208_v58  ;;  %8227 = vst [vmem:[#allocation9_spill] sm:$0xff] %v6210_v60 }
 0x126   :  { %1971 = vrot.lane.b32.xlu1 %v6124_v15, %s5881_s26  ;;  %2063 = vrot.lane.b32.xlu0 %v6126_v16, %s5881_s26  ;;  %8228 = vst [vmem:[#allocation10_spill] sm:$0xff] %v6212_v63 }
 0x128   :  { %v5110_v1 = vpop.f32.mrb[24].mxu0  ;;  %v5122_v3 = vpop.f32.mrb[24].mxu1 }
 0x129   :  { %v915_v4 = vpop.f32.mrb[25].mxu0  ;;  %v992_v5 = vpop.f32.mrb[25].mxu1 }
 0x12a   :  { %1973 = vrot.lane.b32.xlu1 %v6122_v12, %s5881_s26  ;;  %2152 = vrot.lane.b32.xlu0 %v6138_v24, %s5881_s26  ;;  %v5111_v6 = vpop.f32.mrb[26].mxu0  ;;  %v5123_v7 = vpop.f32.mrb[26].mxu1 }
 0x12b   :  { %v6218_v8 = vpack.c.bf16 %v5111_v6, %v5110_v1  ;;  %v918_v10 = vpop.f32.mrb[27].mxu0  ;;  %v6220_v13 = vpack.c.bf16 %v5123_v7, %v5122_v3  ;;  %v995_v14 = vpop.f32.mrb[27].mxu1 }
 0x12c   :  { %v6222_v17 = vpack.c.bf16 %v918_v10, %v915_v4  ;;  %v6224_v18 = vpack.c.bf16 %v995_v14, %v992_v5 }
 0x12d   :  { %8229 = vst [vmem:[#allocation11_spill] sm:$0xff] %v6218_v8  ;;  %8230 = vst [vmem:[#allocation12_spill] sm:$0xff] %v6220_v13 }
 0x12e   :  { %2065 = vrot.lane.b32.xlu1 %v6120_v11, %s5881_s26  ;;  %2494 = vrot.lane.b32.xlu0 %v6202_v53, %s5880_s2  ;;  %8231 = vst [vmem:[#allocation13_spill] sm:$0xff] %v6222_v17  ;;  %8232 = vst [vmem:[#allocation14_spill] sm:$0xff] %v6224_v18 }
 0x130   :  { %v5114_v19 = vpop.f32.mrb[28].mxu0  ;;  %v5126_v20 = vpop.f32.mrb[28].mxu1 }
 0x131   :  { %v931_v21 = vpop.f32.mrb[29].mxu0  ;;  %v1008_v22 = vpop.f32.mrb[29].mxu1 }
 0x132   :  { %2150 = vrot.lane.b32.xlu1 %v6140_v27, %s5881_s26  ;;  %v5115_v25 = vpop.f32.mrb[30].mxu0  ;;  %v5127_v26 = vpop.f32.mrb[30].mxu1 }
 0x133   :  { %v6228_v29 = vpack.c.bf16 %v5115_v25, %v5114_v19  ;;  %v934_v30 = vpop.f32.mrb[31].mxu0  ;;  %v6230_v31 = vpack.c.bf16 %v5127_v26, %v5126_v20  ;;  %v1011_v32 = vpop.f32.mrb[31].mxu1 }
 0x134   :  { %v6232_v33 = vpack.c.bf16 %v934_v30, %v931_v21  ;;  %v6234_v34 = vpack.c.bf16 %v1011_v32, %v1008_v22 }
 0x135   :  { %8233 = vst [vmem:[#allocation15_spill] sm:$0xff] %v6228_v29  ;;  %8234 = vst [vmem:[#allocation16_spill] sm:$0xff] %v6230_v31 }
 0x136   :  { %2241 = vrot.lane.b32.xlu1 %v6142_v28, %s5881_s26  ;;  %8235 = vst [vmem:[#allocation17_spill] sm:$0xff] %v6232_v33  ;;  %8236 = vst [vmem:[#allocation18_spill] sm:$0xff] %v6234_v34 }
 0x13a   :  { %2243 = vrot.lane.b32.xlu1 %v6136_v23, %s5881_s26 }
 0x13e   :  { %2156 = vrot.lane.b32.xlu1 %v6154_v36, %s5881_s26 }
 0x142   :  { %2247 = vrot.lane.b32.xlu1 %v6152_v35, %s5881_s26 }
 0x146   :  { %2154 = vrot.lane.b32.xlu1 %v6156_v39, %s5881_s26 }
 0x14a   :  { %2245 = vrot.lane.b32.xlu1 %v6158_v40, %s5881_s26 }
 0x14e   :  { %2395 = vrot.lane.b32.xlu1 %v6196_v47, %s5880_s2 }
 0x152   :  { %2496 = vrot.lane.b32.xlu1 %v6198_v48, %s5880_s2 }
 0x156   :  { %2393 = vrot.lane.b32.xlu1 %v6200_v51, %s5880_s2 }
 0x16f   :  { %v1062_v37 = vpop.permute.xlu1 %1061 }
 0x170   :  { %v1060_v38 = vpop.permute.xlu0 %1059  ;;  %v1084_v45 = vsel %vm1067_vm1, %v1062_v37, 0 }
 0x171   :  { %5428 = vmatprep.subr.msk.bf16.mxu0 %vm1067_vm1, %v1060_v38  ;;  %v1081_v41 = vsel %vm1067_vm1, %v1060_v38, 0 }
 0x172   :  { %5129 = vmatpush3.bf16.xpose.msra.mxu0 %v1081_v41 }
 0x173   :  { %5429 = vmatprep.subr.msk.bf16.mxu0 %vm1067_vm1, %v1062_v37  ;;  %v1164_v43 = vpop.permute.xlu1 %1163 }
 0x174   :  { %v1162_v42 = vpop.permute.xlu0 %1161  ;;  %v1185_v50 = vsel %vm1067_vm1, %v1164_v43, 0 }
 0x175   :  { %5432 = vmatprep.subr.msk.bf16.mxu1 %vm1067_vm1, %v1162_v42  ;;  %v1182_v44 = vsel %vm1067_vm1, %v1162_v42, 0 }
 0x176   :  { %5145 = vmatpush3.bf16.xpose.msra.mxu1 %v1182_v44 }
 0x177   :  { %5433 = vmatprep.subr.msk.bf16.mxu1 %vm1067_vm1, %v1164_v43 }
 0x178   :  { %v1064_v46 = vpop.permute.xlu0 %1063  ;;  %v1166_v49 = vpop.permute.xlu1 %1165 }
 0x179   :  { %v1087_v54 = vsel %vm1067_vm1, %v1064_v46, 0  ;;  %v1188_v56 = vsel %vm1067_vm1, %v1166_v49, 0 }
 0x17a   :  { %5131 = vmatpush3.bf16.xpose.msra.mxu0 %v1084_v45 }
 0x17b   :  { %5430 = vmatprep.subr.msk.bf16.mxu0 %vm1067_vm1, %v1064_v46 }
 0x17c   :  { %v1168_v52 = vpop.permute.xlu1 %1167  ;;  %v1066_v55 = vpop.permute.xlu0 %1065 }
 0x17d   :  { %v1090_v57 = vsel %vm1067_vm1, %v1066_v55, 0  ;;  %v1191_v1 = vsel %vm1067_vm1, %v1168_v52, 0 }
 0x17e   :  { %5147 = vmatpush3.bf16.xpose.msra.mxu1 %v1185_v50 }
 0x17f   :  { %5434 = vmatprep.subr.msk.bf16.mxu1 %vm1067_vm1, %v1166_v49 }
 0x180   :  { %v1364_v9 = vpop.permute.xlu1 %1363  ;;  %v1263_v59 = vpop.permute.xlu0 %1262 }
 0x181   :  { %v1283_v3 = vsel %vm1067_vm1, %v1263_v59, 0  ;;  %v1384_v6 = vsel %vm1067_vm1, %v1364_v9, 0 }
 0x182   :  { %5133 = vmatpush3.bf16.xpose.msra.mxu0 %v1087_v54 }
 0x183   :  { %5431 = vmatprep.subr.msk.bf16.mxu0 %vm1067_vm1, %v1066_v55 }
 0x184   :  { %v1366_v61 = vpop.permute.xlu1 %1365  ;;  %v1265_v4 = vpop.permute.xlu0 %1264 }
 0x186   :  { %5149 = vmatpush3.bf16.xpose.msra.mxu1 %v1188_v56 }
 0x187   :  { %5435 = vmatprep.subr.msk.bf16.mxu1 %vm1067_vm1, %v1168_v52 }
 0x188   :  { %v1368_v5 = vpop.permute.xlu1 %1367  ;;  %v1267_v7 = vpop.permute.xlu0 %1266 }
 0x18a   :  { %5135 = vmatpush3.bf16.xpose.msra.mxu0 %v1090_v57 }
 0x18b   :  { %5436 = vmatprep.subr.msk.bf16.mxu0 %vm1067_vm1, %v1263_v59 }
 0x18c   :  { %v1269_v10 = vpop.permute.xlu0 %1268 }
 0x18e   :  { %5151 = vmatpush3.bf16.xpose.msra.mxu1 %v1191_v1 }
 0x18f   :  { %5440 = vmatprep.subr.msk.bf16.mxu1 %vm1067_vm1, %v1364_v9 }
 0x190   :  { %v1970_v20 = vpop.permute.xlu0 %1969 }
 0x191   :  { %5137 = vmatmul.mubr.msk.bf16.vlgmr.msra.gmra.mrb[32].mxu0 %vm1067_vm1, %v6108_v62  ;;  %v1370_v62 = vpop.permute.xlu1 %1369 }
 0x192   :  { %5140 = vmatprep.mubr.msk.bf16.mxu0 %vm1067_vm1, %v6124_v15  ;;  %5161 = vmatpush3.bf16.xpose.msra.mxu0 %v1283_v3  ;;  %v1286_v15 = vsel %vm1067_vm1, %v1265_v4, 0 }
 0x193   :  { %5437 = vmatprep.subr.msk.bf16.mxu0 %vm1067_vm1, %v1265_v4 }
 0x194   :  { %v2062_v22 = vpop.permute.xlu0 %2061 }
 0x195   :  { %5153 = vmatmul.mubr.msk.bf16.vlgmr.msra.gmra.mrb[32].mxu1 %vm1067_vm1, %v6110_v0  ;;  %v1387_v0 = vsel %vm1067_vm1, %v1366_v61, 0 }
 0x196   :  { %5156 = vmatprep.mubr.msk.bf16.mxu1 %vm1067_vm1, %v6126_v16  ;;  %5177 = vmatpush3.bf16.xpose.msra.mxu1 %v1384_v6  ;;  %v1968_v16 = vpop.permute.xlu1 %1967 }
 0x197   :  { %5441 = vmatprep.subr.msk.bf16.mxu1 %vm1067_vm1, %v1366_v61 }
 0x199   :  { %5141 = vmatmul.mubr.msk.bf16.gmra.mrb[36].mxu0 %vm1067_vm1, %v6122_v12  ;;  %v1289_v12 = vsel %vm1067_vm1, %v1267_v7, 0 }
 0x19a   :  { %5163 = vmatpush3.bf16.xpose.msra.mxu0 %v1286_v15  ;;  %5168 = vmatprep.mubr.msk.bf16.mxu0 %vm1067_vm1, %v6140_v27  ;;  %v1390_v27 = vsel %vm1067_vm1, %v1368_v5, 0  ;;  %v2060_v14 = vpop.permute.xlu1 %2059 }
 0x19b   :  { %5438 = vmatprep.subr.msk.bf16.mxu0 %vm1067_vm1, %v1267_v7 }
 0x19d   :  { %5157 = vmatmul.mubr.msk.bf16.gmra.mrb[36].mxu1 %vm1067_vm1, %v6120_v11  ;;  %v1292_v11 = vsel %vm1067_vm1, %v1269_v10, 0 }
 0x19e   :  { %5179 = vmatpush3.bf16.xpose.msra.mxu1 %v1387_v0  ;;  %5184 = vmatprep.mubr.msk.bf16.mxu1 %vm1067_vm1, %v6142_v28  ;;  %v1972_v19 = vpop.permute.xlu1 %1971  ;;  %v1393_v28 = vsel %vm1067_vm1, %v1370_v62, 0 }
 0x19f   :  { %5442 = vmatprep.subr.msk.bf16.mxu1 %vm1067_vm1, %v1368_v5 }
 0x1a2   :  { %5165 = vmatpush3.bf16.xpose.msra.mxu0 %v1289_v12  ;;  %v1974_v21 = vpop.permute.xlu1 %1973 }
 0x1a3   :  { %5439 = vmatprep.subr.msk.bf16.mxu0 %vm1067_vm1, %v1269_v10 }
 0x1a6   :  { %5181 = vmatpush3.bf16.xpose.msra.mxu1 %v1390_v27  ;;  %v2066_v25 = vpop.permute.xlu1 %2065 }
 0x1a7   :  { %5443 = vmatprep.subr.msk.bf16.mxu1 %vm1067_vm1, %v1370_v62 }
 0x1aa   :  { %5167 = vmatpush3.bf16.xpose.msra.mxu0 %v1292_v11 }
 0x1ab   :  { %5192 = vmatprep.subr.bf16.mxu0 %v1968_v16 }
 0x1ae   :  { %5183 = vmatpush3.bf16.xpose.msra.mxu1 %v1393_v28 }
 0x1af   :  { %5208 = vmatprep.subr.bf16.mxu1 %v2060_v14 }
 0x1b1   :  { %5169 = vmatmul.mubr.msk.bf16.vlgmr.msra.gmra.mrb[40].mxu0 %vm1067_vm1, %v6138_v24  ;;  %v2064_v24 = vpop.permute.xlu0 %2063 }
 0x1b2   :  { %5172 = vmatprep.mubr.msk.bf16.mxu0 %vm1067_vm1, %v6156_v39  ;;  %5193 = vmatpush3.bf16.msra.mxu0 %v1968_v16  ;;  %v6297_v39 = vpop.permute.xlu1 %2150 }
 0x1b3   :  { %5194 = vmatprep.subr.bf16.mxu0 %v1970_v20 }
 0x1b5   :  { %5185 = vmatmul.mubr.msk.bf16.vlgmr.msra.gmra.mrb[40].mxu1 %vm1067_vm1, %v6136_v23  ;;  %v1992_v23 = vsel %vm1990_vm2, %v1974_v21, 0 }
 0x1b6   :  { %5188 = vmatprep.mubr.msk.bf16.mxu1 %vm1067_vm1, %v6158_v40  ;;  %5195 = vmatpush3.bf16.msra.mxu0 %v1970_v20  ;;  %v6305_v40 = vpop.permute.xlu1 %2241 }
 0x1b7   :  { %5209 = vmatpush3.bf16.msra.mxu1 %v2060_v14  ;;  %5196 = vmatprep.subr.bf16.mxu0 %v1972_v19  ;;  %8237 = vst [vmem:[#allocation19_spill] sm:$0xff] %v6305_v40 }
 0x1b8   :  { %5210 = vmatprep.subr.bf16.mxu1 %v2062_v22 }
 0x1b9   :  { %5173 = vmatmul.mubr.msk.bf16.gmra.mrb[44].mxu0 %vm1067_vm1, %v6154_v36  ;;  %v2083_v36 = vsel %vm1990_vm2, %v2066_v25, 0 }
 0x1ba   :  { %5197 = vmatpush3.bf16.msra.mxu0 %v1972_v19 }
 0x1bb   :  { %5211 = vmatpush3.bf16.msra.mxu1 %v2062_v22  ;;  %5444 = vmatprep.subr.msk.bf16.mxu0 %vm1990_vm2, %v1974_v21 }
 0x1bc   :  { %5212 = vmatprep.subr.bf16.mxu1 %v2064_v24 }
 0x1bd   :  { %5189 = vmatmul.mubr.msk.bf16.gmra.mrb[44].mxu1 %vm1067_vm1, %v6152_v35 }
 0x1be   :  { %5199 = vmatpush3.bf16.msra.mxu0 %v1992_v23 }
 0x1bf   :  { %5213 = vmatpush3.bf16.msra.mxu1 %v2064_v24  ;;  %5224 = vmatprep.subr.bf16.mxu0 %v6297_v39 }
 0x1c0   :  { %5445 = vmatprep.subr.msk.bf16.mxu1 %vm1990_vm2, %v2066_v25 }
 0x1c3   :  { %5215 = vmatpush3.bf16.msra.mxu1 %v2083_v36 }
 0x1c4   :  { %5240 = vmatprep.subr.bf16.mxu1 %v6305_v40 }
 0x264   :  { %v6308_v26 = vpop.f32.mrb[32].mxu0 }
 0x265   :  { %v6310_v30 = vpop.f32.mrb[33].mxu0  ;;  %v1467_v35 = vsel %vm1460_vm3, %v6308_v26, -inf }
 0x266   :  { %1468 = vmax.xlane.f32.xlu0 %v1467_v35  ;;  %v6314_v32 = vpop.f32.mrb[34].mxu0  ;;  %v1461_v43 = vsel %vm1460_vm3, %v6310_v30, -inf }
 0x267   :  { %v6316_v37 = vpop.f32.mrb[35].mxu0  ;;  %v1470_v52 = vsel %vm1460_vm3, %v6314_v32, -inf }
 0x268   :  { %v6318_v38 = vpop.f32.mrb[32].mxu1  ;;  %v1464_v59 = vsel %vm1460_vm3, %v6316_v37, -inf }
 0x269   :  { %v6320_v41 = vpop.f32.mrb[33].mxu1  ;;  %v1492_v42 = vsel %vm1460_vm3, %v6318_v38, -inf }
 0x26a   :  { %v6326_v44 = vpop.f32.mrb[34].mxu1  ;;  %1493 = vmax.xlane.f32.xlu1 %v1492_v42  ;;  %1462 = vmax.xlane.f32.xlu0 %v1461_v43  ;;  %v1486_v50 = vsel %vm1460_vm3, %v6320_v41, -inf }
 0x26b   :  { %v6328_v45 = vpop.f32.mrb[35].mxu1  ;;  %v1495_v57 = vsel %vm1460_vm3, %v6326_v44, -inf }
 0x26c   :  { %v6330_v46 = vpop.f32.mrb[36].mxu0  ;;  %v1489_v3 = vsel %vm1460_vm3, %v6328_v45, -inf }
 0x26d   :  { %v6332_v49 = vpop.f32.mrb[37].mxu0  ;;  %v1479_v4 = vsel %vm1460_vm3, %v6330_v46, -inf }
 0x26e   :  { %1487 = vmax.xlane.f32.xlu1 %v1486_v50  ;;  %1471 = vmax.xlane.f32.xlu0 %v1470_v52  ;;  %v6338_v54 = vpop.f32.mrb[38].mxu0  ;;  %v1473_v62 = vsel %vm1460_vm3, %v6332_v49, -inf }
 0x26f   :  { %v6340_v55 = vpop.f32.mrb[39].mxu0  ;;  %v1483_v6 = vsel %vm1482_vm4, %v6338_v54, -inf }
 0x270   :  { %v6342_v56 = vpop.f32.mrb[36].mxu1  ;;  %v1476_v0 = vsel %vm1460_vm3, %v6340_v55, -inf }
 0x271   :  { %v6344_v9 = vpop.f32.mrb[37].mxu1  ;;  %v1504_v5 = vsel %vm1460_vm3, %v6342_v56, -inf }
 0x272   :  { %v6350_v61 = vpop.f32.mrb[38].mxu1  ;;  %1496 = vmax.xlane.f32.xlu0 %v1495_v57  ;;  %1465 = vmax.xlane.f32.xlu1 %v1464_v59  ;;  %v1498_v7 = vsel %vm1460_vm3, %v6344_v9, -inf }
 0x273   :  { %v6352_v1 = vpop.f32.mrb[39].mxu1  ;;  %v1507_v15 = vsel %vm1482_vm4, %v6350_v61, -inf }
 0x274   :  { %v1501_v10 = vsel %vm1460_vm3, %v6352_v1, -inf }
 0x276   :  { %1490 = vmax.xlane.f32.xlu0 %v1489_v3  ;;  %1480 = vmax.xlane.f32.xlu1 %v1479_v4 }
 0x27a   :  { %1505 = vmax.xlane.f32.xlu1 %v1504_v5  ;;  %1484 = vmax.xlane.f32.xlu0 %v1483_v6 }
 0x27e   :  { %1474 = vmax.xlane.f32.xlu1 %v1473_v62  ;;  %1508 = vmax.xlane.f32.xlu0 %v1507_v15 }
 0x282   :  { %1499 = vmax.xlane.f32.xlu1 %v1498_v7  ;;  %1477 = vmax.xlane.f32.xlu0 %v1476_v0 }
 0x284   :  { %v6370_v16 = vpop.f32.mrb[40].mxu0 }
 0x285   :  { %v6372_v12 = vpop.f32.mrb[41].mxu0  ;;  %v1516_v27 = vsel %vm1460_vm3, %v6370_v16, -inf }
 0x286   :  { %1502 = vmax.xlane.f32.xlu0 %v1501_v10  ;;  %1517 = vmax.xlane.f32.xlu1 %v1516_v27  ;;  %v6378_v14 = vpop.f32.mrb[42].mxu0  ;;  %v1510_v36 = vsel %vm1460_vm3, %v6372_v12, -inf }
 0x287   :  { %v6380_v11 = vpop.f32.mrb[43].mxu0  ;;  %v1519_v21 = vsel %vm1460_vm3, %v6378_v14, -inf }
 0x288   :  { %v6382_v19 = vpop.f32.mrb[40].mxu1  ;;  %v1513_v59 = vsel %vm1460_vm3, %v6380_v11, -inf }
 0x289   :  { %v6384_v28 = vpop.f32.mrb[41].mxu1  ;;  %v1540_v20 = vsel %vm1460_vm3, %v6382_v19, -inf }
 0x28a   :  { %v6390_v22 = vpop.f32.mrb[42].mxu1  ;;  %1541 = vmax.xlane.f32.xlu1 %v1540_v20  ;;  %1520 = vmax.xlane.f32.xlu0 %v1519_v21  ;;  %v1534_v57 = vsel %vm1460_vm3, %v6384_v28, -inf  ;;  %v6438_v21 = vpop.permute.xlu1 %2243 }
 0x28b   :  { %v6392_v25 = vpop.f32.mrb[43].mxu1  ;;  %v1543_v35 = vsel %vm1460_vm3, %v6390_v22, -inf  ;;  %8238 = vst [vmem:[#allocation20_spill] sm:$0xff] %v6438_v21 }
 0x28c   :  { %v6394_v24 = vpop.f32.mrb[44].mxu0  ;;  %v1537_v5 = vsel %vm1460_vm3, %v6392_v25, -inf }
 0x28d   :  { %v6396_v23 = vpop.f32.mrb[45].mxu0  ;;  %v1528_v6 = vsel %vm1460_vm3, %v6394_v24, -inf }
 0x28e   :  { %1511 = vmax.xlane.f32.xlu1 %v1510_v36  ;;  %1544 = vmax.xlane.f32.xlu0 %v1543_v35  ;;  %v6402_v42 = vpop.f32.mrb[46].mxu0  ;;  %v1522_v7 = vsel %vm1460_vm3, %v6396_v23, -inf  ;;  %v6440_v36 = vpop.permute.xlu1 %2156 }
 0x28f   :  { %v6404_v43 = vpop.f32.mrb[47].mxu0  ;;  %v1531_v15 = vsel %vm1482_vm4, %v6402_v42, -inf  ;;  %8239 = vst [vmem:[#allocation21_spill] sm:$0xff] %v6440_v36 }
 0x290   :  { %v6406_v50 = vpop.f32.mrb[44].mxu1  ;;  %v1525_v27 = vsel %vm1460_vm3, %v6404_v43, -inf }
 0x291   :  { %v6408_v52 = vpop.f32.mrb[45].mxu1  ;;  %v1552_v62 = vsel %vm1460_vm3, %v6406_v50, -inf }
 0x292   :  { %v6414_v3 = vpop.f32.mrb[46].mxu1  ;;  %1535 = vmax.xlane.f32.xlu1 %v1534_v57  ;;  %1514 = vmax.xlane.f32.xlu0 %v1513_v59  ;;  %v1546_v10 = vsel %vm1460_vm3, %v6408_v52, -inf  ;;  %v6442_v35 = vpop.permute.xlu1 %2247 }
 0x293   :  { %v6416_v4 = vpop.f32.mrb[47].mxu1  ;;  %v1555_v0 = vsel %vm1482_vm4, %v6414_v3, -inf  ;;  %8240 = vst [vmem:[#allocation22_spill] sm:$0xff] %v6442_v35 }
 0x294   :  { %v1549_v20 = vsel %vm1460_vm3, %v6416_v4, -inf }
 0x296   :  { %1538 = vmax.xlane.f32.xlu0 %v1537_v5  ;;  %1529 = vmax.xlane.f32.xlu1 %v1528_v6  ;;  %v6444_v57 = vpop.permute.xlu1 %2154  ;;  %v6450_v6 = vpop.permute.xlu0 %2152 }
 0x297   :  { %8241 = vst [vmem:[#allocation23_spill] sm:$0xff] %v6444_v57 }
 0x29a   :  { %1553 = vmax.xlane.f32.xlu1 %v1552_v62  ;;  %1532 = vmax.xlane.f32.xlu0 %v1531_v15  ;;  %v6446_v59 = vpop.permute.xlu1 %2245  ;;  %v6454_v15 = vpop.permute.xlu0 %2494 }
 0x29b   :  { %8242 = vst [vmem:[#allocation24_spill] sm:$0xff] %v6446_v59  ;;  %8245 = vst [vmem:[#allocation27_spill] sm:$0xff] %v6454_v15 }
 0x29e   :  { %1523 = vmax.xlane.f32.xlu1 %v1522_v7  ;;  %1556 = vmax.xlane.f32.xlu0 %v1555_v0  ;;  %v6448_v5 = vpop.permute.xlu1 %2395 }
 0x29f   :  { %8243 = vst [vmem:[#allocation25_spill] sm:$0xff] %v6448_v5 }
 0x2a2   :  { %1547 = vmax.xlane.f32.xlu1 %v1546_v10  ;;  %1526 = vmax.xlane.f32.xlu0 %v1525_v27  ;;  %v6452_v62 = vpop.permute.xlu1 %2496 }
 0x2a3   :  { %8244 = vst [vmem:[#allocation26_spill] sm:$0xff] %v6452_v62 }
 0x2a6   :  { %1550 = vmax.xlane.f32.xlu0 %v1549_v20  ;;  %v6456_v7 = vpop.permute.xlu1 %2393 }
 0x2a7   :  { %8246 = vst [vmem:[#allocation28_spill] sm:$0xff] %v6456_v7 }
 0x2bc   :  { %2397 = vrot.lane.b32.xlu0 %v6212_v63, %s5880_s2 }
 0x2f3   :  { %v1469_v0 = vpop.xlane.xlu0 %1468 }
 0x2f4   :  { %v1560_v10 = vsub.f32 %v6308_v26, %v1469_v0 }
 0x2f6   :  { %v1594_v27 = vmul.f32 1.442695, %v1560_v10 }
 0x2f7   :  { %v1494_v20 = vpop.xlane.xlu1 %1493  ;;  %v1463_v35 = vpop.xlane.xlu0 %1462 }
 0x2f8   :  { %5501 = vpow2.f32 %v1594_v27  ;;  %v1568_v36 = vsub.f32 %v6318_v38, %v1494_v20  ;;  %v1558_v59 = vsub.f32 %v6310_v30, %v1463_v35 }
 0x2fa   :  { %v1610_v5 = vmul.f32 1.442695, %v1568_v36  ;;  %v1590_v21 = vmul.f32 1.442695, %v1558_v59 }
 0x2fb   :  { %v1488_v57 = vpop.xlane.xlu1 %1487  ;;  %v1472_v40 = vpop.xlane.xlu0 %1471 }
 0x2fc   :  { %5503 = vpow2.f32 %v1610_v5  ;;  %v1566_v62 = vsub.f32 %v6320_v41, %v1488_v57  ;;  %v1561_v15 = vsub.f32 %v6314_v32, %v1472_v40 }
 0x2fd   :  { %5505 = vpow2.f32 %v1590_v21 }
 0x2fe   :  { %v1606_v7 = vmul.f32 1.442695, %v1566_v62  ;;  %v1596_v26 = vmul.f32 1.442695, %v1561_v15 }
 0x2ff   :  { %v1497_v0 = vpop.xlane.xlu0 %1496  ;;  %v1466_v10 = vpop.xlane.xlu1 %1465 }
 0x300   :  { %v1569_v27 = vsub.f32 %v6326_v44, %v1497_v0  ;;  %v1559_v38 = vsub.f32 %v6316_v37, %v1466_v10  ;;  %5507 = vpow2.f32 %v1596_v26 }
 0x301   :  { %5509 = vpow2.f32 %v1606_v7 }
 0x302   :  { %v6465_v30 = vpop.eup %5501  ;;  %v1612_v36 = vmul.f32 1.442695, %v1569_v27  ;;  %v1592_v35 = vmul.f32 1.442695, %v1559_v38 }
 0x303   :  { %v1491_v59 = vpop.xlane.xlu0 %1490  ;;  %v1481_v5 = vpop.xlane.xlu1 %1480  ;;  %v1660_v40 = vsel %vm1460_vm3, %v6465_v30, 0.0 }
 0x304   :  { %5511 = vpow2.f32 %v1612_v36  ;;  %v1567_v32 = vsub.f32 %v6328_v45, %v1491_v59  ;;  %1661 = vadd.xlane.f32.xlu1 %v1660_v40  ;;  %v1564_v37 = vsub.f32 %v6330_v46, %v1481_v5 }
 0x305   :  { %5513 = vpow2.f32 %v1592_v35 }
 0x306   :  { %v6470_v41 = vpop.eup %5503  ;;  %v1608_v44 = vmul.f32 1.442695, %v1567_v32  ;;  %v1602_v20 = vmul.f32 1.442695, %v1564_v37 }
 0x307   :  { %v1506_v21 = vpop.xlane.xlu1 %1505  ;;  %v1485_v57 = vpop.xlane.xlu0 %1484  ;;  %v1684_v62 = vsel %vm1460_vm3, %v6470_v41, 0.0 }
 0x308   :  { %v6475_v15 = vpop.eup %5505  ;;  %1685 = vadd.xlane.f32.xlu1 %v1684_v62  ;;  %5515 = vpow2.f32 %v1608_v44  ;;  %v1572_v45 = vsub.f32 %v6342_v56, %v1506_v21  ;;  %v1565_v21 = vsub.f32 %v6338_v54, %v1485_v57 }
 0x309   :  { %v1654_v10 = vsel %vm1460_vm3, %v6475_v15, 0.0  ;;  %5517 = vpow2.f32 %v1602_v20 }
 0x30a   :  { %v6477_v7 = vpop.eup %5507  ;;  %v1618_v5 = vmul.f32 1.442695, %v1572_v45 }
 0x30b   :  { %v1475_v26 = vpop.xlane.xlu1 %1474  ;;  %v1509_v0 = vpop.xlane.xlu0 %1508  ;;  %v1663_v36 = vsel %vm1460_vm3, %v6477_v7, 0.0 }
 0x30c   :  { %v6482_v46 = vpop.eup %5509  ;;  %v1562_v27 = vsub.f32 %v6332_v49, %v1475_v26  ;;  %v1573_v38 = vsub.f32 %v6350_v61, %v1509_v0  ;;  %1655 = vadd.xlane.f32.xlu1 %v1654_v10  ;;  %1664 = vadd.xlane.f32.xlu0 %v1663_v36 }
 0x30d   :  { %v1678_v44 = vsel %vm1460_vm3, %v6482_v46, 0.0 }
 0x30e   :  { %v6488_v35 = vpop.eup %5511  ;;  %v1598_v59 = vmul.f32 1.442695, %v1562_v27  ;;  %v1620_v56 = vmul.f32 1.442695, %v1573_v38  ;;  %v1604_v27 = vmul.f32 1.442695, %v1565_v21 }
 0x30f   :  { %v1500_v40 = vpop.xlane.xlu1 %1499  ;;  %v1478_v32 = vpop.xlane.xlu0 %1477  ;;  %v1687_v49 = vsel %vm1460_vm3, %v6488_v35, 0.0 }
 0x310   :  { %5519 = vpow2.f32 %v1598_v59  ;;  %v1570_v61 = vsub.f32 %v6344_v9, %v1500_v40  ;;  %1679 = vadd.xlane.f32.xlu1 %v1678_v44  ;;  %v6495_v37 = vpop.eup %5513  ;;  %1688 = vadd.xlane.f32.xlu0 %v1687_v49  ;;  %v1563_v38 = vsub.f32 %v6340_v55, %v1478_v32 }
 0x311   :  { %5521 = vpow2.f32 %v1620_v56  ;;  %v1657_v0 = vsel %vm1460_vm3, %v6495_v37, 0.0 }
 0x312   :  { %5523 = vpow2.f32 %v1618_v5  ;;  %v1614_v62 = vmul.f32 1.442695, %v1570_v61  ;;  %v6501_v10 = vpop.eup %5515  ;;  %v1600_v56 = vmul.f32 1.442695, %v1563_v38 }
 0x313   :  { %v1503_v20 = vpop.xlane.xlu0 %1502  ;;  %v1518_v45 = vpop.xlane.xlu1 %1517  ;;  %v1681_v54 = vsel %vm1460_vm3, %v6501_v10, 0.0 }
 0x314   :  { %v1576_v26 = vsub.f32 %v6370_v16, %v1518_v45  ;;  %1658 = vadd.xlane.f32.xlu0 %v1657_v0  ;;  %5525 = vpow2.f32 %v1614_v62  ;;  %v6506_v57 = vpop.eup %5517  ;;  %v1571_v5 = vsub.f32 %v6352_v1, %v1503_v20 }
 0x315   :  { %v1672_v61 = vsel %vm1460_vm3, %v6506_v57, 0.0 }
 0x316   :  { %v1626_v9 = vmul.f32 1.442695, %v1576_v26  ;;  %v1616_v45 = vmul.f32 1.442695, %v1571_v5 }
 0x317   :  { %v1542_v36 = vpop.xlane.xlu1 %1541  ;;  %v1521_v59 = vpop.xlane.xlu0 %1520 }
 0x318   :  { %5527 = vpow2.f32 %v1626_v9  ;;  %1682 = vadd.xlane.f32.xlu0 %v1681_v54  ;;  %v1584_v1 = vsub.f32 %v6382_v19, %v1542_v36 }
 0x319   :  { %5529 = vpow2.f32 %v1604_v27 }
 0x31a   :  { %v6508_v16 = vpop.eup %5519  ;;  %5531 = vpow2.f32 %v1600_v56  ;;  %v1642_v19 = vmul.f32 1.442695, %v1584_v1 }
 0x31b   :  { %v1545_v40 = vpop.xlane.xlu0 %1544  ;;  %v1666_v44 = vsel %vm1460_vm3, %v6508_v16, 0.0  ;;  %v6513_v55 = vpop.eup %5521 }
 0x31c   :  { %v1512_v32 = vpop.xlane.xlu1 %1511  ;;  %v1585_v49 = vsub.f32 %v6390_v22, %v1545_v40  ;;  %1667 = vadd.xlane.f32.xlu1 %v1666_v44  ;;  %v6518_v21 = vpop.eup %5523  ;;  %1673 = vadd.xlane.f32.xlu0 %v1672_v61  ;;  %v1699_v26 = vsel %vm1482_vm4, %v6513_v55, 0.0 }
 0x31d   :  { %v1696_v22 = vsel %vm1460_vm3, %v6518_v21, 0.0  ;;  %v1574_v36 = vsub.f32 %v6372_v12, %v1512_v32 }
 0x31e   :  { %v1644_v62 = vmul.f32 1.442695, %v1585_v49  ;;  %v6526_v9 = vpop.eup %5525 }
 0x31f   :  { %v1515_v20 = vpop.xlane.xlu0 %1514  ;;  %v1622_v40 = vmul.f32 1.442695, %v1574_v36 }
 0x320   :  { %v1575_v0 = vsub.f32 %v6380_v11, %v1515_v20  ;;  %1700 = vadd.xlane.f32.xlu1 %v1699_v26  ;;  %5533 = vpow2.f32 %v1644_v62  ;;  %1697 = vadd.xlane.f32.xlu0 %v1696_v22  ;;  %v1536_v27 = vpop.xlane.xlu1 %1535  ;;  %v1690_v11 = vsel %vm1460_vm3, %v6526_v9, 0.0 }
 0x321   :  { %5535 = vpow2.f32 %v1616_v45  ;;  %v1582_v44 = vsub.f32 %v6384_v28, %v1536_v27  ;;  %v1577_v45 = vsub.f32 %v6378_v14, %v1521_v59 }
 0x322   :  { %v1624_v38 = vmul.f32 1.442695, %v1575_v0  ;;  %v6528_v54 = vpop.eup %5527 }
 0x323   :  { %v1708_v56 = vsel %vm1460_vm3, %v6528_v54, 0.0  ;;  %v6535_v5 = vpop.eup %5529  ;;  %v1539_v49 = vpop.xlane.xlu0 %1538  ;;  %v1638_v1 = vmul.f32 1.442695, %v1582_v44 }
 0x324   :  { %5537 = vpow2.f32 %v1624_v38  ;;  %1709 = vadd.xlane.f32.xlu1 %v1708_v56  ;;  %1691 = vadd.xlane.f32.xlu0 %v1690_v11  ;;  %v1530_v61 = vpop.xlane.xlu1 %1529  ;;  %v1675_v12 = vsel %vm1482_vm4, %v6535_v5, 0.0  ;;  %v6540_v32 = vpop.eup %5531  ;;  %v1628_v38 = vmul.f32 1.442695, %v1577_v45  ;;  %v1583_v14 = vsub.f32 %v6392_v25, %v1539_v49 }
 0x325   :  { %5539 = vpow2.f32 %v1642_v19  ;;  %v1669_v28 = vsel %vm1460_vm3, %v6540_v32, 0.0  ;;  %v1580_v11 = vsub.f32 %v6394_v24, %v1530_v61 }
 0x326   :  { %5541 = vpow2.f32 %v1622_v40  ;;  %v1640_v56 = vmul.f32 1.442695, %v1583_v14 }
 0x327   :  { %v1533_v22 = vpop.xlane.xlu0 %1532  ;;  %5543 = vpow2.f32 %v1638_v1  ;;  %v1634_v49 = vmul.f32 1.442695, %v1580_v11 }
 0x328   :  { %1676 = vadd.xlane.f32.xlu0 %v1675_v12  ;;  %v1554_v0 = vpop.xlane.xlu1 %1553  ;;  %5545 = vpow2.f32 %v1628_v38  ;;  %v1581_v24 = vsub.f32 %v6402_v42, %v1533_v22 }
 0x329   :  { %5547 = vpow2.f32 %v1640_v56 }
 0x32a   :  { %v6542_v62 = vpop.eup %5533  ;;  %5549 = vpow2.f32 %v1634_v49 }
 0x32b   :  { %v1735_v20 = vsel %vm1460_vm3, %v6542_v62, 0.0  ;;  %v6549_v26 = vpop.eup %5535  ;;  %v1557_v44 = vpop.xlane.xlu0 %1556 }
 0x32c   :  { %1736 = vadd.xlane.f32.xlu1 %v1735_v20  ;;  %1670 = vadd.xlane.f32.xlu0 %v1669_v28  ;;  %v1693_v19 = vsel %vm1460_vm3, %v6549_v26, 0.0  ;;  %v1524_v40 = vpop.xlane.xlu1 %1523 }
 0x32d   :  { %v1578_v45 = vsub.f32 %v6396_v23, %v1524_v40  ;;  %v1589_v23 = vsub.f32 %v6414_v3, %v1557_v44 }
 0x32e   :  { %v6551_v27 = vpop.eup %5537 }
 0x32f   :  { %v1705_v59 = vsel %vm1460_vm3, %v6551_v27, 0.0  ;;  %v6558_v36 = vpop.eup %5539  ;;  %v1527_v28 = vpop.xlane.xlu0 %1526  ;;  %v1630_v61 = vmul.f32 1.442695, %v1578_v45  ;;  %v1652_v42 = vmul.f32 1.442695, %v1589_v23 }
 0x330   :  { %1706 = vadd.xlane.f32.xlu1 %v1705_v59  ;;  %1694 = vadd.xlane.f32.xlu0 %v1693_v19  ;;  %v1732_v12 = vsel %vm1460_vm3, %v6558_v36, 0.0  ;;  %v6563_v25 = vpop.eup %5541  ;;  %v1636_v59 = vmul.f32 1.442695, %v1581_v24 }
 0x331   :  { %v1702_v1 = vsel %vm1460_vm3, %v6563_v25, 0.0  ;;  %v6568_v20 = vpop.eup %5543  ;;  %5551 = vpow2.f32 %v1630_v61 }
 0x332   :  { %v1726_v38 = vsel %vm1460_vm3, %v6568_v20, 0.0  ;;  %v6573_v14 = vpop.eup %5545  ;;  %5553 = vpow2.f32 %v1636_v59 }
 0x333   :  { %v1551_v19 = vpop.xlane.xlu0 %1550  ;;  %v1711_v56 = vsel %vm1460_vm3, %v6573_v14, 0.0  ;;  %v6578_v11 = vpop.eup %5547  ;;  %5555 = vpow2.f32 %v1652_v42 }
 0x334   :  { %1733 = vadd.xlane.f32.xlu0 %v1732_v12  ;;  %v1587_v22 = vsub.f32 %v6416_v4, %v1551_v19  ;;  %v1729_v40 = vsel %vm1460_vm3, %v6578_v11, 0.0  ;;  %v6585_v12 = vpop.eup %5549  ;;  %v1588_v4 = vsub.f32 %v6406_v50, %v1554_v0  ;;  %v1579_v50 = vsub.f32 %v6404_v43, %v1527_v28 }
 0x335   :  { %v1720_v44 = vsel %vm1460_vm3, %v6585_v12, 0.0 }
 0x336   :  { %v1648_v3 = vmul.f32 1.442695, %v1587_v22  ;;  %v1650_v59 = vmul.f32 1.442695, %v1588_v4  ;;  %v1632_v22 = vmul.f32 1.442695, %v1579_v50 }
 0x338   :  { %1703 = vadd.xlane.f32.xlu0 %v1702_v1  ;;  %5557 = vpow2.f32 %v1648_v3 }
 0x339   :  { %5559 = vpow2.f32 %v1650_v59 }
 0x33b   :  { %v6589_v49 = vpop.eup %5551 }
 0x33c   :  { %1727 = vadd.xlane.f32.xlu0 %v1726_v38  ;;  %v1714_v45 = vsel %vm1460_vm3, %v6589_v49, 0.0  ;;  %v6593_v1 = vpop.eup %5553  ;;  %v1548_v38 = vpop.xlane.xlu1 %1547 }
 0x33d   :  { %v1723_v24 = vsel %vm1482_vm4, %v6593_v1, 0.0  ;;  %v6598_v61 = vpop.eup %5555  ;;  %v1586_v23 = vsub.f32 %v6408_v52, %v1548_v38 }
 0x33e   :  { %v1747_v19 = vsel %vm1482_vm4, %v6598_v61, 0.0 }
 0x33f   :  { %v1646_v42 = vmul.f32 1.442695, %v1586_v23 }
 0x340   :  { %1712 = vadd.xlane.f32.xlu0 %v1711_v56 }
 0x341   :  { %2498 = vrot.lane.b32.xlu1 %v6214_v2, %s5880_s2  ;;  %5561 = vpow2.f32 %v1646_v42 }
 0x342   :  { %v6603_v56 = vpop.eup %5557  ;;  %5563 = vpow2.f32 %v1632_v22 }
 0x343   :  { %v1741_v0 = vsel %vm1460_vm3, %v6603_v56, 0.0 }
 0x344   :  { %1730 = vadd.xlane.f32.xlu0 %v1729_v40  ;;  %v6608_v40 = vpop.eup %5559 }
 0x345   :  { %v1744_v52 = vsel %vm1460_vm3, %v6608_v40, 0.0 }
 0x348   :  { %1721 = vadd.xlane.f32.xlu0 %v1720_v44 }
 0x34b   :  { %v6612_v3 = vpop.eup %5561 }
 0x34c   :  { %1715 = vadd.xlane.f32.xlu0 %v1714_v45  ;;  %v1738_v44 = vsel %vm1460_vm3, %v6612_v3, 0.0  ;;  %v6616_v45 = vpop.eup %5563 }
 0x34d   :  { %v1717_v43 = vsel %vm1460_vm3, %v6616_v45, 0.0 }
 0x350   :  { %1724 = vadd.xlane.f32.xlu0 %v1723_v24  ;;  %v6648_v24 = vpop.permute.xlu0 %2397 }
 0x354   :  { %1748 = vadd.xlane.f32.xlu0 %v1747_v19 }
 0x358   :  { %1742 = vadd.xlane.f32.xlu0 %v1741_v0 }
 0x365   :  { %1745 = vadd.xlane.f32.xlu1 %v1744_v52 }
 0x369   :  { %1739 = vadd.xlane.f32.xlu1 %v1738_v44 }
 0x36d   :  { %1718 = vadd.xlane.f32.xlu1 %v1717_v43 }
 0x36e   :  { %2399 = vrot.lane.b32.xlu0 %v6208_v58, %s5880_s2 }
 0x372   :  { %2595 = vrot.lane.b32.xlu0 %v6222_v17, %s5880_s2 }
 0x376   :  { %2597 = vrot.lane.b32.xlu0 %v6218_v8, %s5880_s2 }
 0x37a   :  { %2599 = vrot.lane.b32.xlu0 %v6232_v33, %s5880_s2 }
 0x37e   :  { %2500 = vrot.lane.b32.xlu1 %v6210_v60, %s5880_s2  ;;  %2601 = vrot.lane.b32.xlu0 %v6228_v29, %s5880_s2 }
 0x382   :  { %2696 = vrot.lane.b32.xlu1 %v6224_v18, %s5880_s2  ;;  %3389 = vrot.lane.b32.xlu0 %v6202_v53, %s5881_s26 }
 0x386   :  { %2698 = vrot.lane.b32.xlu1 %v6220_v13, %s5880_s2  ;;  %3391 = vrot.lane.b32.xlu0 %v6198_v48, %s5881_s26 }
 0x38a   :  { %2700 = vrot.lane.b32.xlu1 %v6234_v34, %s5880_s2  ;;  %3304 = vrot.lane.b32.xlu0 %v6208_v58, %s5881_s26 }
 0x38e   :  { %2702 = vrot.lane.b32.xlu1 %v6230_v31, %s5880_s2 }
 0x391   :  { %v1662_v28 = vpop.xlane.xlu1 %1661 }
 0x392   :  { %3298 = vrot.lane.b32.xlu1 %v6200_v51, %s5881_s26 }
 0x395   :  { %v1686_v4 = vpop.xlane.xlu1 %1685 }
 0x396   :  { %3300 = vrot.lane.b32.xlu1 %v6196_v47, %s5881_s26 }
 0x399   :  { %v1656_v38 = vpop.xlane.xlu1 %1655  ;;  %v1665_v59 = vpop.xlane.xlu0 %1664 }
 0x39a   :  { %5565 = vrcp.f32 %v1656_v38  ;;  %3302 = vrot.lane.b32.xlu1 %v6212_v63, %s5881_s26 }
 0x39b   :  { %5567 = vrcp.f32 %v1662_v28  ;;  %v6662_v28 = vld [vmem:[%s8182_s1] sm:$0xff] }
 0x39c   :  { %5569 = vrcp.f32 %v1665_v59 }
 0x39d   :  { %v1689_v23 = vpop.xlane.xlu0 %1688  ;;  %v1680_v19 = vpop.xlane.xlu1 %1679 }
 0x39e   :  { %3393 = vrot.lane.b32.xlu1 %v6214_v2, %s5881_s26 }
 0x3a1   :  { %v1659_v42 = vpop.xlane.xlu0 %1658 }
 0x3a2   :  { %5571 = vrcp.f32 %v1659_v42  ;;  %3395 = vrot.lane.b32.xlu1 %v6210_v60, %s5881_s26  ;;  %v6675_v42 = vld [vmem:[%s8182_s1 + $0x18] sm:$0xff] }
 0x3a3   :  { %5573 = vrcp.f32 %v1689_v23 }
 0x3a4   :  { %v5566_v50 = vpop.eup %5565  ;;  %5575 = vrcp.f32 %v1680_v19 }
 0x3a5   :  { %5577 = vrcp.f32 %v1686_v4  ;;  %v1683_v0 = vpop.xlane.xlu0 %1682  ;;  %v5568_v22 = vpop.eup %5567  ;;  %v1782_v52 = vmul.f32 %v5566_v50, %v6475_v15  ;;  %v6668_v4 = vld [vmem:[%s8182_s1 + $0x10] sm:$0xff] }
 0x3a6   :  { %5579 = vrcp.f32 %v1683_v0  ;;  %v5570_v44 = vpop.eup %5569  ;;  %v1784_v38 = vmul.f32 %v5568_v22, %v6465_v30  ;;  %v6680_v30 = vld [vmem:[%s8182_s1 + $0x8] sm:$0xff] }
 0x3a7   :  { %v1785_v23 = vmul.f32 %v5570_v44, %v6477_v7  ;;  %v1814_v15 = vsub.f32 %v1782_v52, %v6662_v28 }
 0x3a8   :  { %v1816_v0 = vsub.f32 %v1784_v38, %v6668_v4 }
 0x3a9   :  { %v1668_v43 = vpop.xlane.xlu1 %1667  ;;  %v1674_v59 = vpop.xlane.xlu0 %1673  ;;  %v1817_v29 = vsub.f32 %v1785_v23, %v6675_v42  ;;  %v1846_v33 = vmul.f32 %v1814_v15, %v1814_v15  ;;  %v1952_v13 = vpack.c.bf16 %v1785_v23, %v1784_v38 }
 0x3aa   :  { %5581 = vrcp.f32 %v1668_v43  ;;  %v1848_v58 = vmul.f32 %v1816_v0, %v1816_v0 }
 0x3ab   :  { %v1878_v38 = vsel %vm1460_vm3, %v1846_v33, 0.0  ;;  %5583 = vrcp.f32 %v1674_v59 }
 0x3ac   :  { %v5572_v19 = vpop.eup %5571 }
 0x3ad   :  { %v5574_v50 = vpop.eup %5573  ;;  %v1698_v22 = vpop.xlane.xlu0 %1697  ;;  %v1783_v43 = vmul.f32 %v5572_v19, %v6495_v37 }
 0x3ae   :  { %v5576_v7 = vpop.eup %5575  ;;  %v6687_v17 = vmul.f32 %v5574_v50, %v6488_v35  ;;  %v1701_v18 = vpop.xlane.xlu1 %1700  ;;  %v1849_v35 = vmul.f32 %v1817_v29, %v1817_v29  ;;  %v8248_v50 = vld [vmem:[#allocation23_spill] sm:$0xff] }
 0x3af   :  { %v5578_v44 = vpop.eup %5577  ;;  %v1815_v31 = vsub.f32 %v1783_v43, %v6680_v30  ;;  %v1951_v8 = vpack.c.bf16 %v1783_v43, %v1782_v52  ;;  %v6691_v37 = vmul.f32 %v5576_v7, %v6482_v46 }
 0x3b0   :  { %v5580_v34 = vpop.eup %5579  ;;  %v6697_v15 = vmul.f32 %v5578_v44, %v6470_v41 }
 0x3b1   :  { %v1847_v60 = vmul.f32 %v1815_v31, %v1815_v31  ;;  %5200 = vmatprep.mubr.msk.bf16.mxu0 %vm1460_vm3, %v1951_v8  ;;  %v1692_v63 = vpop.xlane.xlu0 %1691  ;;  %v6694_v19 = vmul.f32 %v5580_v34, %v6501_v10  ;;  %v6708_v34 = vld [vmem:[%s8182_s1 + $0x20] sm:$0xff]  ;;  %v1883_v10 = vsel %vm1460_vm3, %v1849_v35, 0.0  ;;  %v8251_v35 = vld [vmem:[#allocation24_spill] sm:$0xff] }
 0x3b2   :  { %5201 = vmatmul.mubr.msk.bf16.vlgmr.msra.gmra.mrb[48].mxu0 %vm1460_vm3, %v1952_v13  ;;  %v1956_v41 = vpack.c.bf16 %v6687_v17, %v6697_v15  ;;  %v1710_v23 = vpop.xlane.xlu1 %1709 }
 0x3b3   :  { %v1879_v31 = vsel %vm1460_vm3, %v1847_v60, 0.0  ;;  %5225 = vmatpush3.bf16.msra.mxu0 %v6297_v39  ;;  %v1955_v8 = vpack.c.bf16 %v6694_v19, %v6691_v37  ;;  %v1881_v60 = vsel %vm1460_vm3, %v1848_v58, 0.0  ;;  %v8249_v58 = vld [vmem:[#allocation20_spill] sm:$0xff] }
 0x3b4   :  { %v5582_v52 = vpop.eup %5581  ;;  %v1880_v13 = vadd.f32 %v1879_v31, %v1878_v38  ;;  %5226 = vmatprep.subr.bf16.mxu0 %v6450_v6 }
 0x3b5   :  { %v6714_v29 = vmul.f32 %v5582_v52, %v6508_v16  ;;  %5216 = vmatprep.mubr.msk.bf16.mxu1 %vm1460_vm3, %v1955_v8  ;;  %v1677_v33 = vpop.xlane.xlu0 %1676  ;;  %v8247_v16 = vld [vmem:[#allocation19_spill] sm:$0xff]  ;;  %v8250_v52 = vld [vmem:[#allocation21_spill] sm:$0xff]  ;;  %v5584_v31 = vpop.eup %5583  ;;  %v8252_v8 = vld [vmem:[#allocation22_spill] sm:$0xff] }
 0x3b6   :  { %v1882_v39 = vadd.f32 %v1881_v60, %v1880_v13  ;;  %5217 = vmatmul.mubr.msk.bf16.vlgmr.msra.gmra.mrb[48].mxu1 %vm1460_vm3, %v1956_v41  ;;  %5585 = vrcp.f32 %v1677_v33  ;;  %v8253_v41 = vld [vmem:[#allocation28_spill] sm:$0xff]  ;;  %v1788_v33 = vmul.f32 %v5584_v31, %v6506_v57  ;;  %v1822_v31 = vsub.f32 %v6691_v37, %v6662_v28 }
 0x3b7   :  { %v1818_v46 = vsub.f32 %v6714_v29, %v6708_v34  ;;  %5227 = vmatpush3.bf16.msra.mxu0 %v6450_v6  ;;  %5241 = vmatpush3.bf16.msra.mxu1 %v8247_v16  ;;  %5587 = vrcp.f32 %v1701_v18  ;;  %v2174_v18 = vsel %vm1990_vm2, %v8250_v52, 0  ;;  %v1823_v37 = vsub.f32 %v6694_v19, %v6680_v30 }
 0x3b8   :  { %5228 = vmatprep.subr.bf16.mxu0 %v8248_v50  ;;  %5242 = vmatprep.subr.bf16.mxu1 %v8249_v58  ;;  %v1884_v0 = vadd.f32 %v1883_v10, %v1882_v39  ;;  %v6747_v39 = vld [vmem:[%s8182_s1 + $0x30] sm:$0xff]  ;;  %v8254_v10 = vld [vmem:[#allocation27_spill] sm:$0xff] }
 0x3b9   :  { %v1850_v59 = vmul.f32 %v1818_v46, %v1818_v46  ;;  %v1671_v43 = vpop.xlane.xlu0 %1670  ;;  %v6727_v44 = vpop.xlane.xlu1 %1736 }
 0x3ba   :  { %5589 = vrcp.f32 %v1671_v43  ;;  %v1820_v43 = vsub.f32 %v1788_v33, %v6747_v39 }
 0x3bb   :  { %v1885_v7 = vsel %vm1460_vm3, %v1850_v59, 0.0  ;;  %5229 = vmatpush3.bf16.msra.mxu0 %v8248_v50  ;;  %5243 = vmatpush3.bf16.msra.mxu1 %v8249_v58  ;;  %5591 = vrcp.f32 %v1698_v22  ;;  %v6755_v59 = vld [vmem:[%s8182_s1 + $0x28] sm:$0xff] }
 0x3bc   :  { %v1886_v6 = vadd.f32 %v1885_v7, %v1884_v0  ;;  %5446 = vmatprep.subr.msk.bf16.mxu0 %vm1990_vm2, %v8250_v52  ;;  %5244 = vmatprep.subr.bf16.mxu1 %v8251_v35  ;;  %5593 = vrcp.f32 %v1692_v63  ;;  %v2265_v63 = vsel %vm1990_vm2, %v8252_v8, 0  ;;  %v6762_v52 = vld [vmem:[%s8182_s1 + $0x38] sm:$0xf] }
 0x3bd   :  { %v1695_v38 = vpop.xlane.xlu0 %1694  ;;  %v1707_v13 = vpop.xlane.xlu1 %1706 }
 0x3be   :  { %5595 = vrcp.f32 %v1695_v38 }
 0x3bf   :  { %5231 = vmatpush3.bf16.msra.mxu0 %v2174_v18  ;;  %5245 = vmatpush3.bf16.msra.mxu1 %v8251_v35  ;;  %5597 = vrcp.f32 %v1707_v13 }
 0x3c0   :  { %5447 = vmatprep.subr.msk.bf16.mxu1 %vm1990_vm2, %v8252_v8  ;;  %5448 = vmatprep.subr.msk.bf16.mxu0 %vm1067_vm1, %v8253_v41  ;;  %v5586_v22 = vpop.eup %5585 }
 0x3c1   :  { %v1734_v60 = vpop.xlane.xlu0 %1733  ;;  %v5588_v46 = vpop.eup %5587  ;;  %v1789_v16 = vmul.f32 %v5586_v22, %v6535_v5 }
 0x3c2   :  { %v1797_v13 = vmul.f32 %v5588_v46, %v6513_v55 }
 0x3c3   :  { %5247 = vmatpush3.bf16.msra.mxu1 %v2265_v63  ;;  %v1821_v38 = vsub.f32 %v1789_v16, %v6762_v52 }
 0x3c4   :  { %5452 = vmatprep.subr.msk.bf16.mxu1 %vm1067_vm1, %v8254_v10  ;;  %v5590_v50 = vpop.eup %5589 }
 0x3c5   :  { %v1704_v58 = vpop.xlane.xlu0 %1703  ;;  %v5592_v57 = vpop.eup %5591  ;;  %v1787_v0 = vmul.f32 %v5590_v50, %v6540_v32  ;;  %v1954_v32 = vpack.c.bf16 %v1789_v16, %v1788_v33  ;;  %v1852_v50 = vmul.f32 %v1820_v43, %v1820_v43  ;;  %v1853_v16 = vmul.f32 %v1821_v38, %v1821_v38 }
 0x3c6   :  { %5599 = vrcp.f32 %v1704_v58  ;;  %v5594_v7 = vpop.eup %5593  ;;  %v1796_v22 = vmul.f32 %v5592_v57, %v6518_v21  ;;  %v1824_v43 = vsub.f32 %v6697_v15, %v6668_v4 }
 0x3c7   :  { %v1819_v5 = vsub.f32 %v1787_v0, %v6755_v59  ;;  %v1953_v35 = vpack.c.bf16 %v1787_v0, %v6714_v29  ;;  %v1794_v58 = vmul.f32 %v5594_v7, %v6526_v9  ;;  %5601 = vrcp.f32 %v1710_v23 }
 0x3c8   :  { %v5596_v18 = vpop.eup %5595  ;;  %v1958_v46 = vpack.c.bf16 %v1797_v13, %v1796_v22  ;;  %v1854_v9 = vmul.f32 %v1822_v31, %v1822_v31  ;;  %v1855_v7 = vmul.f32 %v1823_v37, %v1823_v37 }
 0x3c9   :  { %v1728_v8 = vpop.xlane.xlu0 %1727  ;;  %v1851_v63 = vmul.f32 %v1819_v5, %v1819_v5  ;;  %5204 = vmatprep.mubr.msk.bf16.mxu0 %vm1460_vm3, %v1953_v35  ;;  %v1795_v29 = vmul.f32 %v5596_v18, %v6549_v26  ;;  %v5598_v0 = vpop.eup %5597  ;;  %v1889_v26 = vsel %vm1460_vm3, %v1852_v50, 0.0  ;;  %v1891_v5 = vsel %vm1482_vm4, %v1853_v16, 0.0 }
 0x3ca   :  { %5205 = vmatmul.mubr.msk.bf16.gmra.mrb[52].mxu0 %vm1460_vm3, %v1954_v32  ;;  %v1799_v18 = vmul.f32 %v5598_v0, %v6551_v27  ;;  %v1893_v31 = vsel %vm1460_vm3, %v1854_v9, 0.0  ;;  %v1826_v32 = vsub.f32 %v1794_v58, %v6708_v34  ;;  %v1829_v0 = vsub.f32 %v1797_v13, %v6762_v52 }
 0x3cb   :  { %v1887_v33 = vsel %vm1460_vm3, %v1851_v63, 0.0  ;;  %v1957_v21 = vpack.c.bf16 %v1795_v29, %v1794_v58  ;;  %v1827_v37 = vsub.f32 %v1795_v29, %v6755_v59 }
 0x3cc   :  { %v1888_v57 = vadd.f32 %v1887_v33, %v1886_v6  ;;  %v1825_v6 = vsub.f32 %v6687_v17, %v6675_v42  ;;  %v1858_v16 = vmul.f32 %v1826_v32, %v1826_v32 }
 0x3cd   :  { %v1713_v55 = vpop.xlane.xlu0 %1712  ;;  %5220 = vmatprep.mubr.msk.bf16.mxu1 %vm1460_vm3, %v1957_v21  ;;  %v1828_v21 = vsub.f32 %v1796_v22, %v6747_v39 }
 0x3ce   :  { %5603 = vrcp.f32 %v1713_v55  ;;  %v1890_v23 = vadd.f32 %v1889_v26, %v1888_v57  ;;  %5221 = vmatmul.mubr.msk.bf16.gmra.mrb[52].mxu1 %vm1460_vm3, %v1958_v46  ;;  %v1857_v50 = vmul.f32 %v1825_v6, %v1825_v6  ;;  %v1859_v46 = vmul.f32 %v1827_v37, %v1827_v37 }
 0x3cf   :  { %5605 = vrcp.f32 %v1734_v60  ;;  %v1856_v60 = vmul.f32 %v1824_v43, %v1824_v43  ;;  %v1901_v6 = vsel %vm1460_vm3, %v1858_v16, 0.0 }
 0x3d0   :  { %v5600_v19 = vpop.eup %5599  ;;  %5607 = vrcp.f32 %v1728_v8  ;;  %v1892_v15 = vadd.f32 %v1891_v5, %v1890_v23  ;;  %v1895_v8 = vsel %vm1460_vm3, %v1855_v7, 0.0  ;;  %v1899_v55 = vsel %vm1460_vm3, %v1857_v50, 0.0 }
 0x3d1   :  { %5609 = vrcp.f32 %v6727_v44  ;;  %v1731_v35 = vpop.xlane.xlu0 %1730  ;;  %v1798_v38 = vmul.f32 %v5600_v19, %v6563_v25  ;;  %v5602_v44 = vpop.eup %5601  ;;  %v1897_v27 = vsel %vm1460_vm3, %v1856_v60, 0.0  ;;  %v1860_v7 = vmul.f32 %v1828_v21, %v1828_v21 }
 0x3d2   :  { %5611 = vrcp.f32 %v1731_v35  ;;  %v1894_v63 = vadd.f32 %v1893_v31, %v1892_v15  ;;  %v1800_v29 = vmul.f32 %v5602_v44, %v6528_v54  ;;  %v1903_v54 = vsel %vm1460_vm3, %v1859_v46, 0.0 }
 0x3d3   :  { %v1959_v17 = vpack.c.bf16 %v1799_v18, %v1798_v38  ;;  %v1830_v22 = vsub.f32 %v1798_v38, %v6662_v28  ;;  %v1861_v31 = vmul.f32 %v1829_v0, %v1829_v0 }
 0x3d4   :  { %v1896_v33 = vadd.f32 %v1895_v8, %v1894_v63  ;;  %v2414_v63 = vsel %vm1067_vm1, %v8253_v41, 0 }
 0x3d5   :  { %5232 = vmatprep.mubr.msk.bf16.mxu0 %vm1460_vm3, %v1959_v17  ;;  %v6794_v25 = vpop.xlane.xlu0 %1721  ;;  %v1862_v37 = vmul.f32 %v1830_v22, %v1830_v22 }
 0x3d6   :  { %v1898_v58 = vadd.f32 %v1897_v27, %v1896_v33  ;;  %v8255_v33 = vld [vmem:[#allocation25_spill] sm:$0xff]  ;;  %v1907_v27 = vsel %vm1482_vm4, %v1861_v31, 0.0 }
 0x3d8   :  { %v5604_v57 = vpop.eup %5603  ;;  %v1900_v9 = vadd.f32 %v1899_v55, %v1898_v58  ;;  %v1909_v58 = vsel %vm1460_vm3, %v1862_v37, 0.0  ;;  %v2515_v55 = vsel %vm1067_vm1, %v8254_v10, 0 }
 0x3d9   :  { %v5606_v43 = vpop.eup %5605  ;;  %v1801_v26 = vmul.f32 %v5604_v57, %v6573_v14  ;;  %v1716_v23 = vpop.xlane.xlu0 %1715  ;;  %v1831_v14 = vsub.f32 %v1799_v18, %v6680_v30  ;;  %v1905_v18 = vsel %vm1460_vm3, %v1860_v7, 0.0 }
 0x3da   :  { %v5608_v19 = vpop.eup %5607  ;;  %5613 = vrcp.f32 %v1716_v23  ;;  %v1902_v15 = vadd.f32 %v1901_v6, %v1900_v9  ;;  %v6805_v13 = vmul.f32 %v5606_v43, %v6558_v36  ;;  %v1832_v36 = vsub.f32 %v1800_v29, %v6668_v4  ;;  %v8256_v9 = vld [vmem:[#allocation26_spill] sm:$0xff] }
 0x3db   :  { %v5610_v5 = vpop.eup %5609  ;;  %v1960_v35 = vpack.c.bf16 %v1801_v26, %v1800_v29  ;;  %v6813_v17 = vmul.f32 %v5608_v19, %v6568_v20  ;;  %v1833_v41 = vsub.f32 %v1801_v26, %v6675_v42  ;;  %v2417_v23 = vsel %vm1067_vm1, %v8255_v33, 0 }
 0x3dc   :  { %v5612_v60 = vpop.eup %5611  ;;  %v1904_v32 = vadd.f32 %v1903_v54, %v1902_v15  ;;  %v6820_v8 = vmul.f32 %v5610_v5, %v6542_v62  ;;  %v1863_v62 = vmul.f32 %v1831_v14, %v1831_v14  ;;  %v1864_v21 = vmul.f32 %v1832_v36, %v1832_v36 }
 0x3dd   :  { %5233 = vmatmul.mubr.msk.bf16.vlgmr.msra.gmra.mrb[56].mxu0 %vm1460_vm3, %v1960_v35  ;;  %v1725_v38 = vpop.xlane.xlu0 %1724  ;;  %v6816_v50 = vmul.f32 %v5612_v60, %v6578_v11  ;;  %v1865_v43 = vmul.f32 %v1833_v41, %v1833_v41  ;;  %v2518_v60 = vsel %vm1067_vm1, %v8256_v9, 0  ;;  %v2420_v14 = vsel %vm1067_vm1, %v6648_v24, 0 }
 0x3de   :  { %5257 = vmatpush3.bf16.xpose.msra.mxu0 %v2414_v63  ;;  %v1906_v44 = vadd.f32 %v1905_v18, %v1904_v32  ;;  %v1964_v11 = vpack.c.bf16 %v6820_v8, %v6805_v13  ;;  %v1911_v29 = vsel %vm1460_vm3, %v1863_v62, 0.0  ;;  %v1913_v6 = vsel %vm1460_vm3, %v1864_v21, 0.0 }
 0x3df   :  { %5449 = vmatprep.subr.msk.bf16.mxu0 %vm1067_vm1, %v8255_v33  ;;  %v1963_v20 = vpack.c.bf16 %v6816_v50, %v6813_v17  ;;  %v1915_v22 = vsel %vm1460_vm3, %v1865_v43, 0.0  ;;  %5615 = vrcp.f32 %v6794_v25 }
 0x3e0   :  { %v1908_v16 = vadd.f32 %v1907_v27, %v1906_v44  ;;  %5617 = vrcp.f32 %v1725_v38 }
 0x3e1   :  { %5248 = vmatprep.mubr.msk.bf16.mxu1 %vm1460_vm3, %v1963_v20  ;;  %v1749_v57 = vpop.xlane.xlu0 %1748 }
 0x3e2   :  { %5249 = vmatmul.mubr.msk.bf16.vlgmr.msra.gmra.mrb[56].mxu1 %vm1460_vm3, %v1964_v11  ;;  %v1910_v46 = vadd.f32 %v1909_v58, %v1908_v16 }
 0x3e3   :  { %5273 = vmatpush3.bf16.xpose.msra.mxu1 %v2515_v55 }
 0x3e4   :  { %v5614_v0 = vpop.eup %5613  ;;  %5453 = vmatprep.subr.msk.bf16.mxu1 %vm1067_vm1, %v8256_v9  ;;  %v1912_v26 = vadd.f32 %v1911_v29, %v1910_v46 }
 0x3e5   :  { %v6842_v19 = vmul.f32 %v5614_v0, %v6589_v49  ;;  %v1743_v5 = vpop.xlane.xlu0 %1742  ;;  %v2499_v49 = vpop.permute.xlu1 %2498 }
 0x3e6   :  { %5259 = vmatpush3.bf16.xpose.msra.mxu0 %v2417_v23  ;;  %v1914_v10 = vadd.f32 %v1913_v6, %v1912_v26  ;;  %v2521_v36 = vsel %vm1067_vm1, %v2499_v49, 0  ;;  %v1839_v6 = vsub.f32 %v6816_v50, %v6680_v30  ;;  %v1841_v50 = vsub.f32 %v6820_v8, %v6675_v42 }
 0x3e7   :  { %5450 = vmatprep.subr.msk.bf16.mxu0 %vm1067_vm1, %v6648_v24  ;;  %v1834_v7 = vsub.f32 %v6842_v19, %v6708_v34 }
 0x3e8   :  { %v1916_v35 = vadd.f32 %v1915_v22, %v1914_v10 }
 0x3e9   :  { %v1866_v15 = vmul.f32 %v1834_v7, %v1834_v7  ;;  %v2400_v32 = vpop.permute.xlu0 %2399  ;;  %v5616_v25 = vpop.eup %5615  ;;  %v1840_v7 = vsub.f32 %v6805_v13, %v6668_v4 }
 0x3ea   :  { %v2423_v18 = vsel %vm1067_vm1, %v2400_v32, 0  ;;  %v5618_v33 = vpop.eup %5617  ;;  %v1804_v55 = vmul.f32 %v5616_v25, %v6585_v12 }
 0x3eb   :  { %5275 = vmatpush3.bf16.xpose.msra.mxu1 %v2518_v60  ;;  %v1917_v54 = vsel %vm1460_vm3, %v1866_v15, 0.0  ;;  %v1805_v43 = vmul.f32 %v5618_v33, %v6593_v1  ;;  %v1871_v15 = vmul.f32 %v1839_v6, %v1839_v6  ;;  %v1872_v13 = vmul.f32 %v1840_v7, %v1840_v7 }
 0x3ec   :  { %5454 = vmatprep.subr.msk.bf16.mxu1 %vm1067_vm1, %v2499_v49  ;;  %v1918_v31 = vadd.f32 %v1917_v54, %v1916_v35  ;;  %v1836_v26 = vsub.f32 %v1804_v55, %v6747_v39 }
 0x3ed   :  { %v6860_v37 = vpop.permute.xlu0 %2595  ;;  %v1962_v1 = vpack.c.bf16 %v1805_v43, %v1804_v55  ;;  %v1927_v8 = vsel %vm1460_vm3, %v1871_v15, 0.0 }
 0x3ee   :  { %5261 = vmatpush3.bf16.xpose.msra.mxu0 %v2420_v14  ;;  %v2616_v42 = vsel %vm1067_vm1, %v6860_v37, 0 }
 0x3ef   :  { %5451 = vmatprep.subr.msk.bf16.mxu0 %vm1067_vm1, %v2400_v32 }
 0x3f1   :  { %v2598_v49 = vpop.permute.xlu0 %2597 }
 0x3f2   :  { %v1746_v63 = vpop.xlane.xlu1 %1745 }
 0x3f3   :  { %5277 = vmatpush3.bf16.xpose.msra.mxu1 %v2521_v36  ;;  %5619 = vrcp.f32 %v1746_v63  ;;  %v1929_v63 = vsel %vm1460_vm3, %v1872_v13, 0.0  ;;  %v8258_v36 = vld [vmem:[#allocation9_spill] sm:$0xff] }
 0x3f4   :  { %5621 = vrcp.f32 %v1743_v5 }
 0x3f5   :  { %5623 = vrcp.f32 %v1749_v57 }
 0x3f6   :  { %5263 = vmatpush3.bf16.xpose.msra.mxu0 %v2423_v18  ;;  %v1740_v24 = vpop.xlane.xlu1 %1739 }
 0x3f7   :  { %5625 = vrcp.f32 %v1740_v24  ;;  %5456 = vmatprep.subr.msk.bf16.mxu0 %vm1067_vm1, %v6860_v37  ;;  %v8259_v24 = vld [vmem:[#allocation14_spill] sm:$0xff] }
 0x3fa   :  { %v1719_v44 = vpop.xlane.xlu1 %1718 }
 0x3fb   :  { %5627 = vrcp.f32 %v1719_v44 }
 0x3fd   :  { %v5620_v20 = vpop.eup %5619 }
 0x3fe   :  { %v2501_v38 = vpop.permute.xlu1 %2500  ;;  %v5622_v11 = vpop.eup %5621  ;;  %v1812_v16 = vmul.f32 %v5620_v20, %v6608_v40 }
 0x3ff   :  { %5455 = vmatprep.subr.msk.bf16.mxu1 %vm1067_vm1, %v2501_v38  ;;  %v2524_v41 = vsel %vm1067_vm1, %v2501_v38, 0  ;;  %v5624_v27 = vpop.eup %5623  ;;  %v1811_v57 = vmul.f32 %v5622_v11, %v6603_v56  ;;  %v1837_v56 = vsub.f32 %v1805_v43, %v6762_v52  ;;  %v8260_v11 = vld [vmem:[#allocation8_spill] sm:$0xff] }
 0x400   :  { %5279 = vmatpush3.bf16.xpose.msra.mxu1 %v2524_v41  ;;  %v1813_v46 = vmul.f32 %v5624_v27, %v6598_v61  ;;  %v2619_v41 = vsel %vm1067_vm1, %v2598_v49, 0 }
 0x401   :  { %v5626_v62 = vpop.eup %5625  ;;  %v1869_v10 = vmul.f32 %v1837_v56, %v1837_v56  ;;  %v1843_v54 = vsub.f32 %v1811_v57, %v6755_v59 }
 0x402   :  { %v2697_v21 = vpop.permute.xlu1 %2696  ;;  %v1810_v58 = vmul.f32 %v5626_v62, %v6612_v3  ;;  %v1966_v9 = vpack.c.bf16 %v1813_v46, %v1812_v16  ;;  %v1838_v3 = vsub.f32 %v6813_v17, %v6662_v28  ;;  %v2600_v62 = vpop.permute.xlu0 %2599 }
 0x403   :  { %5460 = vmatprep.subr.msk.bf16.mxu1 %vm1067_vm1, %v2697_v21  ;;  %v2717_v30 = vsel %vm1067_vm1, %v2697_v21, 0  ;;  %v1875_v44 = vmul.f32 %v1843_v54, %v1843_v54 }
 0x404   :  { %v1965_v0 = vpack.c.bf16 %v1811_v57, %v1810_v58  ;;  %v1870_v28 = vmul.f32 %v1838_v3, %v1838_v3  ;;  %v8263_v3 = vld [vmem:[#allocation12_spill] sm:$0xff] }
 0x405   :  { %v5628_v29 = vpop.eup %5627  ;;  %v1935_v21 = vsel %vm1460_vm3, %v1875_v44, 0.0 }
 0x406   :  { %5252 = vmatprep.mubr.msk.bf16.mxu1 %vm1460_vm3, %v1965_v0  ;;  %v1803_v40 = vmul.f32 %v5628_v29, %v6616_v45  ;;  %v1868_v45 = vmul.f32 %v1836_v26, %v1836_v26  ;;  %v2699_v22 = vpop.permute.xlu1 %2698  ;;  %v1925_v35 = vsel %vm1460_vm3, %v1870_v28, 0.0  ;;  %v8268_v28 = vld [vmem:[#allocation15_spill] sm:$0xff] }
 0x407   :  { %5253 = vmatmul.mubr.msk.bf16.gmra.mrb[60].mxu1 %vm1460_vm3, %v1966_v9  ;;  %v2720_v18 = vsel %vm1067_vm1, %v2699_v22, 0  ;;  %v2602_v9 = vpop.permute.xlu0 %2601 }
 0x408   :  { %5280 = vmatprep.mubr.msk.bf16.mxu1 %vm1067_vm1, %v6202_v53  ;;  %v1835_v12 = vsub.f32 %v1803_v40, %v6755_v59  ;;  %v1961_v61 = vpack.c.bf16 %v1803_v40, %v6842_v19  ;;  %v1921_v17 = vsel %vm1460_vm3, %v1868_v45, 0.0  ;;  %v1845_v59 = vsub.f32 %v1813_v46, %v6762_v52  ;;  %v8264_v45 = vld [vmem:[#allocation18_spill] sm:$0xff] }
 0x409   :  { %v2622_v40 = vsel %vm1067_vm1, %v2600_v62, 0  ;;  %v2625_v56 = vsel %vm1067_vm1, %v2602_v9, 0 }
 0x40a   :  { %v1867_v23 = vmul.f32 %v1835_v12, %v1835_v12  ;;  %5236 = vmatprep.mubr.msk.bf16.mxu0 %vm1460_vm3, %v1961_v61  ;;  %v2701_v14 = vpop.permute.xlu1 %2700  ;;  %v1877_v52 = vmul.f32 %v1845_v59, %v1845_v59 }
 0x40b   :  { %5237 = vmatmul.mubr.msk.bf16.gmra.mrb[60].mxu0 %vm1460_vm3, %v1962_v1  ;;  %v2723_v55 = vsel %vm1067_vm1, %v2701_v14, 0  ;;  %v3390_v61 = vpop.permute.xlu0 %3389 }
 0x40c   :  { %v1919_v53 = vsel %vm1460_vm3, %v1867_v23, 0.0  ;;  %5264 = vmatprep.mubr.msk.bf16.mxu0 %vm1067_vm1, %v6200_v51  ;;  %v1923_v51 = vsel %vm1482_vm4, %v1869_v10, 0.0  ;;  %v1939_v0 = vsel %vm1482_vm4, %v1877_v52, 0.0  ;;  %v8266_v10 = vld [vmem:[#allocation17_spill] sm:$0xff] }
 0x40d   :  { %v1920_v19 = vadd.f32 %v1919_v53, %v1918_v31  ;;  %v1873_v31 = vmul.f32 %v1841_v50, %v1841_v50  ;;  %v8265_v53 = vld [vmem:[#allocation11_spill] sm:$0xff] }
 0x40e   :  { %v2703_v38 = vpop.permute.xlu1 %2702 }
 0x40f   :  { %v1922_v5 = vadd.f32 %v1921_v17, %v1920_v19  ;;  %5281 = vmatmul.mubr.msk.bf16.vlgmr.msra.gmra.mrb[64].mxu1 %vm1067_vm1, %v6198_v48  ;;  %v1842_v48 = vsub.f32 %v1810_v58, %v6708_v34  ;;  %v1931_v25 = vsel %vm1460_vm3, %v1873_v31, 0.0  ;;  %v2726_v12 = vsel %vm1067_vm1, %v2703_v38, 0  ;;  %v3392_v23 = vpop.permute.xlu0 %3391  ;;  %v8267_v19 = vld [vmem:[#allocation16_spill] sm:$0xff] }
 0x410   :  { %5305 = vmatpush3.bf16.xpose.msra.mxu1 %v2717_v30  ;;  %5284 = vmatprep.mubr.msk.bf16.mxu1 %vm1067_vm1, %v6214_v2  ;;  %v8257_v2 = vld [vmem:[#allocation10_spill] sm:$0xff] }
 0x411   :  { %v1924_v4 = vadd.f32 %v1923_v51, %v1922_v5  ;;  %5461 = vmatprep.subr.msk.bf16.mxu1 %vm1067_vm1, %v2699_v22  ;;  %v1874_v32 = vmul.f32 %v1842_v48, %v1842_v48 }
 0x412   :  { %v3299_v43 = vpop.permute.xlu1 %3298 }
 0x413   :  { %v1926_v60 = vadd.f32 %v1925_v35, %v1924_v4  ;;  %5265 = vmatmul.mubr.msk.bf16.vlgmr.msra.gmra.mrb[64].mxu0 %vm1067_vm1, %v6196_v47  ;;  %v1844_v47 = vsub.f32 %v1812_v16, %v6747_v39  ;;  %v1933_v20 = vsel %vm1460_vm3, %v1874_v32, 0.0  ;;  %v8261_v16 = vld [vmem:[#allocation13_spill] sm:$0xff]  ;;  %v3305_v17 = vpop.permute.xlu0 %3304 }
 0x414   :  { %5289 = vmatpush3.bf16.xpose.msra.mxu0 %v2616_v42  ;;  %5268 = vmatprep.mubr.msk.bf16.mxu0 %vm1067_vm1, %v8257_v2  ;;  %v3322_v5 = vsel %vm1990_vm2, %v3305_v17, 0 }
 0x415   :  { %5457 = vmatprep.subr.msk.bf16.mxu0 %vm1067_vm1, %v2598_v49  ;;  %v1928_v34 = vadd.f32 %v1927_v8, %v1926_v60  ;;  %v1876_v33 = vmul.f32 %v1844_v47, %v1844_v47 }
 0x416   :  { %v3301_v26 = vpop.permute.xlu1 %3300 }
 0x417   :  { %5285 = vmatmul.mubr.msk.bf16.gmra.mrb[68].mxu1 %vm1067_vm1, %v8258_v36  ;;  %v1930_v37 = vadd.f32 %v1929_v63, %v1928_v34  ;;  %v1937_v57 = vsel %vm1460_vm3, %v1876_v33, 0.0 }
 0x418   :  { %5307 = vmatpush3.bf16.xpose.msra.mxu1 %v2720_v18  ;;  %5312 = vmatprep.mubr.msk.bf16.mxu1 %vm1067_vm1, %v8259_v24 }
 0x419   :  { %5462 = vmatprep.subr.msk.bf16.mxu1 %vm1067_vm1, %v2701_v14  ;;  %v1932_v39 = vadd.f32 %v1931_v25, %v1930_v37 }
 0x41a   :  { %v3303_v1 = vpop.permute.xlu1 %3302 }
 0x41b   :  { %5269 = vmatmul.mubr.msk.bf16.gmra.mrb[68].mxu0 %vm1067_vm1, %v8260_v11  ;;  %v1934_v27 = vadd.f32 %v1933_v20, %v1932_v39 }
 0x41c   :  { %5291 = vmatpush3.bf16.xpose.msra.mxu0 %v2619_v41  ;;  %5296 = vmatprep.mubr.msk.bf16.mxu0 %vm1067_vm1, %v8261_v16 }
 0x41d   :  { %5458 = vmatprep.subr.msk.bf16.mxu0 %vm1067_vm1, %v2600_v62  ;;  %v1936_v58 = vadd.f32 %v1935_v21, %v1934_v27 }
 0x41e   :  { %v3394_v6 = vpop.permute.xlu1 %3393 }
 0x41f   :  { %v1938_v46 = vadd.f32 %v1937_v57, %v1936_v58 }
 0x420   :  { %5309 = vmatpush3.bf16.xpose.msra.mxu1 %v2723_v55 }
 0x421   :  { %5463 = vmatprep.subr.msk.bf16.mxu1 %vm1067_vm1, %v2703_v38  ;;  %v6936_v29 = vadd.f32 %v1939_v0, %v1938_v46 }
 0x422   :  { %v3396_v7 = vpop.permute.xlu1 %3395 }
 0x423   :  { %8262 = vst [vmem:[#allocation19_spill] sm:$0xff] %v6936_v29  ;;  %v3413_v22 = vsel %vm1990_vm2, %v3396_v7, 0 }
 0x424   :  { %5293 = vmatpush3.bf16.xpose.msra.mxu0 %v2622_v40 }
 0x425   :  { %5459 = vmatprep.subr.msk.bf16.mxu0 %vm1067_vm1, %v2602_v9 }
 0x428   :  { %5311 = vmatpush3.bf16.xpose.msra.mxu1 %v2726_v12 }
 0x429   :  { %5336 = vmatprep.subr.bf16.mxu1 %v3390_v61 }
 0x42c   :  { %5295 = vmatpush3.bf16.xpose.msra.mxu0 %v2625_v56 }
 0x42d   :  { %5320 = vmatprep.subr.bf16.mxu0 %v3299_v43 }
 0x42f   :  { %5313 = vmatmul.mubr.msk.bf16.vlgmr.msra.gmra.mrb[72].mxu1 %vm1067_vm1, %v8263_v3 }
 0x430   :  { %5316 = vmatprep.mubr.msk.bf16.mxu1 %vm1067_vm1, %v8264_v45  ;;  %5337 = vmatpush3.bf16.msra.mxu1 %v3390_v61 }
 0x431   :  { %5338 = vmatprep.subr.bf16.mxu1 %v3392_v23 }
 0x433   :  { %5297 = vmatmul.mubr.msk.bf16.vlgmr.msra.gmra.mrb[72].mxu0 %vm1067_vm1, %v8265_v53 }
 0x434   :  { %5300 = vmatprep.mubr.msk.bf16.mxu0 %vm1067_vm1, %v8266_v10  ;;  %5321 = vmatpush3.bf16.msra.mxu0 %v3299_v43 }
 0x435   :  { %5339 = vmatpush3.bf16.msra.mxu1 %v3392_v23  ;;  %5322 = vmatprep.subr.bf16.mxu0 %v3301_v26 }
 0x436   :  { %5340 = vmatprep.subr.bf16.mxu1 %v3394_v6 }
 0x437   :  { %5317 = vmatmul.mubr.msk.bf16.gmra.mrb[76].mxu1 %vm1067_vm1, %v8267_v19 }
 0x438   :  { %5323 = vmatpush3.bf16.msra.mxu0 %v3301_v26 }
 0x439   :  { %5341 = vmatpush3.bf16.msra.mxu1 %v3394_v6  ;;  %5324 = vmatprep.subr.bf16.mxu0 %v3303_v1 }
 0x43a   :  { %5465 = vmatprep.subr.msk.bf16.mxu1 %vm1990_vm2, %v3396_v7 }
 0x43b   :  { %5301 = vmatmul.mubr.msk.bf16.gmra.mrb[76].mxu0 %vm1067_vm1, %v8268_v28 }
 0x43c   :  { %5325 = vmatpush3.bf16.msra.mxu0 %v3303_v1 }
 0x43d   :  { %5343 = vmatpush3.bf16.msra.mxu1 %v3413_v22  ;;  %5464 = vmatprep.subr.msk.bf16.mxu0 %vm1990_vm2, %v3305_v17 }
 0x440   :  { %5327 = vmatpush3.bf16.msra.mxu0 %v3322_v5 }
 0x485   :  { %v5202_v30 = vpop.f32.mrb[48].mxu0 }
 0x486   :  { %v2028_v50 = vpop.f32.mrb[49].mxu0  ;;  %v2346_v13 = vsel %vm327_vm0, %v5202_v30, 0.0 }
 0x487   :  { %v5203_v15 = vpop.f32.mrb[50].mxu0  ;;  %v2332_v60 = vsel %vm327_vm0, %v2028_v50, 0.0 }
 0x488   :  { %v2031_v51 = vpop.f32.mrb[51].mxu0  ;;  %v2353_v2 = vsel %vm327_vm0, %v5203_v15, 0.0 }
 0x489   :  { %v5218_v4 = vpop.f32.mrb[48].mxu1  ;;  %v2339_v34 = vsel %vm327_vm0, %v2031_v51, 0.0 }
 0x48a   :  { %v2347_v35 = vsel %vm327_vm0, %v5218_v4, 0.0  ;;  %v2119_v48 = vpop.f32.mrb[49].mxu1 }
 0x48b   :  { %v2348_v42 = vadd.f32 %v2347_v35, %v2346_v13  ;;  %v2333_v8 = vsel %vm327_vm0, %v2119_v48, 0.0  ;;  %v5219_v49 = vpop.f32.mrb[50].mxu1 }
 0x48c   :  { %v2334_v54 = vadd.f32 %v2333_v8, %v2332_v60  ;;  %v2354_v31 = vsel %vm327_vm0, %v5219_v49, 0.0  ;;  %v2122_v14 = vpop.f32.mrb[51].mxu1 }
 0x48d   :  { %v2355_v32 = vadd.f32 %v2354_v31, %v2353_v2  ;;  %v2340_v47 = vsel %vm327_vm0, %v2122_v14, 0.0 }
 0x48e   :  { %v2341_v63 = vadd.f32 %v2340_v47, %v2339_v34 }
 0x49d   :  { %v5206_v36 = vpop.f32.mrb[52].mxu0 }
 0x49e   :  { %v2044_v18 = vpop.f32.mrb[53].mxu0  ;;  %v2374_v25 = vsel %vm327_vm0, %v5206_v36, 0.0 }
 0x49f   :  { %v5207_v37 = vpop.f32.mrb[54].mxu0  ;;  %v2360_v20 = vsel %vm327_vm0, %v2044_v18, 0.0 }
 0x4a0   :  { %v2047_v59 = vpop.f32.mrb[55].mxu0  ;;  %v2382_v27 = vsel %vm2381_vm5, %v5207_v37, 0.0 }
 0x4a1   :  { %v5222_v44 = vpop.f32.mrb[52].mxu1  ;;  %v2367_v58 = vsel %vm327_vm0, %v2047_v59, 0.0 }
 0x4a2   :  { %v2375_v39 = vsel %vm327_vm0, %v5222_v44, 0.0  ;;  %v2135_v33 = vpop.f32.mrb[53].mxu1 }
 0x4a3   :  { %v2376_v38 = vadd.f32 %v2375_v39, %v2374_v25  ;;  %v2361_v11 = vsel %vm327_vm0, %v2135_v33, 0.0  ;;  %v5223_v41 = vpop.f32.mrb[54].mxu1 }
 0x4a4   :  { %v2362_v62 = vadd.f32 %v2361_v11, %v2360_v20  ;;  %v2383_v52 = vsel %vm2381_vm5, %v5223_v41, 0.0  ;;  %v2138_v21 = vpop.f32.mrb[55].mxu1 }
 0x4a5   :  { %v2384_v57 = vadd.f32 %v2383_v52, %v2382_v27  ;;  %v2368_v55 = vsel %vm327_vm0, %v2138_v21, 0.0 }
 0x4a6   :  { %v2369_v46 = vadd.f32 %v2368_v55, %v2367_v58 }
 0x4b0   :  { %v5234_v0 = vpop.f32.mrb[56].mxu0 }
 0x4b1   :  { %v2349_v43 = vsel %vm327_vm0, %v5234_v0, 0.0  ;;  %v2210_v9 = vpop.f32.mrb[57].mxu0 }
 0x4b2   :  { %v2350_v40 = vadd.f32 %v2349_v43, %v2348_v42  ;;  %v2335_v26 = vsel %vm327_vm0, %v2210_v9, 0.0  ;;  %v5235_v12 = vpop.f32.mrb[58].mxu0 }
 0x4b3   :  { %v2336_v61 = vadd.f32 %v2335_v26, %v2334_v54  ;;  %v2356_v56 = vsel %vm327_vm0, %v5235_v12, 0.0  ;;  %v2213_v1 = vpop.f32.mrb[59].mxu0 }
 0x4b4   :  { %v2357_v23 = vadd.f32 %v2356_v56, %v2355_v32  ;;  %v2342_v6 = vsel %vm327_vm0, %v2213_v1, 0.0 }
 0x4b5   :  { %v2343_v7 = vadd.f32 %v2342_v6, %v2341_v63  ;;  %v5250_v17 = vpop.f32.mrb[56].mxu1 }
 0x4b6   :  { %v2351_v22 = vsel %vm327_vm0, %v5250_v17, 0.0  ;;  %v2301_v5 = vpop.f32.mrb[57].mxu1 }
 0x4b7   :  { %v6979_v30 = vadd.f32 %v2351_v22, %v2350_v40  ;;  %v2337_v50 = vsel %vm327_vm0, %v2301_v5, 0.0  ;;  %v5251_v15 = vpop.f32.mrb[58].mxu1 }
 0x4b8   :  { %v6982_v51 = vadd.f32 %v2337_v50, %v2336_v61  ;;  %v2358_v4 = vsel %vm327_vm0, %v5251_v15, 0.0  ;;  %v2304_v13 = vpop.f32.mrb[59].mxu1 }
 0x4b9   :  { %v6985_v35 = vadd.f32 %v2358_v4, %v2357_v23  ;;  %v2344_v48 = vsel %vm327_vm0, %v2304_v13, 0.0 }
 0x4ba   :  { %v6988_v60 = vadd.f32 %v2344_v48, %v2343_v7 }
 0x4da   :  { %v5254_v42 = vpop.f32.mrb[60].mxu1 }
 0x4db   :  { %v2317_v8 = vpop.f32.mrb[61].mxu1  ;;  %v2379_v63 = vsel %vm327_vm0, %v5254_v42, 0.0 }
 0x4dc   :  { %v5255_v49 = vpop.f32.mrb[62].mxu1  ;;  %v2365_v59 = vsel %vm327_vm0, %v2317_v8, 0.0 }
 0x4dd   :  { %v2320_v2 = vpop.f32.mrb[63].mxu1  ;;  %v2387_v20 = vsel %vm2381_vm5, %v5255_v49, 0.0 }
 0x4de   :  { %v5238_v54 = vpop.f32.mrb[60].mxu0 }
 0x4df   :  { %v2377_v31 = vsel %vm327_vm0, %v5238_v54, 0.0  ;;  %v2226_v14 = vpop.f32.mrb[61].mxu0 }
 0x4e0   :  { %v2378_v34 = vadd.f32 %v2377_v31, %v2376_v38  ;;  %v2363_v32 = vsel %vm327_vm0, %v2226_v14, 0.0  ;;  %v5239_v47 = vpop.f32.mrb[62].mxu0 }
 0x4e1   :  { %v2364_v36 = vadd.f32 %v2363_v32, %v2362_v62  ;;  %v2385_v18 = vsel %vm2381_vm5, %v5239_v47, 0.0  ;;  %v2229_v37 = vpop.f32.mrb[63].mxu0  ;;  %v2372_v62 = vsel %vm327_vm0, %v2320_v2, 0.0 }
 0x4e2   :  { %v6995_v44 = vadd.f32 %v2379_v63, %v2378_v34  ;;  %v2386_v25 = vadd.f32 %v2385_v18, %v2384_v57  ;;  %v2370_v39 = vsel %vm327_vm0, %v2229_v37, 0.0  ;;  %v6998_v33 = vpop.f32.mrb[64].mxu1 }
 0x4e3   :  { %v7001_v38 = vadd.f32 %v2365_v59, %v2364_v36  ;;  %v2371_v11 = vadd.f32 %v2370_v39, %v2369_v46  ;;  %v7003_v41 = vpop.f32.mrb[65].mxu1  ;;  %v2823_v27 = vsel %vm1460_vm3, %v6998_v33, -inf }
 0x4e4   :  { %v7008_v52 = vadd.f32 %v2387_v20, %v2386_v25  ;;  %2824 = vmax.xlane.f32.xlu1 %v2823_v27  ;;  %v7010_v21 = vpop.f32.mrb[66].mxu1  ;;  %v2817_v46 = vsel %vm1460_vm3, %v7003_v41, -inf }
 0x4e5   :  { %v7012_v58 = vadd.f32 %v2372_v62, %v2371_v11  ;;  %v7014_v57 = vpop.f32.mrb[67].mxu1  ;;  %v2826_v4 = vsel %vm1460_vm3, %v7010_v21, -inf }
 0x4e6   :  { %8269 = vst [vmem:[#allocation23_spill] sm:$0xff] %v7008_v52  ;;  %v7016_v55 = vpop.f32.mrb[64].mxu0  ;;  %v2820_v48 = vsel %vm1460_vm3, %v7014_v57, -inf }
 0x4e7   :  { %v7018_v0 = vpop.f32.mrb[65].mxu0  ;;  %v2799_v43 = vsel %vm1460_vm3, %v7016_v55, -inf }
 0x4e8   :  { %2818 = vmax.xlane.f32.xlu1 %v2817_v46  ;;  %v7024_v9 = vpop.f32.mrb[66].mxu0  ;;  %2800 = vmax.xlane.f32.xlu0 %v2799_v43  ;;  %v2793_v56 = vsel %vm1460_vm3, %v7018_v0, -inf }
 0x4e9   :  { %v7026_v40 = vpop.f32.mrb[67].mxu0  ;;  %v2802_v22 = vsel %vm1460_vm3, %v7024_v9, -inf }
 0x4ea   :  { %v7028_v26 = vpop.f32.mrb[68].mxu1  ;;  %v2796_v12 = vsel %vm1460_vm3, %v7026_v40, -inf }
 0x4eb   :  { %v7032_v61 = vpop.f32.mrb[69].mxu1  ;;  %v2835_v15 = vsel %vm1460_vm3, %v7028_v26, -inf }
 0x4ec   :  { %v7036_v1 = vpop.f32.mrb[70].mxu1  ;;  %2797 = vmax.xlane.f32.xlu1 %v2796_v12  ;;  %2794 = vmax.xlane.f32.xlu0 %v2793_v56  ;;  %v2829_v42 = vsel %vm1460_vm3, %v7032_v61, -inf }
 0x4ed   :  { %v7038_v23 = vpop.f32.mrb[71].mxu1  ;;  %v2838_v49 = vsel %vm1482_vm4, %v7036_v1, -inf }
 0x4ee   :  { %v7040_v6 = vpop.f32.mrb[68].mxu0  ;;  %v2832_v36 = vsel %vm1460_vm3, %v7038_v23, -inf }
 0x4ef   :  { %v7042_v7 = vpop.f32.mrb[69].mxu0  ;;  %v2811_v17 = vsel %vm1460_vm3, %v7040_v6, -inf }
 0x4f0   :  { %2812 = vmax.xlane.f32.xlu1 %v2811_v17  ;;  %v7048_v5 = vpop.f32.mrb[70].mxu0  ;;  %2803 = vmax.xlane.f32.xlu0 %v2802_v22  ;;  %v2805_v13 = vsel %vm1460_vm3, %v7042_v7, -inf }
 0x4f1   :  { %v7050_v50 = vpop.f32.mrb[71].mxu0  ;;  %v2814_v8 = vsel %vm1482_vm4, %v7048_v5, -inf }
 0x4f2   :  { %v2808_v31 = vsel %vm1460_vm3, %v7050_v50, -inf }
 0x4f4   :  { %2836 = vmax.xlane.f32.xlu1 %v2835_v15  ;;  %2827 = vmax.xlane.f32.xlu0 %v2826_v4 }
 0x4f8   :  { %2806 = vmax.xlane.f32.xlu1 %v2805_v13  ;;  %2821 = vmax.xlane.f32.xlu0 %v2820_v48 }
 0x4fc   :  { %2830 = vmax.xlane.f32.xlu1 %v2829_v42  ;;  %2815 = vmax.xlane.f32.xlu0 %v2814_v8 }
 0x500   :  { %2839 = vmax.xlane.f32.xlu0 %v2838_v49 }
 0x502   :  { %v7066_v2 = vpop.f32.mrb[72].mxu1 }
 0x503   :  { %v7068_v54 = vpop.f32.mrb[73].mxu1  ;;  %v2871_v39 = vsel %vm1460_vm3, %v7066_v2, -inf }
 0x504   :  { %v7072_v14 = vpop.f32.mrb[74].mxu1  ;;  %2809 = vmax.xlane.f32.xlu0 %v2808_v31  ;;  %v2865_v22 = vsel %vm1460_vm3, %v7068_v54, -inf }
 0x505   :  { %v7074_v34 = vpop.f32.mrb[75].mxu1  ;;  %v2874_v12 = vsel %vm1460_vm3, %v7072_v14, -inf }
 0x506   :  { %v7076_v32 = vpop.f32.mrb[72].mxu0  ;;  %v2868_v13 = vsel %vm1460_vm3, %v7074_v34, -inf }
 0x507   :  { %v7078_v47 = vpop.f32.mrb[73].mxu0  ;;  %v2847_v63 = vsel %vm1460_vm3, %v7076_v32, -inf }
 0x508   :  { %2848 = vmax.xlane.f32.xlu1 %v2847_v63  ;;  %v7084_v18 = vpop.f32.mrb[74].mxu0  ;;  %2833 = vmax.xlane.f32.xlu0 %v2832_v36  ;;  %v2841_v43 = vsel %vm1460_vm3, %v7078_v47, -inf }
 0x509   :  { %v7086_v37 = vpop.f32.mrb[75].mxu0  ;;  %v2850_v20 = vsel %vm1460_vm3, %v7084_v18, -inf }
 0x50a   :  { %v7088_v59 = vpop.f32.mrb[76].mxu1  ;;  %v2844_v15 = vsel %vm1460_vm3, %v7086_v37, -inf }
 0x50b   :  { %v7090_v25 = vpop.f32.mrb[77].mxu1  ;;  %v2883_v48 = vsel %vm1460_vm3, %v7088_v59, -inf }
 0x50c   :  { %v7096_v11 = vpop.f32.mrb[78].mxu1  ;;  %2872 = vmax.xlane.f32.xlu1 %v2871_v39  ;;  %2851 = vmax.xlane.f32.xlu0 %v2850_v20  ;;  %v2877_v31 = vsel %vm1460_vm3, %v7090_v25, -inf }
 0x50d   :  { %v7098_v27 = vpop.f32.mrb[79].mxu1  ;;  %v2886_v49 = vsel %vm1482_vm4, %v7096_v11, -inf }
 0x50e   :  { %v7100_v62 = vpop.f32.mrb[76].mxu0  ;;  %v2880_v36 = vsel %vm1460_vm3, %v7098_v27, -inf }
 0x50f   :  { %v7102_v46 = vpop.f32.mrb[77].mxu0  ;;  %v2859_v4 = vsel %vm1460_vm3, %v7100_v62, -inf }
 0x510   :  { %2842 = vmax.xlane.f32.xlu1 %v2841_v43  ;;  %v7108_v56 = vpop.f32.mrb[78].mxu0  ;;  %2875 = vmax.xlane.f32.xlu0 %v2874_v12  ;;  %v2853_v8 = vsel %vm1460_vm3, %v7102_v46, -inf }
 0x511   :  { %v7110_v17 = vpop.f32.mrb[79].mxu0  ;;  %v2862_v42 = vsel %vm1482_vm4, %v7108_v56, -inf }
 0x512   :  { %v2856_v63 = vsel %vm1460_vm3, %v7110_v17, -inf }
 0x514   :  { %2866 = vmax.xlane.f32.xlu1 %v2865_v22  ;;  %2845 = vmax.xlane.f32.xlu0 %v2844_v15 }
 0x518   :  { %2860 = vmax.xlane.f32.xlu1 %v2859_v4  ;;  %2869 = vmax.xlane.f32.xlu0 %v2868_v13 }
 0x51c   :  { %2884 = vmax.xlane.f32.xlu1 %v2883_v48  ;;  %2863 = vmax.xlane.f32.xlu0 %v2862_v42 }
 0x520   :  { %2854 = vmax.xlane.f32.xlu1 %v2853_v8  ;;  %2887 = vmax.xlane.f32.xlu0 %v2886_v49 }
 0x524   :  { %2878 = vmax.xlane.f32.xlu1 %v2877_v31  ;;  %2857 = vmax.xlane.f32.xlu0 %v2856_v63 }
 0x528   :  { %2881 = vmax.xlane.f32.xlu0 %v2880_v36 }
 0x535   :  { %3571 = vrot.lane.b32.xlu1 %v8259_v24, %s5881_s26 }
 0x539   :  { %3482 = vrot.lane.b32.xlu1 %v8265_v53, %s5881_s26 }
 0x53d   :  { %3573 = vrot.lane.b32.xlu1 %v8263_v3, %s5881_s26 }
 0x53e   :  { %3480 = vrot.lane.b32.xlu0 %v8261_v16, %s5881_s26 }
 0x541   :  { %3484 = vrot.lane.b32.xlu1 %v8266_v10, %s5881_s26 }
 0x545   :  { %3575 = vrot.lane.b32.xlu1 %v8264_v45, %s5881_s26 }
 0x571   :  { %v2825_v39 = vpop.xlane.xlu1 %2824 }
 0x572   :  { %v2899_v20 = vsub.f32 %v6998_v33, %v2825_v39 }
 0x574   :  { %v2941_v22 = vmul.f32 1.442695, %v2899_v20 }
 0x575   :  { %v2819_v43 = vpop.xlane.xlu1 %2818  ;;  %v2801_v24 = vpop.xlane.xlu0 %2800 }
 0x576   :  { %v2891_v12 = vsub.f32 %v7016_v55, %v2801_v24  ;;  %v2897_v16 = vsub.f32 %v7003_v41, %v2819_v43 }
 0x578   :  { %v2925_v53 = vmul.f32 1.442695, %v2891_v12  ;;  %v2937_v8 = vmul.f32 1.442695, %v2897_v16 }
 0x579   :  { %v2798_v15 = vpop.xlane.xlu1 %2797  ;;  %v2795_v3 = vpop.xlane.xlu0 %2794 }
 0x57a   :  { %v2889_v4 = vsub.f32 %v7018_v0, %v2795_v3  ;;  %5629 = vpow2.f32 %v2925_v53  ;;  %v2890_v33 = vsub.f32 %v7026_v40, %v2798_v15 }
 0x57b   :  { %5631 = vpow2.f32 %v2941_v22 }
 0x57c   :  { %v2921_v10 = vmul.f32 1.442695, %v2889_v4  ;;  %v2923_v63 = vmul.f32 1.442695, %v2890_v33 }
 0x57d   :  { %v2813_v13 = vpop.xlane.xlu1 %2812  ;;  %v2804_v45 = vpop.xlane.xlu0 %2803 }
 0x57e   :  { %v2892_v48 = vsub.f32 %v7024_v9, %v2804_v45  ;;  %5633 = vpow2.f32 %v2921_v10  ;;  %v2895_v55 = vsub.f32 %v7040_v6, %v2813_v13 }
 0x580   :  { %v2927_v42 = vmul.f32 1.442695, %v2892_v48  ;;  %v2933_v9 = vmul.f32 1.442695, %v2895_v55 }
 0x581   :  { %v2837_v49 = vpop.xlane.xlu1 %2836  ;;  %v2828_v31 = vpop.xlane.xlu0 %2827 }
 0x582   :  { %v2900_v0 = vsub.f32 %v7010_v21, %v2828_v31  ;;  %5635 = vpow2.f32 %v2927_v42  ;;  %v2903_v41 = vsub.f32 %v7028_v26, %v2837_v49 }
 0x583   :  { %5637 = vpow2.f32 %v2937_v8 }
 0x584   :  { %v2943_v36 = vmul.f32 1.442695, %v2900_v0  ;;  %v7155_v39 = vpop.eup %5629  ;;  %v2949_v21 = vmul.f32 1.442695, %v2903_v41 }
 0x585   :  { %v2807_v20 = vpop.xlane.xlu1 %2806  ;;  %v2822_v40 = vpop.xlane.xlu0 %2821  ;;  %v2991_v6 = vsel %vm1460_vm3, %v7155_v39, 0.0 }
 0x586   :  { %v2898_v43 = vsub.f32 %v7014_v57, %v2822_v40  ;;  %v7160_v24 = vpop.eup %5631  ;;  %5639 = vpow2.f32 %v2943_v36  ;;  %2992 = vadd.xlane.f32.xlu1 %v2991_v6  ;;  %v2893_v26 = vsub.f32 %v7042_v7, %v2807_v20 }
 0x587   :  { %5641 = vpow2.f32 %v2923_v63  ;;  %v3015_v57 = vsel %vm1460_vm3, %v7160_v24, 0.0 }
 0x588   :  { %5643 = vpow2.f32 %v2933_v9  ;;  %v2939_v12 = vmul.f32 1.442695, %v2898_v43  ;;  %v7166_v3 = vpop.eup %5633  ;;  %v2929_v4 = vmul.f32 1.442695, %v2893_v26 }
 0x589   :  { %v2831_v53 = vpop.xlane.xlu1 %2830  ;;  %v2816_v22 = vpop.xlane.xlu0 %2815  ;;  %5645 = vpow2.f32 %v2949_v21 }
 0x58a   :  { %v2896_v15 = vsub.f32 %v7048_v5, %v2816_v22  ;;  %3016 = vadd.xlane.f32.xlu1 %v3015_v57  ;;  %v2901_v16 = vsub.f32 %v7032_v61, %v2831_v53  ;;  %5647 = vpow2.f32 %v2939_v12  ;;  %v2985_v5 = vsel %vm1460_vm3, %v7166_v3, 0.0 }
 0x58b   :  { %5649 = vpow2.f32 %v2929_v4 }
 0x58c   :  { %v7169_v10 = vpop.eup %5635  ;;  %v2935_v7 = vmul.f32 1.442695, %v2896_v15  ;;  %v2945_v42 = vmul.f32 1.442695, %v2901_v16 }
 0x58d   :  { %v2840_v13 = vpop.xlane.xlu0 %2839  ;;  %v2994_v48 = vsel %vm1460_vm3, %v7169_v10, 0.0  ;;  %v7176_v33 = vpop.eup %5637 }
 0x58e   :  { %v2904_v45 = vsub.f32 %v7036_v1, %v2840_v13  ;;  %2986 = vadd.xlane.f32.xlu1 %v2985_v5  ;;  %2995 = vadd.xlane.f32.xlu0 %v2994_v48  ;;  %5651 = vpow2.f32 %v2935_v7  ;;  %v3009_v31 = vsel %vm1460_vm3, %v7176_v33, 0.0 }
 0x58f   :  { %5653 = vpow2.f32 %v2945_v42 }
 0x590   :  { %v7178_v61 = vpop.eup %5639  ;;  %v2951_v8 = vmul.f32 1.442695, %v2904_v45 }
 0x591   :  { %v2810_v55 = vpop.xlane.xlu0 %2809  ;;  %v7180_v49 = vpop.eup %5641  ;;  %v3018_v0 = vsel %vm1460_vm3, %v7178_v61, 0.0 }
 0x592   :  { %v2894_v1 = vsub.f32 %v7050_v50, %v2810_v55  ;;  %v7187_v63 = vpop.eup %5643  ;;  %3010 = vadd.xlane.f32.xlu1 %v3009_v31  ;;  %3019 = vadd.xlane.f32.xlu0 %v3018_v0  ;;  %5655 = vpow2.f32 %v2951_v8  ;;  %v2988_v6 = vsel %vm1460_vm3, %v7180_v49, 0.0 }
 0x593   :  { %v7189_v20 = vpop.eup %5645  ;;  %v3003_v43 = vsel %vm1460_vm3, %v7187_v63, 0.0 }
 0x594   :  { %v2931_v41 = vmul.f32 1.442695, %v2894_v1  ;;  %v7197_v21 = vpop.eup %5647 }
 0x595   :  { %v2849_v36 = vpop.xlane.xlu1 %2848  ;;  %v2834_v9 = vpop.xlane.xlu0 %2833  ;;  %v3012_v57 = vsel %vm1460_vm3, %v7197_v21, 0.0 }
 0x596   :  { %v2907_v40 = vsub.f32 %v7076_v32, %v2849_v36  ;;  %v2902_v50 = vsub.f32 %v7038_v23, %v2834_v9  ;;  %3004 = vadd.xlane.f32.xlu1 %v3003_v43  ;;  %2989 = vadd.xlane.f32.xlu0 %v2988_v6  ;;  %5657 = vpow2.f32 %v2931_v41  ;;  %v7199_v15 = vpop.eup %5649  ;;  %v3027_v32 = vsel %vm1460_vm3, %v7189_v20, 0.0 }
 0x598   :  { %v2957_v26 = vmul.f32 1.442695, %v2907_v40  ;;  %v2947_v12 = vmul.f32 1.442695, %v2902_v50  ;;  %v7206_v4 = vpop.eup %5651 }
 0x599   :  { %v2873_v53 = vpop.xlane.xlu1 %2872  ;;  %v2852_v22 = vpop.xlane.xlu0 %2851  ;;  %v3006_v48 = vsel %vm1482_vm4, %v7206_v4, 0.0 }
 0x59a   :  { %5659 = vpow2.f32 %v2957_v26  ;;  %v2915_v23 = vsub.f32 %v7066_v2, %v2873_v53  ;;  %3028 = vadd.xlane.f32.xlu1 %v3027_v32  ;;  %3013 = vadd.xlane.f32.xlu0 %v3012_v57  ;;  %v7208_v45 = vpop.eup %5653  ;;  %v2997_v2 = vsel %vm1460_vm3, %v7199_v15, 0.0  ;;  %v2908_v8 = vsub.f32 %v7084_v18, %v2852_v22 }
 0x59b   :  { %5661 = vpow2.f32 %v2947_v12 }
 0x59c   :  { %v2973_v16 = vmul.f32 1.442695, %v2915_v23  ;;  %v7215_v42 = vpop.eup %5655  ;;  %v2959_v50 = vmul.f32 1.442695, %v2908_v8 }
 0x59d   :  { %v2843_v7 = vpop.xlane.xlu1 %2842  ;;  %v2876_v13 = vpop.xlane.xlu0 %2875  ;;  %v3030_v41 = vsel %vm1482_vm4, %v7215_v42, 0.0 }
 0x59e   :  { %v2905_v5 = vsub.f32 %v7078_v47, %v2843_v7  ;;  %2998 = vadd.xlane.f32.xlu1 %v2997_v2  ;;  %3007 = vadd.xlane.f32.xlu0 %v3006_v48  ;;  %5663 = vpow2.f32 %v2973_v16  ;;  %v3021_v47 = vsel %vm1460_vm3, %v7208_v45, 0.0  ;;  %v2916_v18 = vsub.f32 %v7072_v14, %v2876_v13 }
 0x5a0   :  { %v2953_v55 = vmul.f32 1.442695, %v2905_v5  ;;  %v7223_v36 = vpop.eup %5657  ;;  %v2975_v23 = vmul.f32 1.442695, %v2916_v18 }
 0x5a1   :  { %v2867_v1 = vpop.xlane.xlu1 %2866  ;;  %v2846_v31 = vpop.xlane.xlu0 %2845  ;;  %v3000_v12 = vsel %vm1460_vm3, %v7223_v36, 0.0 }
 0x5a2   :  { %v2913_v0 = vsub.f32 %v7068_v54, %v2867_v1  ;;  %3022 = vadd.xlane.f32.xlu1 %v3021_v47  ;;  %3031 = vadd.xlane.f32.xlu0 %v3030_v41  ;;  %5665 = vpow2.f32 %v2953_v55  ;;  %v2906_v14 = vsub.f32 %v7086_v37, %v2846_v31 }
 0x5a4   :  { %v7225_v9 = vpop.eup %5659  ;;  %v2969_v40 = vmul.f32 1.442695, %v2913_v0 }
 0x5a5   :  { %v2861_v43 = vpop.xlane.xlu1 %2860  ;;  %v2870_v6 = vpop.xlane.xlu0 %2869  ;;  %v3039_v54 = vsel %vm1460_vm3, %v7225_v9, 0.0 }
 0x5a6   :  { %5667 = vpow2.f32 %v2969_v40  ;;  %v2914_v26 = vsub.f32 %v7074_v34, %v2870_v6  ;;  %v7233_v53 = vpop.eup %5661  ;;  %3040 = vadd.xlane.f32.xlu1 %v3039_v54  ;;  %3001 = vadd.xlane.f32.xlu0 %v3000_v12  ;;  %v2955_v34 = vmul.f32 1.442695, %v2906_v14  ;;  %v2911_v13 = vsub.f32 %v7100_v62, %v2861_v43 }
 0x5a7   :  { %5669 = vpow2.f32 %v2959_v50  ;;  %v3024_v16 = vsel %vm1460_vm3, %v7233_v53, 0.0 }
 0x5a8   :  { %v2971_v22 = vmul.f32 1.442695, %v2914_v26  ;;  %v7238_v7 = vpop.eup %5663  ;;  %v2965_v47 = vmul.f32 1.442695, %v2911_v13 }
 0x5a9   :  { %v2885_v32 = vpop.xlane.xlu1 %2884  ;;  %v2864_v57 = vpop.xlane.xlu0 %2863  ;;  %v3063_v37 = vsel %vm1460_vm3, %v7238_v7, 0.0 }
 0x5aa   :  { %5671 = vpow2.f32 %v2971_v22  ;;  %3025 = vadd.xlane.f32.xlu0 %v3024_v16  ;;  %v2919_v62 = vsub.f32 %v7088_v59, %v2885_v32 }
 0x5ab   :  { %5673 = vpow2.f32 %v2975_v23 }
 0x5ac   :  { %v7245_v55 = vpop.eup %5665  ;;  %5675 = vpow2.f32 %v2955_v34  ;;  %v2981_v43 = vmul.f32 1.442695, %v2919_v62 }
 0x5ad   :  { %v2855_v5 = vpop.xlane.xlu1 %2854  ;;  %v2888_v2 = vpop.xlane.xlu0 %2887 }
 0x5ae   :  { %v2909_v48 = vsub.f32 %v7102_v46, %v2855_v5  ;;  %v2920_v8 = vsub.f32 %v7096_v11, %v2888_v2  ;;  %3064 = vadd.xlane.f32.xlu0 %v3063_v37  ;;  %v3033_v11 = vsel %vm1460_vm3, %v7245_v55, 0.0 }
 0x5b0   :  { %v7247_v1 = vpop.eup %5667  ;;  %v2961_v31 = vmul.f32 1.442695, %v2909_v48  ;;  %v2983_v0 = vmul.f32 1.442695, %v2920_v8 }
 0x5b1   :  { %v2879_v41 = vpop.xlane.xlu1 %2878  ;;  %v3057_v46 = vsel %vm1460_vm3, %v7247_v1, 0.0  ;;  %v2858_v40 = vpop.xlane.xlu0 %2857 }
 0x5b2   :  { %5677 = vpow2.f32 %v2961_v31  ;;  %3058 = vadd.xlane.f32.xlu1 %v3057_v46  ;;  %v7254_v50 = vpop.eup %5669  ;;  %3034 = vadd.xlane.f32.xlu0 %v3033_v11  ;;  %v2917_v59 = vsub.f32 %v7090_v25, %v2879_v41  ;;  %v2912_v25 = vsub.f32 %v7108_v56, %v2864_v57  ;;  %v2910_v2 = vsub.f32 %v7110_v17, %v2858_v40 }
 0x5b3   :  { %5679 = vpow2.f32 %v2983_v0  ;;  %v3042_v12 = vsel %vm1460_vm3, %v7254_v50, 0.0 }
 0x5b4   :  { %v7256_v18 = vpop.eup %5671  ;;  %5681 = vpow2.f32 %v2965_v47  ;;  %v2977_v32 = vmul.f32 1.442695, %v2917_v59  ;;  %v2967_v5 = vmul.f32 1.442695, %v2912_v25  ;;  %v2963_v37 = vmul.f32 1.442695, %v2910_v2 }
 0x5b5   :  { %v7259_v6 = vpop.permute.xlu1 %3571  ;;  %v2882_v54 = vpop.xlane.xlu0 %2881  ;;  %v3060_v22 = vsel %vm1460_vm3, %v7256_v18, 0.0  ;;  %5683 = vpow2.f32 %v2981_v43 }
 0x5b6   :  { %5368 = vmatprep.subr.bf16.mxu1 %v7259_v6  ;;  %v2918_v26 = vsub.f32 %v7098_v27, %v2882_v54  ;;  %v7267_v23 = vpop.eup %5673  ;;  %3043 = vadd.xlane.f32.xlu0 %v3042_v12 }
 0x5b7   :  { %3061 = vadd.xlane.f32.xlu1 %v3060_v22  ;;  %v3066_v27 = vsel %vm1460_vm3, %v7267_v23, 0.0  ;;  %v7275_v34 = vpop.eup %5675  ;;  %v5818_v22 = vld [vmem:[%s8181_s0 + $0x8] sm:$0xff] }
 0x5b8   :  { %v2979_v14 = vmul.f32 1.442695, %v2918_v26  ;;  %v3036_v48 = vsel %vm1460_vm3, %v7275_v34, 0.0  ;;  %v5817_v26 = vld [vmem:[%s8181_s0] sm:$0xff] }
 0x5b9   :  { %v7270_v16 = vpop.permute.xlu0 %3480  ;;  %v7320_v12 = vadd.f32 %v5817_v26, %v6982_v51 }
 0x5ba   :  { %5685 = vpow2.f32 %v2979_v14  ;;  %5352 = vmatprep.subr.bf16.mxu0 %v7270_v16  ;;  %3067 = vadd.xlane.f32.xlu0 %v3066_v27  ;;  %v7326_v14 = vadd.f32 %v5818_v22, %v6988_v60 }
 0x5bb   :  { %5687 = vpow2.f32 %v2977_v32  ;;  %v3813_v51 = vmul.f32 %v7320_v12, %v7320_v12  ;;  %v7338_v32 = vpop.permute.xlu1 %3482 }
 0x5bc   :  { %v7277_v13 = vpop.eup %5677  ;;  %5689 = vpow2.f32 %v2967_v5  ;;  %v3771_v25 = vsel %vm327_vm0, %v7326_v14, 0.0 }
 0x5bd   :  { %v3045_v56 = vsel %vm1460_vm3, %v7277_v13, 0.0  ;;  %v7282_v57 = vpop.eup %5679  ;;  %5691 = vpow2.f32 %v2963_v37  ;;  %v3828_v27 = vsel %vm327_vm0, %v3813_v51, 0.0 }
 0x5be   :  { %3046 = vadd.xlane.f32.xlu1 %v3045_v56  ;;  %v7286_v8 = vpop.eup %5681  ;;  %3037 = vadd.xlane.f32.xlu0 %v3036_v48  ;;  %v3078_v31 = vsel %vm1482_vm4, %v7282_v57, 0.0  ;;  %v5821_v48 = vld [vmem:[%s8181_s0 + $0x30] sm:$0xff] }
 0x5bf   :  { %v3051_v17 = vsel %vm1460_vm3, %v7286_v8, 0.0  ;;  %v7292_v0 = vpop.eup %5683  ;;  %v7350_v56 = vpop.permute.xlu1 %3573  ;;  %v7356_v37 = vadd.f32 %v5821_v48, %v6995_v44  ;;  %v5822_v44 = vld [vmem:[%s8181_s0 + $0x18] sm:$0xff] }
 0x5c0   :  { %v3075_v41 = vsel %vm1460_vm3, %v7292_v0, 0.0 }
 0x5c1   :  { %8272 = vst [vmem:[#allocation24_spill] sm:$0xff] %v7356_v37  ;;  %v3819_v26 = vmul.f32 %v7356_v37, %v7356_v37 }
 0x5c2   :  { %3079 = vadd.xlane.f32.xlu1 %v3078_v31  ;;  %3052 = vadd.xlane.f32.xlu0 %v3051_v17  ;;  %v3768_v17 = vsel %vm327_vm0, %v7320_v12, 0.0 }
 0x5c4   :  { %v7294_v47 = vpop.eup %5685 }
 0x5c5   :  { %v3072_v62 = vsel %vm1460_vm3, %v7294_v47, 0.0  ;;  %v7300_v46 = vpop.eup %5687 }
 0x5c6   :  { %3073 = vadd.xlane.f32.xlu1 %v3072_v62  ;;  %3076 = vadd.xlane.f32.xlu0 %v3075_v41  ;;  %v3069_v40 = vsel %vm1460_vm3, %v7300_v46, 0.0  ;;  %v7304_v11 = vpop.eup %5689  ;;  %v3786_v62 = vsel %vm327_vm0, %v7356_v37, 0.0 }
 0x5c7   :  { %v3054_v43 = vsel %vm1482_vm4, %v7304_v11, 0.0  ;;  %v7308_v59 = vpop.eup %5691 }
 0x5c8   :  { %v3048_v54 = vsel %vm1460_vm3, %v7308_v59, 0.0 }
 0x5ca   :  { %3070 = vadd.xlane.f32.xlu0 %v3069_v40  ;;  %v7372_v40 = vadd.f32 %v5822_v44, %v6985_v35  ;;  %v3846_v35 = vsel %vm327_vm0, %v3819_v26, 0.0 }
 0x5cc   :  { %8273 = vst [vmem:[#allocation22_spill] sm:$0xff] %v7372_v40  ;;  %v3777_v22 = vsel %vm327_vm0, %v7372_v40, 0.0 }
 0x5ce   :  { %3055 = vadd.xlane.f32.xlu0 %v3054_v43 }
 0x5d2   :  { %3049 = vadd.xlane.f32.xlu0 %v3048_v54 }
 0x5d7   :  { %3577 = vrot.lane.b32.xlu1 %v8267_v19, %s5881_s26  ;;  %v5819_v19 = vld [vmem:[%s8181_s0 + $0x10] sm:$0xff] }
 0x5e8   :  { %3486 = vrot.lane.b32.xlu0 %v8268_v28, %s5881_s26  ;;  %v7332_v28 = vadd.f32 %v5819_v19, %v6979_v30  ;;  %v5820_v30 = vld [vmem:[%s8181_s0 + $0x20] sm:$0xff]  ;;  %v3814_v19 = vmul.f32 %v7326_v14, %v7326_v14 }
 0x5e9   :  { %v7347_v5 = vadd.f32 %v5820_v30, %v7001_v38  ;;  %v7362_v38 = vpop.permute.xlu1 %3484  ;;  %v5823_v30 = vld [vmem:[%s8181_s0 + $0x28] sm:$0xff] }
 0x5ea   :  { %8270 = vst [vmem:[#allocation20_spill] sm:$0xff] %v7332_v28  ;;  %v3815_v60 = vmul.f32 %v7332_v28, %v7332_v28  ;;  %v3774_v43 = vsel %vm327_vm0, %v7332_v28, 0.0  ;;  %v3831_v51 = vsel %vm327_vm0, %v3814_v19, 0.0 }
 0x5eb   :  { %8271 = vst [vmem:[#allocation21_spill] sm:$0xff] %v7347_v5  ;;  %v3780_v31 = vsel %vm327_vm0, %v7347_v5, 0.0  ;;  %v3817_v41 = vmul.f32 %v7347_v5, %v7347_v5 }
 0x5ec   :  { %v3834_v2 = vsel %vm327_vm0, %v3815_v60, 0.0 }
 0x5ed   :  { %v3840_v54 = vsel %vm327_vm0, %v3817_v41, 0.0 }
 0x5fb   :  { %3772 = vadd.xlane.f32.xlu1 %v3771_v25  ;;  %v7383_v25 = vpop.permute.xlu1 %3575 }
 0x5ff   :  { %3829 = vadd.xlane.f32.xlu1 %v3828_v27  ;;  %v3816_v27 = vmul.f32 %v7372_v40, %v7372_v40 }
 0x601   :  { %v3837_v48 = vsel %vm327_vm0, %v3816_v27, 0.0 }
 0x603   :  { %3835 = vadd.xlane.f32.xlu1 %v3834_v2  ;;  %v7393_v2 = vadd.f32 %v5823_v30, %v7012_v58 }
 0x605   :  { %8274 = vst [vmem:[#allocation28_spill] sm:$0xff] %v7393_v2 }
 0x607   :  { %3781 = vadd.xlane.f32.xlu1 %v3780_v31  ;;  %3769 = vadd.xlane.f32.xlu0 %v3768_v17  ;;  %v3783_v17 = vsel %vm327_vm0, %v7393_v2, 0.0 }
 0x60b   :  { %3787 = vadd.xlane.f32.xlu1 %v3786_v62  ;;  %3775 = vadd.xlane.f32.xlu0 %v3774_v43  ;;  %v3818_v62 = vmul.f32 %v7393_v2, %v7393_v2 }
 0x60d   :  { %v3843_v43 = vsel %vm327_vm0, %v3818_v62, 0.0 }
 0x60f   :  { %3841 = vadd.xlane.f32.xlu1 %v3840_v54  ;;  %3778 = vadd.xlane.f32.xlu0 %v3777_v22 }
 0x613   :  { %3847 = vadd.xlane.f32.xlu1 %v3846_v35  ;;  %v2993_v60 = vpop.xlane.xlu1 %2992  ;;  %3832 = vadd.xlane.f32.xlu0 %v3831_v51 }
 0x617   :  { %v3017_v31 = vpop.xlane.xlu1 %3016  ;;  %3838 = vadd.xlane.f32.xlu0 %v3837_v48 }
 0x61b   :  { %v2987_v41 = vpop.xlane.xlu1 %2986  ;;  %3784 = vadd.xlane.f32.xlu0 %v3783_v17  ;;  %v2996_v44 = vpop.xlane.xlu0 %2995 }
 0x61c   :  { %5693 = vrcp.f32 %v2987_v41 }
 0x61d   :  { %5695 = vrcp.f32 %v2993_v60 }
 0x61e   :  { %5697 = vrcp.f32 %v2996_v44  ;;  %v7407_v44 = vld [vmem:[%s8182_s1] sm:$0xff] }
 0x61f   :  { %v3011_v54 = vpop.xlane.xlu1 %3010  ;;  %3844 = vadd.xlane.f32.xlu0 %v3843_v43  ;;  %v3020_v58 = vpop.xlane.xlu0 %3019 }
 0x623   :  { %v3005_v26 = vpop.xlane.xlu1 %3004  ;;  %v2990_v22 = vpop.xlane.xlu0 %2989 }
 0x624   :  { %5699 = vrcp.f32 %v2990_v22 }
 0x625   :  { %5701 = vrcp.f32 %v3020_v58 }
 0x626   :  { %v5694_v19 = vpop.eup %5693  ;;  %5703 = vrcp.f32 %v3011_v54 }
 0x627   :  { %v3029_v35 = vpop.xlane.xlu1 %3028  ;;  %v3014_v51 = vpop.xlane.xlu0 %3013  ;;  %5705 = vrcp.f32 %v3017_v31  ;;  %v3113_v60 = vmul.f32 %v5694_v19, %v7166_v3  ;;  %v7413_v31 = vld [vmem:[%s8182_s1 + $0x10] sm:$0xff]  ;;  %v7420_v19 = vld [vmem:[%s8182_s1 + $0x18] sm:$0xff] }
 0x628   :  { %v5696_v27 = vpop.eup %5695  ;;  %5707 = vrcp.f32 %v3014_v51 }
 0x629   :  { %v5698_v30 = vpop.eup %5697  ;;  %v3115_v48 = vmul.f32 %v5696_v27, %v7155_v39  ;;  %v3145_v43 = vsub.f32 %v3113_v60, %v7407_v44 }
 0x62a   :  { %v3116_v41 = vmul.f32 %v5698_v30, %v7169_v10  ;;  %v7426_v30 = vld [vmem:[%s8182_s1 + $0x8] sm:$0xff] }
 0x62b   :  { %v2999_v17 = vpop.xlane.xlu1 %2998  ;;  %v3008_v62 = vpop.xlane.xlu0 %3007  ;;  %v3147_v39 = vsub.f32 %v3115_v48, %v7413_v31 }
 0x62c   :  { %5709 = vrcp.f32 %v2999_v17  ;;  %v3148_v51 = vsub.f32 %v3116_v41, %v7420_v19  ;;  %v3177_v17 = vmul.f32 %v3145_v43, %v3145_v43 }
 0x62d   :  { %5711 = vrcp.f32 %v3005_v26 }
 0x62e   :  { %v5700_v54 = vpop.eup %5699  ;;  %5713 = vrcp.f32 %v3008_v62 }
 0x62f   :  { %v3032_v3 = vpop.xlane.xlu0 %3031  ;;  %v5702_v58 = vpop.eup %5701  ;;  %v3114_v10 = vmul.f32 %v5700_v54, %v7180_v49  ;;  %v3179_v49 = vmul.f32 %v3147_v39, %v3147_v39  ;;  %v3283_v54 = vpack.c.bf16 %v3116_v41, %v3115_v48  ;;  %v3209_v48 = vsel %vm1460_vm3, %v3177_v17, 0.0 }
 0x630   :  { %v5704_v22 = vpop.eup %5703  ;;  %v7430_v29 = vmul.f32 %v5702_v58, %v7178_v61  ;;  %v3023_v52 = vpop.xlane.xlu1 %3022  ;;  %5715 = vrcp.f32 %v3032_v3 }
 0x631   :  { %v5706_v27 = vpop.eup %5705  ;;  %v3146_v26 = vsub.f32 %v3114_v10, %v7426_v30  ;;  %v3282_v62 = vpack.c.bf16 %v3114_v10, %v3113_v60  ;;  %v3121_v40 = vmul.f32 %v5704_v22, %v7176_v33  ;;  %v3180_v60 = vmul.f32 %v3148_v51, %v3148_v51 }
 0x632   :  { %v5708_v37 = vpop.eup %5707  ;;  %v7438_v43 = vmul.f32 %v5706_v27, %v7160_v24 }
 0x633   :  { %v3002_v2 = vpop.xlane.xlu0 %3001  ;;  %v3178_v5 = vmul.f32 %v3146_v26, %v3146_v26  ;;  %5328 = vmatprep.mubr.msk.bf16.mxu0 %vm1460_vm3, %v3282_v62  ;;  %v7435_v28 = vmul.f32 %v5708_v37, %v7197_v21  ;;  %v3214_v58 = vsel %vm1460_vm3, %v3180_v60, 0.0 }
 0x634   :  { %5717 = vrcp.f32 %v3002_v2  ;;  %5329 = vmatmul.mubr.msk.bf16.vlgmr.msra.gmra.mrb[80].mxu0 %vm1460_vm3, %v3283_v54  ;;  %v3287_v21 = vpack.c.bf16 %v7430_v29, %v7438_v43 }
 0x635   :  { %5719 = vrcp.f32 %v3023_v52  ;;  %v3210_v41 = vsel %vm1460_vm3, %v3178_v5, 0.0  ;;  %5353 = vmatpush3.bf16.msra.mxu0 %v7270_v16  ;;  %v3286_v33 = vpack.c.bf16 %v7435_v28, %v3121_v40  ;;  %v3212_v52 = vsel %vm1460_vm3, %v3179_v49, 0.0  ;;  %v7455_v16 = vld [vmem:[%s8182_s1 + $0x20] sm:$0xff] }
 0x636   :  { %v5710_v61 = vpop.eup %5709  ;;  %5721 = vrcp.f32 %v3029_v35  ;;  %v3211_v24 = vadd.f32 %v3210_v41, %v3209_v48  ;;  %5354 = vmatprep.subr.bf16.mxu0 %v7338_v32 }
 0x637   :  { %v3026_v37 = vpop.xlane.xlu0 %3025  ;;  %v3117_v2 = vmul.f32 %v5710_v61, %v7199_v15  ;;  %5344 = vmatprep.mubr.msk.bf16.mxu1 %vm1460_vm3, %v3286_v33  ;;  %v5712_v5 = vpop.eup %5711 }
 0x638   :  { %5723 = vrcp.f32 %v3026_v37  ;;  %v3213_v39 = vadd.f32 %v3212_v52, %v3211_v24  ;;  %5345 = vmatmul.mubr.msk.bf16.vlgmr.msra.gmra.mrb[80].mxu1 %vm1460_vm3, %v3287_v21  ;;  %v5714_v3 = vpop.eup %5713  ;;  %v3041_v15 = vpop.xlane.xlu1 %3040  ;;  %v3119_v27 = vmul.f32 %v5712_v5, %v7187_v63  ;;  %v7473_v63 = vld [vmem:[%s8182_s1 + $0x30] sm:$0xff] }
 0x639   :  { %v3149_v35 = vsub.f32 %v3117_v2, %v7455_v16  ;;  %5355 = vmatpush3.bf16.msra.mxu0 %v7338_v32  ;;  %5369 = vmatpush3.bf16.msra.mxu1 %v7259_v6  ;;  %v3120_v17 = vmul.f32 %v5714_v3, %v7206_v4 }
 0x63a   :  { %5356 = vmatprep.subr.bf16.mxu0 %v7362_v38  ;;  %5370 = vmatprep.subr.bf16.mxu1 %v7350_v56  ;;  %v3215_v51 = vadd.f32 %v3214_v58, %v3213_v39  ;;  %v5716_v62 = vpop.eup %5715  ;;  %v3151_v4 = vsub.f32 %v3119_v27, %v7473_v63 }
 0x63b   :  { %v3065_v10 = vpop.xlane.xlu0 %3064  ;;  %v3181_v22 = vmul.f32 %v3149_v35, %v3149_v35  ;;  %v3285_v5 = vpack.c.bf16 %v3120_v17, %v3119_v27 }
 0x63c   :  { %v3183_v3 = vmul.f32 %v3151_v4, %v3151_v4 }
 0x63d   :  { %v3216_v26 = vsel %vm1460_vm3, %v3181_v22, 0.0  ;;  %5357 = vmatpush3.bf16.msra.mxu0 %v7362_v38  ;;  %5371 = vmatpush3.bf16.msra.mxu1 %v7350_v56  ;;  %v3153_v38 = vsub.f32 %v3121_v40, %v7407_v44  ;;  %v7480_v56 = vld [vmem:[%s8182_s1 + $0x38] sm:$0xf]  ;;  %v3128_v40 = vmul.f32 %v5716_v62, %v7215_v42  ;;  %v3154_v42 = vsub.f32 %v7435_v28, %v7426_v30 }
 0x63e   :  { %v3217_v6 = vadd.f32 %v3216_v26, %v3215_v51  ;;  %v5718_v49 = vpop.eup %5717  ;;  %5372 = vmatprep.subr.bf16.mxu1 %v7383_v25  ;;  %v3152_v41 = vsub.f32 %v3120_v17, %v7480_v56  ;;  %v3156_v17 = vsub.f32 %v7430_v29, %v7420_v19 }
 0x63f   :  { %v3059_v32 = vpop.xlane.xlu1 %3058  ;;  %v3035_v54 = vpop.xlane.xlu0 %3034  ;;  %v3118_v61 = vmul.f32 %v5718_v49, %v7223_v36  ;;  %v7487_v36 = vld [vmem:[%s8182_s1 + $0x28] sm:$0xff]  ;;  %v3186_v62 = vmul.f32 %v3154_v42, %v3154_v42 }
 0x640   :  { %v5720_v60 = vpop.eup %5719  ;;  %5725 = vrcp.f32 %v3059_v32  ;;  %v3184_v51 = vmul.f32 %v3152_v41, %v3152_v41  ;;  %v3188_v29 = vmul.f32 %v3156_v17, %v3156_v17 }
 0x641   :  { %v5722_v48 = vpop.eup %5721  ;;  %5373 = vmatpush3.bf16.msra.mxu1 %v7383_v25  ;;  %v3150_v21 = vsub.f32 %v3118_v61, %v7487_v36  ;;  %v3284_v24 = vpack.c.bf16 %v3118_v61, %v3117_v2  ;;  %5727 = vrcp.f32 %v3035_v54  ;;  %v3125_v39 = vmul.f32 %v5720_v60, %v7208_v45 }
 0x642   :  { %v5724_v33 = vpop.eup %5723  ;;  %v3127_v58 = vmul.f32 %v5722_v48, %v7189_v20  ;;  %v3185_v20 = vmul.f32 %v3153_v38, %v3153_v38  ;;  %v3222_v32 = vsel %vm1482_vm4, %v3184_v51, 0.0 }
 0x643   :  { %v3044_v52 = vpop.xlane.xlu0 %3043  ;;  %v3126_v35 = vmul.f32 %v5724_v33, %v7233_v53  ;;  %v3182_v25 = vmul.f32 %v3150_v21, %v3150_v21  ;;  %5332 = vmatprep.mubr.msk.bf16.mxu0 %vm1460_vm3, %v3284_v24  ;;  %v3155_v53 = vsub.f32 %v7438_v43, %v7413_v31  ;;  %v3157_v61 = vsub.f32 %v3125_v39, %v7455_v16 }
 0x644   :  { %v3062_v37 = vpop.xlane.xlu1 %3061  ;;  %5333 = vmatmul.mubr.msk.bf16.gmra.mrb[84].mxu0 %vm1460_vm3, %v3285_v5  ;;  %v3289_v45 = vpack.c.bf16 %v3128_v40, %v3127_v58  ;;  %v3224_v60 = vsel %vm1460_vm3, %v3185_v20, 0.0  ;;  %v3159_v4 = vsub.f32 %v3127_v58, %v7473_v63  ;;  %v3226_v33 = vsel %vm1460_vm3, %v3186_v62, 0.0 }
 0x645   :  { %5729 = vrcp.f32 %v3062_v37  ;;  %v3288_v2 = vpack.c.bf16 %v3126_v35, %v3125_v39  ;;  %v3218_v22 = vsel %vm1460_vm3, %v3182_v25, 0.0  ;;  %v3158_v21 = vsub.f32 %v3126_v35, %v7487_v36 }
 0x646   :  { %5731 = vrcp.f32 %v3041_v15  ;;  %v3219_v27 = vadd.f32 %v3218_v22, %v3217_v6  ;;  %v3220_v15 = vsel %vm1460_vm3, %v3183_v3, 0.0  ;;  %v3189_v58 = vmul.f32 %v3157_v61, %v3157_v61 }
 0x647   :  { %5733 = vrcp.f32 %v3065_v10  ;;  %5348 = vmatprep.mubr.msk.bf16.mxu1 %vm1460_vm3, %v3288_v2  ;;  %v3068_v26 = vpop.xlane.xlu0 %3067  ;;  %v3187_v10 = vmul.f32 %v3155_v53, %v3155_v53  ;;  %v3191_v2 = vmul.f32 %v3159_v4, %v3159_v4  ;;  %v3160_v35 = vsub.f32 %v3128_v40, %v7480_v56 }
 0x648   :  { %5735 = vrcp.f32 %v3068_v26  ;;  %5349 = vmatmul.mubr.msk.bf16.gmra.mrb[84].mxu1 %vm1460_vm3, %v3289_v45  ;;  %v3221_v28 = vadd.f32 %v3220_v15, %v3219_v27  ;;  %v3190_v27 = vmul.f32 %v3158_v21, %v3158_v21 }
 0x649   :  { %5737 = vrcp.f32 %v3044_v52  ;;  %v3228_v3 = vsel %vm1460_vm3, %v3187_v10, 0.0  ;;  %v3236_v40 = vsel %vm1460_vm3, %v3191_v2, 0.0  ;;  %v3192_v10 = vmul.f32 %v3160_v35, %v3160_v35 }
 0x64a   :  { %v3223_v6 = vadd.f32 %v3222_v32, %v3221_v28  ;;  %v5726_v54 = vpop.eup %5725 }
 0x64b   :  { %v3047_v43 = vpop.xlane.xlu1 %3046  ;;  %v3038_v49 = vpop.xlane.xlu0 %3037  ;;  %v7513_v25 = vmul.f32 %v5726_v54, %v7247_v1  ;;  %v3230_v1 = vsel %vm1460_vm3, %v3188_v29, 0.0  ;;  %v3234_v54 = vsel %vm1460_vm3, %v3190_v27, 0.0 }
 0x64c   :  { %5739 = vrcp.f32 %v3047_v43  ;;  %v5728_v48 = vpop.eup %5727  ;;  %v3225_v38 = vadd.f32 %v3224_v60, %v3223_v6 }
 0x64d   :  { %5741 = vrcp.f32 %v3038_v49  ;;  %v3129_v42 = vmul.f32 %v5728_v48, %v7245_v55  ;;  %v3232_v55 = vsel %vm1460_vm3, %v3189_v58, 0.0 }
 0x64e   :  { %v3227_v52 = vadd.f32 %v3226_v33, %v3225_v38 }
 0x64f   :  { %v5730_v41 = vpop.eup %5729  ;;  %v3080_v24 = vpop.xlane.xlu1 %3079  ;;  %v3161_v17 = vsub.f32 %v3129_v42, %v7407_v44 }
 0x650   :  { %v5732_v37 = vpop.eup %5731  ;;  %v3053_v5 = vpop.xlane.xlu0 %3052  ;;  %v7516_v39 = vmul.f32 %v5730_v41, %v7256_v18  ;;  %v3229_v51 = vadd.f32 %v3228_v3, %v3227_v52 }
 0x651   :  { %v5734_v22 = vpop.eup %5733  ;;  %v7526_v28 = vmul.f32 %v5732_v37, %v7225_v9 }
 0x652   :  { %v3294_v45 = vpack.c.bf16 %v7516_v39, %v7513_v25  ;;  %v5736_v53 = vpop.eup %5735  ;;  %v3231_v20 = vadd.f32 %v3230_v1, %v3229_v51  ;;  %v7535_v49 = vmul.f32 %v5734_v22, %v7238_v7 }
 0x653   :  { %v3074_v26 = vpop.xlane.xlu1 %3073  ;;  %v5738_v18 = vpop.eup %5737  ;;  %v7532_v43 = vmul.f32 %v5736_v53, %v7267_v23  ;;  %v3163_v7 = vsub.f32 %v7526_v28, %v7413_v31 }
 0x654   :  { %5376 = vmatprep.mubr.msk.bf16.mxu1 %vm1460_vm3, %v3294_v45  ;;  %v3077_v15 = vpop.xlane.xlu0 %3076  ;;  %v3233_v32 = vadd.f32 %v3232_v55, %v3231_v20  ;;  %v7538_v9 = vmul.f32 %v5738_v18, %v7254_v50  ;;  %v3193_v50 = vmul.f32 %v3161_v17, %v3161_v17 }
 0x655   :  { %5743 = vrcp.f32 %v3077_v15  ;;  %v3295_v41 = vpack.c.bf16 %v7532_v43, %v7535_v49 }
 0x656   :  { %v5740_v62 = vpop.eup %5739  ;;  %5745 = vrcp.f32 %v3074_v26  ;;  %v3235_v61 = vadd.f32 %v3234_v54, %v3233_v32  ;;  %v3240_v58 = vsel %vm1460_vm3, %v3193_v50, 0.0 }
 0x657   :  { %v5742_v6 = vpop.eup %5741  ;;  %v3578_v60 = vpop.permute.xlu1 %3577  ;;  %5747 = vrcp.f32 %v3080_v24  ;;  %v7547_v38 = vmul.f32 %v5740_v62, %v7277_v13  ;;  %v3164_v24 = vsub.f32 %v7538_v9, %v7420_v19  ;;  %v3195_v13 = vmul.f32 %v3163_v7, %v3163_v7 }
 0x658   :  { %v3595_v4 = vsel %vm1990_vm2, %v3578_v60, 0  ;;  %v3071_v48 = vpop.xlane.xlu0 %3070  ;;  %5467 = vmatprep.subr.msk.bf16.mxu1 %vm1990_vm2, %v3578_v60  ;;  %v3130_v23 = vmul.f32 %v5742_v6, %v7275_v34  ;;  %v3237_v29 = vadd.f32 %v3236_v40, %v3235_v61  ;;  %v3238_v34 = vsel %vm1482_vm4, %v3192_v10, 0.0  ;;  %v5495_v40 = vld [vmem:[#allocation2] sm:$0xff]  }
 0x659   :  { %5749 = vrcp.f32 %v3071_v48  ;;  %5375 = vmatpush3.bf16.msra.mxu1 %v3595_v4  ;;  %v3165_v2 = vsub.f32 %v7547_v38, %v7455_v16  ;;  %v3196_v51 = vmul.f32 %v3164_v24, %v3164_v24  ;;  %v3244_v1 = vsel %vm1460_vm3, %v3195_v13, 0.0 }
 0x65a   :  { %v3162_v33 = vsub.f32 %v3130_v23, %v7426_v30  ;;  %v3290_v21 = vpack.c.bf16 %v3130_v23, %v3129_v42  ;;  %5751 = vrcp.f32 %v3053_v5  ;;  %v3239_v37 = vadd.f32 %v3238_v34, %v3237_v29 }
 0x65b   :  { %v3197_v27 = vmul.f32 %v3165_v2, %v3165_v2  ;;  %v3246_v15 = vsel %vm1460_vm3, %v3196_v51, 0.0  ;;  %v3291_v23 = vpack.c.bf16 %v7538_v9, %v7526_v28 }
 0x65c   :  { %v3194_v52 = vmul.f32 %v3162_v33, %v3162_v33  ;;  %5360 = vmatprep.mubr.msk.bf16.mxu0 %vm1460_vm3, %v3290_v21  ;;  %v3056_v3 = vpop.xlane.xlu0 %3055  ;;  %5377 = vmatmul.mubr.msk.bf16.vlgmr.msra.gmra.mrb[88].mxu1 %vm1460_vm3, %v3295_v41  ;;  %v3241_v42 = vadd.f32 %v3240_v58, %v3239_v37  ;;  %v3169_v21 = vsub.f32 %v7513_v25, %v7407_v44 }
 0x65d   :  { %5753 = vrcp.f32 %v3056_v3  ;;  %v3248_v61 = vsel %vm1460_vm3, %v3197_v27, 0.0  ;;  %v3172_v25 = vsub.f32 %v7532_v43, %v7420_v19 }
 0x65e   :  { %v3242_v22 = vsel %vm1460_vm3, %v3194_v52, 0.0  ;;  %v3171_v52 = vsub.f32 %v7535_v49, %v7413_v31  ;;  %v3201_v3 = vmul.f32 %v3169_v21, %v3169_v21 }
 0x65f   :  { %v5744_v35 = vpop.eup %5743  ;;  %v3243_v5 = vadd.f32 %v3242_v22, %v3241_v42 }
 0x660   :  { %v3050_v45 = vpop.xlane.xlu0 %3049  ;;  %v5746_v53 = vpop.eup %5745  ;;  %v3143_v55 = vmul.f32 %v5744_v35, %v7292_v0  ;;  %v3203_v22 = vmul.f32 %v3171_v52, %v3171_v52  ;;  %v3204_v35 = vmul.f32 %v3172_v25, %v3172_v25 }
 0x661   :  { %5755 = vrcp.f32 %v3050_v45  ;;  %v5748_v26 = vpop.eup %5747  ;;  %v3245_v18 = vadd.f32 %v3244_v1, %v3243_v5  ;;  %v3142_v32 = vmul.f32 %v5746_v53, %v7294_v47  ;;  %v5496_v47 = vld [vmem:[#allocation2 + $0x8] sm:$0xff]  }
 0x662   :  { %v3144_v60 = vmul.f32 %v5748_v26, %v7282_v57  ;;  %v3175_v53 = vsub.f32 %v3143_v55, %v7473_v63  ;;  %v3260_v19 = vsel %vm1460_vm3, %v3203_v22, 0.0  ;;  %v3262_v26 = vsel %vm1460_vm3, %v3204_v35, 0.0 }
 0x663   :  { %v5750_v20 = vpop.eup %5749  ;;  %v3247_v10 = vadd.f32 %v3246_v15, %v3245_v18  ;;  %v3174_v49 = vsub.f32 %v3142_v32, %v7487_v36 }
 0x664   :  { %v3487_v17 = vpop.permute.xlu0 %3486  ;;  %v3141_v62 = vmul.f32 %v5750_v20, %v7300_v46  ;;  %v5752_v6 = vpop.eup %5751  ;;  %v3297_v46 = vpack.c.bf16 %v3144_v60, %v3143_v55  ;;  %v3176_v1 = vsub.f32 %v3144_v60, %v7480_v56 }
 0x665   :  { %v3504_v54 = vsel %vm1990_vm2, %v3487_v17, 0  ;;  %5466 = vmatprep.subr.msk.bf16.mxu0 %vm1990_vm2, %v3487_v17  ;;  %v3249_v48 = vadd.f32 %v3248_v61, %v3247_v10  ;;  %v3135_v7 = vmul.f32 %v5752_v6, %v7286_v8  ;;  %v3206_v27 = vmul.f32 %v3174_v49, %v3174_v49 }
 0x666   :  { %5359 = vmatpush3.bf16.msra.mxu0 %v3504_v54  ;;  %v3296_v4 = vpack.c.bf16 %v3142_v32, %v3141_v62 }
 0x667   :  { %v5754_v0 = vpop.eup %5753  ;;  %5384 = vmatprep.subr.bf16.mxu0 %v5495_v40  ;;  %v3167_v28 = vsub.f32 %v3135_v7, %v7473_v63 }
 0x668   :  { %5380 = vmatprep.mubr.msk.bf16.mxu1 %vm1460_vm3, %v3296_v4  ;;  %v3136_v57 = vmul.f32 %v5754_v0, %v7304_v11 }
 0x669   :  { %5361 = vmatmul.mubr.msk.bf16.vlgmr.msra.gmra.mrb[88].mxu0 %vm1460_vm3, %v3291_v23  ;;  %5381 = vmatmul.mubr.msk.bf16.gmra.mrb[92].mxu1 %vm1460_vm3, %v3297_v46  ;;  %v3199_v11 = vmul.f32 %v3167_v28, %v3167_v28 }
 0x66a   :  { %5385 = vmatpush3.bf16.msra.mxu0 %v5495_v40  ;;  %v3168_v33 = vsub.f32 %v3136_v57, %v7480_v56  ;;  %v3293_v8 = vpack.c.bf16 %v3136_v57, %v3135_v7  ;;  %v3208_v40 = vmul.f32 %v3176_v1, %v3176_v1 }
 0x66b   :  { %v5756_v50 = vpop.eup %5755  ;;  %5386 = vmatprep.subr.bf16.mxu0 %v5496_v47  ;;  %v3252_v13 = vsel %vm1460_vm3, %v3199_v11, 0.0 }
 0x66c   :  { %v3134_v41 = vmul.f32 %v5756_v50, %v7308_v59  ;;  %v3170_v59 = vsub.f32 %v7516_v39, %v7426_v30  ;;  %v3200_v37 = vmul.f32 %v3168_v33, %v3168_v33  ;;  %v3256_v30 = vsel %vm1460_vm3, %v3201_v3, 0.0 }
 0x66d   :  { %v3173_v39 = vsub.f32 %v3141_v62, %v7455_v16  ;;  %v3207_v16 = vmul.f32 %v3175_v53, %v3175_v53  ;;  %v3270_v55 = vsel %vm1482_vm4, %v3208_v40, 0.0 }
 0x66e   :  { %v3166_v9 = vsub.f32 %v3134_v41, %v7487_v36  ;;  %v3292_v29 = vpack.c.bf16 %v3134_v41, %v7547_v38  ;;  %5387 = vmatpush3.bf16.msra.mxu0 %v5496_v47  ;;  %v3202_v58 = vmul.f32 %v3170_v59, %v3170_v59  ;;  %v3254_v2 = vsel %vm1482_vm4, %v3200_v37, 0.0 }
 0x66f   :  { %v3205_v45 = vmul.f32 %v3173_v39, %v3173_v39  ;;  %v3266_v36 = vsel %vm1460_vm3, %v3206_v27, 0.0  ;;  %v3268_v62 = vsel %vm1460_vm3, %v3207_v16, 0.0 }
 0x670   :  { %v3198_v24 = vmul.f32 %v3166_v9, %v3166_v9  ;;  %5364 = vmatprep.mubr.msk.bf16.mxu0 %vm1460_vm3, %v3292_v29  ;;  %v3258_v31 = vsel %vm1460_vm3, %v3202_v58, 0.0 }
 0x671   :  { %5365 = vmatmul.mubr.msk.bf16.gmra.mrb[92].mxu0 %vm1460_vm3, %v3293_v8  ;;  %v3264_v20 = vsel %vm1460_vm3, %v3205_v45, 0.0 }
 0x672   :  { %v3250_v34 = vsel %vm1460_vm3, %v3198_v24, 0.0 }
 0x673   :  { %v3251_v38 = vadd.f32 %v3250_v34, %v3249_v48 }
 0x675   :  { %v3253_v44 = vadd.f32 %v3252_v13, %v3251_v38 }
 0x677   :  { %v3255_v42 = vadd.f32 %v3254_v2, %v3253_v44 }
 0x679   :  { %v3257_v51 = vadd.f32 %v3256_v30, %v3255_v42 }
 0x67b   :  { %v3259_v5 = vadd.f32 %v3258_v31, %v3257_v51 }
 0x67d   :  { %v3261_v43 = vadd.f32 %v3260_v19, %v3259_v5 }
 0x67f   :  { %v3263_v18 = vadd.f32 %v3262_v26, %v3261_v43 }
 0x681   :  { %v3265_v15 = vadd.f32 %v3264_v20, %v3263_v18  ;;  %v7619_v18 = vld [vmem:[%s8184_s3] ss:$0 sm:$0xff] }
 0x683   :  { %v3267_v17 = vadd.f32 %v3266_v36, %v3265_v15  ;;  %v8275_v15 = vld [vmem:[#allocation20_spill] sm:$0xff] }
 0x685   :  { %v3269_v63 = vadd.f32 %v3268_v62, %v3267_v17 }
 0x687   :  { %v7607_v32 = vadd.f32 %v3270_v55, %v3269_v63  ;;  %v7627_v55 = vld [vmem:[%s8185_s4] ss:$0 sm:$0xff] }
 0x688   :  { %v3773_v56 = vpop.xlane.xlu1 %3772 }
 0x689   :  { %v3874_v9 = vmul.f32 0.03125, %v3773_v56  ;;  %v8276_v56 = vld [vmem:[#allocation22_spill] sm:$0xff] }
 0x68b   :  { %v3904_v59 = vmul.f32 %v3874_v9, %v3874_v9  ;;  %v3949_v20 = vsub.f32 %v7326_v14, %v3874_v9 }
 0x68c   :  { %v3830_v10 = vpop.xlane.xlu1 %3829 }
 0x68d   :  { %v3888_v4 = vmul.f32 0.03125, %v3830_v10 }
 0x690   :  { %v3836_v6 = vpop.xlane.xlu1 %3835 }
 0x691   :  { %v3890_v7 = vmul.f32 0.03125, %v3836_v6 }
 0x694   :  { %v3782_v54 = vpop.xlane.xlu1 %3781  ;;  %v3770_v60 = vpop.xlane.xlu0 %3769 }
 0x695   :  { %v3873_v61 = vmul.f32 0.03125, %v3770_v60  ;;  %v7611_v29 = vmul.f32 0.03125, %v3782_v54 }
 0x697   :  { %v3903_v48 = vmul.f32 %v3873_v61, %v3873_v61  ;;  %v3907_v34 = vmul.f32 %v7611_v29, %v7611_v29  ;;  %v3948_v43 = vsub.f32 %v7320_v12, %v3873_v61 }
 0x698   :  { %v7609_v0 = vpop.xlane.xlu1 %3787  ;;  %v3776_v23 = vpop.xlane.xlu0 %3775 }
 0x699   :  { %v3918_v46 = vsub.f32 %v3888_v4, %v3903_v48  ;;  %v3875_v47 = vmul.f32 0.03125, %v3776_v23  ;;  %v8277_v23 = vld [vmem:[#allocation21_spill] sm:$0xff] }
 0x69b   :  { %v3933_v57 = vmax.f32 %v3918_v46, 0.0  ;;  %v3905_v50 = vmul.f32 %v3875_v47, %v3875_v47  ;;  %v3950_v40 = vsub.f32 %v8275_v15, %v3875_v47  ;;  %v3952_v46 = vsub.f32 %v8277_v23, %v7611_v29 }
 0x69c   :  { %v3842_v41 = vpop.xlane.xlu1 %3841  ;;  %v3779_v28 = vpop.xlane.xlu0 %3778 }
 0x69d   :  { %v3920_v33 = vsub.f32 %v3890_v7, %v3905_v50  ;;  %v3963_v8 = vadd.f32 1e-05, %v3933_v57  ;;  %v3892_v24 = vmul.f32 0.03125, %v3842_v41  ;;  %v3876_v37 = vmul.f32 0.03125, %v3779_v28  ;;  %v8278_v28 = vld [vmem:[#allocation28_spill] sm:$0xff] }
 0x69f   :  { %v3935_v21 = vmax.f32 %v3920_v33, 0.0  ;;  %5757 = vrsqrt.f32 %v3963_v8  ;;  %v3922_v3 = vsub.f32 %v3892_v24, %v3907_v34  ;;  %v3906_v25 = vmul.f32 %v3876_v37, %v3876_v37 }
 0x6a0   :  { %v3833_v11 = vpop.xlane.xlu0 %3832  ;;  %v3951_v10 = vsub.f32 %v8276_v56, %v3876_v37  ;;  %v5497_v37 = vld [vmem:[%s8187_s6] sm:$0xff]  }
 0x6a1   :  { %v3889_v38 = vmul.f32 0.03125, %v3833_v11  ;;  %v3965_v52 = vadd.f32 1e-05, %v3935_v21  ;;  %v3937_v42 = vmax.f32 %v3922_v3, 0.0  ;;  %5404 = vmatprep.subr.bf16.mxu1 %v5497_v37 }
 0x6a2   :  { %5405 = vmatpush3.bf16.msra.mxu1 %v5497_v37 }
 0x6a3   :  { %v3919_v13 = vsub.f32 %v3889_v38, %v3904_v59  ;;  %5759 = vrsqrt.f32 %v3965_v52  ;;  %v3967_v31 = vadd.f32 1e-05, %v3937_v42  ;;  %v5498_v38 = vld [vmem:[%s8187_s6 + $0x8] sm:$0xff]  }
 0x6a4   :  { %v3839_v44 = vpop.xlane.xlu0 %3838  ;;  %5406 = vmatprep.subr.bf16.mxu1 %v5498_v38 }
 0x6a5   :  { %v3934_v58 = vmax.f32 %v3919_v13, 0.0  ;;  %v3891_v2 = vmul.f32 0.03125, %v3839_v44 }
 0x6a6   :  { %5407 = vmatpush3.bf16.msra.mxu1 %v5498_v38 }
 0x6a7   :  { %v3964_v22 = vadd.f32 1e-05, %v3934_v58  ;;  %v3921_v30 = vsub.f32 %v3891_v2, %v3906_v25 }
 0x6a8   :  { %v3785_v39 = vpop.xlane.xlu0 %3784 }
 0x6a9   :  { %5761 = vrsqrt.f32 %v3964_v22  ;;  %v3936_v51 = vmax.f32 %v3921_v30, 0.0  ;;  %v3878_v35 = vmul.f32 0.03125, %v3785_v39  ;;  %v5758_v45 = vpop.eup %5757 }
 0x6aa   :  { %v3993_v27 = vmul.f32 %v5758_v45, %v3948_v43 }
 0x6ab   :  { %v3966_v49 = vadd.f32 1e-05, %v3936_v51  ;;  %v3908_v53 = vmul.f32 %v3878_v35, %v3878_v35  ;;  %v3953_v9 = vsub.f32 %v8278_v28, %v3878_v35 }
 0x6ac   :  { %v3845_v5 = vpop.xlane.xlu0 %3844  ;;  %v4014_v62 = vmul.f32 %v7619_v18, %v3993_v27 }
 0x6ad   :  { %5763 = vrsqrt.f32 %v3966_v49  ;;  %v3893_v19 = vmul.f32 0.03125, %v3845_v5  ;;  %v5760_v26 = vpop.eup %5759 }
 0x6ae   :  { %5765 = vrsqrt.f32 %v3967_v31  ;;  %v3995_v63 = vmul.f32 %v5760_v26, %v3950_v40  ;;  %v7632_v14 = vadd.f32 %v7627_v55, %v4014_v62 }
 0x6af   :  { %v3923_v1 = vsub.f32 %v3893_v19, %v3908_v53 }
 0x6b0   :  { %v4016_v60 = vmul.f32 %v7619_v18, %v3995_v63 }
 0x6b1   :  { %v3938_v16 = vmax.f32 %v3923_v1, 0.0  ;;  %v5499_v1 = vld [vmem:[%s8187_s6 + $0x10] sm:$0xff]  }
 0x6b2   :  { %v7644_v57 = vadd.f32 %v7627_v55, %v4016_v60  ;;  %5408 = vmatprep.subr.bf16.mxu1 %v5499_v1 }
 0x6b3   :  { %v5762_v36 = vpop.eup %5761  ;;  %v3968_v17 = vadd.f32 1e-05, %v3938_v16  ;;  %5409 = vmatpush3.bf16.msra.mxu1 %v5499_v1  ;;  %v5500_v16 = vld [vmem:[%s8187_s6 + $0x18] sm:$0xff]  }
 0x6b4   :  { %v3994_v12 = vmul.f32 %v5762_v36, %v3949_v20  ;;  %5410 = vmatprep.subr.bf16.mxu1 %v5500_v16 }
 0x6b5   :  { %5767 = vrsqrt.f32 %v3968_v17 }
 0x6b6   :  { %v4015_v6 = vmul.f32 %v7619_v18, %v3994_v12 }
 0x6b7   :  { %v5764_v54 = vpop.eup %5763  ;;  %5411 = vmatpush3.bf16.msra.mxu1 %v5500_v16 }
 0x6b8   :  { %v3996_v61 = vmul.f32 %v5764_v54, %v3951_v10  ;;  %v7636_v4 = vadd.f32 %v7627_v55, %v4015_v6  ;;  %v5766_v48 = vpop.eup %5765 }
 0x6b9   :  { %v3997_v41 = vmul.f32 %v5766_v48, %v3952_v46 }
 0x6ba   :  { %v4017_v47 = vmul.f32 %v7619_v18, %v3996_v61  ;;  %v4050_v7 = vpack.c.bf16 %v7636_v4, %v7632_v14 }
 0x6bb   :  { %v4018_v21 = vmul.f32 %v7619_v18, %v3997_v41 }
 0x6bc   :  { %v7647_v50 = vadd.f32 %v7627_v55, %v4017_v47  ;;  %5388 = vmatprep.mubr.msk.bf16.mxu0 %vm327_vm0, %v4050_v7 }
 0x6bd   :  { %v7657_v11 = vadd.f32 %v7627_v55, %v4018_v21 }
 0x6be   :  { %v4051_v33 = vpack.c.bf16 %v7647_v50, %v7644_v57 }
 0x6bf   :  { %v5768_v29 = vpop.eup %5767 }
 0x6c0   :  { %5389 = vmatmul.mubr.msk.bf16.vlgmr.msra.gmra.mrb[96].mxu0 %vm327_vm0, %v4051_v33  ;;  %v3998_v8 = vmul.f32 %v5768_v29, %v3953_v9 }
 0x6c2   :  { %v4019_v24 = vmul.f32 %v7619_v18, %v3998_v8 }
 0x6c4   :  { %v7660_v59 = vadd.f32 %v7627_v55, %v4019_v24 }
 0x6c6   :  { %v4052_v34 = vpack.c.bf16 %v7660_v59, %v7657_v11 }
 0x6c8   :  { %5392 = vmatprep.mubr.msk.bf16.mxu0 %vm327_vm0, %v4052_v34 }
 0x707   :  { %v5330_v52 = vpop.f32.mrb[80].mxu0 }
 0x708   :  { %v3358_v3 = vpop.f32.mrb[81].mxu0  ;;  %v3676_v58 = vsel %vm327_vm0, %v5330_v52, 0.0 }
 0x709   :  { %v5331_v13 = vpop.f32.mrb[82].mxu0  ;;  %v3662_v22 = vsel %vm327_vm0, %v3358_v3, 0.0 }
 0x70a   :  { %v3361_v44 = vpop.f32.mrb[83].mxu0  ;;  %v3683_v35 = vsel %vm327_vm0, %v5331_v13, 0.0 }
 0x70b   :  { %v5346_v25 = vpop.f32.mrb[80].mxu1  ;;  %v3669_v45 = vsel %vm327_vm0, %v3361_v44, 0.0 }
 0x70c   :  { %v3677_v2 = vsel %vm327_vm0, %v5346_v25, 0.0  ;;  %v3449_v42 = vpop.f32.mrb[81].mxu1 }
 0x70d   :  { %v3678_v30 = vadd.f32 %v3677_v2, %v3676_v58  ;;  %v3663_v39 = vsel %vm327_vm0, %v3449_v42, 0.0  ;;  %v5347_v51 = vpop.f32.mrb[82].mxu1 }
 0x70e   :  { %v3664_v31 = vadd.f32 %v3663_v39, %v3662_v22  ;;  %v3684_v49 = vsel %vm327_vm0, %v5347_v51, 0.0  ;;  %v3452_v5 = vpop.f32.mrb[83].mxu1 }
 0x70f   :  { %v3685_v53 = vadd.f32 %v3684_v49, %v3683_v35  ;;  %v3670_v19 = vsel %vm327_vm0, %v3452_v5, 0.0 }
 0x710   :  { %v3671_v43 = vadd.f32 %v3670_v19, %v3669_v45 }
 0x717   :  { %v5334_v27 = vpop.f32.mrb[84].mxu0 }
 0x718   :  { %v3374_v26 = vpop.f32.mrb[85].mxu0  ;;  %v3704_v36 = vsel %vm327_vm0, %v5334_v27, 0.0 }
 0x719   :  { %v5335_v20 = vpop.f32.mrb[86].mxu0  ;;  %v3690_v63 = vsel %vm327_vm0, %v3374_v26, 0.0 }
 0x71a   :  { %v3377_v15 = vpop.f32.mrb[87].mxu0  ;;  %v3711_v6 = vsel %vm2381_vm5, %v5335_v20, 0.0 }
 0x71b   :  { %v5350_v40 = vpop.f32.mrb[84].mxu1  ;;  %v3697_v48 = vsel %vm327_vm0, %v3377_v15, 0.0 }
 0x71c   :  { %v3705_v17 = vsel %vm327_vm0, %v5350_v40, 0.0  ;;  %v3465_v62 = vpop.f32.mrb[85].mxu1 }
 0x71d   :  { %v3706_v12 = vadd.f32 %v3705_v17, %v3704_v36  ;;  %v3691_v56 = vsel %vm327_vm0, %v3465_v62, 0.0  ;;  %v5351_v10 = vpop.f32.mrb[86].mxu1 }
 0x71e   :  { %v3692_v54 = vadd.f32 %v3691_v56, %v3690_v63  ;;  %v3712_v60 = vsel %vm2381_vm5, %v5351_v10, 0.0  ;;  %v3468_v61 = vpop.f32.mrb[87].mxu1  ;;  %v5832_v56 = vld [vmem:[%s8181_s0 + $0x38] sm:$0xff] }
 0x71f   :  { %v3713_v23 = vadd.f32 %v3712_v60, %v3711_v6  ;;  %v3698_v46 = vsel %vm327_vm0, %v3468_v61, 0.0 }
 0x720   :  { %v3699_v47 = vadd.f32 %v3698_v46, %v3697_v48  ;;  %v5833_v46 = vld [vmem:[%s8181_s0 + $0x50] sm:$0xff] }
 0x72f   :  { %v5378_v7 = vpop.f32.mrb[88].mxu1 }
 0x730   :  { %v3631_v41 = vpop.f32.mrb[89].mxu1  ;;  %v3681_v3 = vsel %vm327_vm0, %v5378_v7, 0.0 }
 0x731   :  { %v5379_v28 = vpop.f32.mrb[90].mxu1  ;;  %v3667_v2 = vsel %vm327_vm0, %v3631_v41, 0.0 }
 0x732   :  { %v3634_v9 = vpop.f32.mrb[91].mxu1  ;;  %v3688_v51 = vsel %vm327_vm0, %v5379_v28, 0.0 }
 0x733   :  { %v3674_v49 = vsel %vm327_vm0, %v3634_v9, 0.0 }
 0x73c   :  { %v5362_v33 = vpop.f32.mrb[88].mxu0  ;;  %v5382_v29 = vpop.f32.mrb[92].mxu1 }
 0x73d   :  { %v3679_v8 = vsel %vm327_vm0, %v5362_v33, 0.0  ;;  %v3540_v21 = vpop.f32.mrb[89].mxu0  ;;  %v3647_v24 = vpop.f32.mrb[93].mxu1  ;;  %v3709_v1 = vsel %vm327_vm0, %v5382_v29, 0.0 }
 0x73e   :  { %v3680_v34 = vadd.f32 %v3679_v8, %v3678_v30  ;;  %v3665_v37 = vsel %vm327_vm0, %v3540_v21, 0.0  ;;  %v5363_v38 = vpop.f32.mrb[90].mxu0  ;;  %v5383_v52 = vpop.f32.mrb[94].mxu1  ;;  %v3695_v27 = vsel %vm327_vm0, %v3647_v24, 0.0 }
 0x73f   :  { %v3666_v13 = vadd.f32 %v3665_v37, %v3664_v31  ;;  %v3686_v44 = vsel %vm327_vm0, %v5363_v38, 0.0  ;;  %v3543_v25 = vpop.f32.mrb[91].mxu0  ;;  %v3650_v58 = vpop.f32.mrb[95].mxu1 }
 0x740   :  { %v3682_v42 = vadd.f32 %v3681_v3, %v3680_v34  ;;  %v3687_v22 = vadd.f32 %v3686_v44, %v3685_v53  ;;  %v3672_v39 = vsel %vm327_vm0, %v3543_v25, 0.0  ;;  %v3716_v53 = vsel %vm2381_vm5, %v5383_v52, 0.0  ;;  %v5835_v25 = vld [vmem:[%s8181_s0 + $0x48] sm:$0xff] }
 0x741   :  { %v3668_v30 = vadd.f32 %v3667_v2, %v3666_v13  ;;  %v3673_v35 = vadd.f32 %v3672_v39, %v3671_v43  ;;  %v8279_v43 = vld [vmem:[#allocation23_spill] sm:$0xff]  ;;  %v3702_v24 = vsel %vm327_vm0, %v3650_v58, 0.0 }
 0x742   :  { %v3689_v5 = vadd.f32 %v3688_v51, %v3687_v22  ;;  %v3730_v19 = vrot.slane %v3682_v42, 4 }
 0x743   :  { %v3727_v45 = vrot.slane %v3668_v30, 4  ;;  %v3675_v31 = vadd.f32 %v3674_v49, %v3673_v35 }
 0x744   :  { %v3732_v26 = vrot.slane %v3689_v5, 4  ;;  %v5366_v16 = vpop.f32.mrb[92].mxu0 }
 0x745   :  { %v3728_v20 = vrot.slane %v3675_v31, 4  ;;  %v3707_v15 = vsel %vm327_vm0, %v5366_v16, 0.0  ;;  %v3556_v40 = vpop.f32.mrb[93].mxu0  ;;  %v3750_v36 = vsel %vm3726_vm6, %v8279_v43, %v3727_v45  ;;  %v5837_v16 = vld [vmem:[%s8181_s0 + $0x70] sm:$0xff]  ;;  %v5838_v43 = vld [vmem:[%s8181_s0 + $0x60] sm:$0xff] }
 0x746   :  { %v3708_v17 = vadd.f32 %v3707_v15, %v3706_v12  ;;  %v3693_v62 = vsel %vm327_vm0, %v3556_v40, 0.0  ;;  %v5367_v63 = vpop.f32.mrb[94].mxu0  ;;  %v7711_v10 = vadd.f32 %v5832_v56, %v3750_v36  ;;  %v3733_v6 = vsel %vm3726_vm6, %v3730_v19, %v3732_v26 }
 0x747   :  { %v3694_v60 = vadd.f32 %v3693_v62, %v3692_v54  ;;  %v3714_v61 = vsel %vm2381_vm5, %v5367_v63, 0.0  ;;  %v3559_v48 = vpop.f32.mrb[95].mxu0  ;;  %v7718_v12 = vadd.f32 %v5833_v46, %v3733_v6  ;;  %v3729_v7 = vsel %vm3726_vm6, %v3727_v45, %v3728_v20 }
 0x748   :  { %v3710_v41 = vadd.f32 %v3709_v1, %v3708_v17  ;;  %v3715_v28 = vadd.f32 %v3714_v61, %v3713_v23  ;;  %v3700_v9 = vsel %vm327_vm0, %v3559_v48, 0.0  ;;  %v3789_v33 = vsel %vm327_vm0, %v7711_v10, 0.0  ;;  %v5834_v23 = vld [vmem:[%s8181_s0 + $0x40] sm:$0xff]  ;;  %v5836_v1 = vld [vmem:[%s8181_s0 + $0x58] sm:$0xff]  ;;  %v5839_v17 = vld [vmem:[%s8181_s0 + $0x68] sm:$0xff] }
 0x749   :  { %v3696_v29 = vadd.f32 %v3695_v27, %v3694_v60  ;;  %v3701_v54 = vadd.f32 %v3700_v9, %v3699_v47  ;;  %3790 = vadd.xlane.f32.xlu0 %v3789_v33  ;;  %v3798_v8 = vsel %vm327_vm0, %v7718_v12, 0.0  ;;  %v3820_v21 = vmul.f32 %v7711_v10, %v7711_v10 }
 0x74a   :  { %v3717_v34 = vadd.f32 %v3716_v53, %v3715_v28  ;;  %3799 = vadd.xlane.f32.xlu1 %v3798_v8  ;;  %v7732_v37 = vadd.f32 %v5834_v23, %v3729_v7  ;;  %v3731_v38 = vsel %vm3726_vm6, %v3728_v20, %v3730_v19  ;;  %v3738_v3 = vrot.slane %v3710_v41, 4  ;;  %v8280_v41 = vld [vmem:[#allocation19_spill] sm:$0xff] }
 0x74b   :  { %v3734_v47 = vrot.slane %v3696_v29, 4  ;;  %v3703_v52 = vadd.f32 %v3702_v24, %v3701_v54  ;;  %v3849_v44 = vsel %vm327_vm0, %v3820_v21, 0.0  ;;  %v7739_v58 = vadd.f32 %v5835_v25, %v3731_v38 }
 0x74c   :  { %v3740_v13 = vrot.slane %v3717_v34, 4  ;;  %v3792_v42 = vsel %vm327_vm0, %v7732_v37, 0.0  ;;  %v3823_v22 = vmul.f32 %v7718_v12, %v7718_v12  ;;  %v3821_v31 = vmul.f32 %v7732_v37, %v7732_v37 }
 0x74d   :  { %v3736_v2 = vrot.slane %v3703_v52, 4  ;;  %3850 = vadd.xlane.f32.xlu0 %v3849_v44  ;;  %v3735_v39 = vsel %vm3726_vm6, %v3732_v26, %v3734_v47  ;;  %v3795_v49 = vsel %vm327_vm0, %v7739_v58, 0.0  ;;  %v3822_v5 = vmul.f32 %v7739_v58, %v7739_v58 }
 0x74e   :  { %3793 = vadd.xlane.f32.xlu1 %v3792_v42  ;;  %v3741_v51 = vsel %vm3726_vm6, %v3738_v3, %v3740_v13  ;;  %v3858_v45 = vsel %vm327_vm0, %v3823_v22, 0.0  ;;  %v7760_v27 = vadd.f32 %v5836_v1, %v3735_v39  ;;  %v3852_v26 = vsel %vm327_vm0, %v3821_v31, 0.0 }
 0x74f   :  { %v3737_v30 = vsel %vm3726_vm6, %v3734_v47, %v3736_v2  ;;  %v3739_v35 = vsel %vm3726_vm6, %v3736_v2, %v3738_v3  ;;  %v3855_v19 = vsel %vm327_vm0, %v3822_v5, 0.0  ;;  %v7766_v53 = vadd.f32 %v5837_v16, %v3741_v51  ;;  %v3848_v47 = vpop.xlane.xlu1 %3847 }
 0x750   :  { %v3801_v20 = vsel %vm327_vm0, %v7760_v27, 0.0  ;;  %v3824_v15 = vmul.f32 %v7760_v27, %v7760_v27  ;;  %v7777_v36 = vadd.f32 %v5838_v43, %v3737_v30  ;;  %v7782_v62 = vadd.f32 %v5839_v17, %v3739_v35 }
 0x751   :  { %3796 = vadd.xlane.f32.xlu0 %v3795_v49  ;;  %v3810_v40 = vsel %vm327_vm0, %v7766_v53, 0.0  ;;  %v3827_v7 = vmul.f32 %v7766_v53, %v7766_v53  ;;  %v3879_v52 = vmul.f32 0.03125, %v7609_v0  ;;  %v3894_v3 = vmul.f32 0.03125, %v3848_v47 }
 0x752   :  { %3859 = vadd.xlane.f32.xlu1 %v3858_v45  ;;  %v3861_v63 = vsel %vm327_vm0, %v3824_v15, 0.0  ;;  %v3804_v56 = vsel %vm327_vm0, %v7777_v36, 0.0  ;;  %v3826_v6 = vmul.f32 %v7782_v62, %v7782_v62  ;;  %v3807_v60 = vsel %vm327_vm0, %v7782_v62, 0.0 }
 0x753   :  { %v3825_v61 = vmul.f32 %v7777_v36, %v7777_v36  ;;  %v3870_v28 = vsel %vm327_vm0, %v3827_v7, 0.0 }
 0x754   :  { %v3867_v48 = vsel %vm327_vm0, %v3826_v6, 0.0 }
 0x755   :  { %3856 = vadd.xlane.f32.xlu0 %v3855_v19  ;;  %v3864_v46 = vsel %vm327_vm0, %v3825_v61, 0.0 }
 0x756   :  { %3853 = vadd.xlane.f32.xlu1 %v3852_v26 }
 0x759   :  { %3802 = vadd.xlane.f32.xlu0 %v3801_v20 }
 0x75a   :  { %3811 = vadd.xlane.f32.xlu1 %v3810_v40 }
 0x75d   :  { %3862 = vadd.xlane.f32.xlu0 %v3861_v63 }
 0x75e   :  { %3805 = vadd.xlane.f32.xlu1 %v3804_v56 }
 0x761   :  { %3808 = vadd.xlane.f32.xlu0 %v3807_v60 }
 0x762   :  { %3868 = vadd.xlane.f32.xlu1 %v3867_v48 }
 0x765   :  { %3865 = vadd.xlane.f32.xlu0 %v3864_v46 }
 0x766   :  { %1941 = vadd.xlane.f32.xlu1 %v8280_v41 }
 0x769   :  { %3871 = vadd.xlane.f32.xlu0 %v3870_v28 }
 0x76d   :  { %3272 = vadd.xlane.f32.xlu0 %v7607_v32  ;;  %v3909_v32 = vmul.f32 %v3879_v52, %v3879_v52 }
 0x76f   :  { %v3924_v13 = vsub.f32 %v3894_v3, %v3909_v32 }
 0x771   :  { %v3939_v44 = vmax.f32 %v3924_v13, 0.0 }
 0x773   :  { %v3969_v22 = vadd.f32 1e-05, %v3939_v44 }
 0x775   :  { %5769 = vrsqrt.f32 %v3969_v22 }
 0x77f   :  { %v5770_v7 = vpop.eup %5769 }
 0x793   :  { %v5390_v9 = vpop.f32.mrb[96].mxu0 }
 0x794   :  { %v4132_v33 = vpop.f32.mrb[97].mxu0  ;;  %v4196_v54 = vmax.f32 %v5390_v9, 0.0 }
 0x795   :  { %v5391_v29 = vpop.f32.mrb[98].mxu0  ;;  %v4194_v24 = vmax.f32 %v4132_v33, 0.0  ;;  %v8281_v33 = vld [vmem:[#allocation24_spill] sm:$0xff] }
 0x796   :  { %v4197_v8 = vmax.f32 %v5391_v29, 0.0  ;;  %v4135_v21 = vpop.f32.mrb[99].mxu0  ;;  %v3954_v29 = vsub.f32 %v8281_v33, %v3879_v52 }
 0x797   :  { %v4195_v34 = vmax.f32 %v4135_v21, 0.0 }
 0x798   :  { %v4210_v23 = vpack.c.bf16 %v4197_v8, %v4196_v54 }
 0x799   :  { %v4209_v38 = vpack.c.bf16 %v4195_v34, %v4194_v24 }
 0x79b   :  { %5412 = vmatprep.mubr.msk.bf16.mxu1 %vm4249_vm7, %v4209_v38 }
 0x79c   :  { %5413 = vmatmul.mubr.msk.bf16.vlgmr.msra.gmra.mrb[96].mxu1 %vm4249_vm7, %v4210_v23  ;;  %v3999_v23 = vmul.f32 %v5770_v7, %v3954_v29 }
 0x7d6   :  { %v3791_v25 = vpop.xlane.xlu0 %3790 }
 0x7d7   :  { %v3880_v2 = vmul.f32 0.03125, %v3791_v25  ;;  %v3800_v42 = vpop.xlane.xlu1 %3799 }
 0x7d8   :  { %v7803_v49 = vmul.f32 0.03125, %v3800_v42  ;;  %v4020_v42 = vmul.f32 %v7619_v18, %v3999_v23 }
 0x7d9   :  { %v3910_v51 = vmul.f32 %v3880_v2, %v3880_v2  ;;  %v3955_v32 = vsub.f32 %v7711_v10, %v3880_v2 }
 0x7da   :  { %v3851_v39 = vpop.xlane.xlu0 %3850  ;;  %v3913_v1 = vmul.f32 %v7803_v49, %v7803_v49 }
 0x7db   :  { %v3895_v30 = vmul.f32 0.03125, %v3851_v39  ;;  %v3794_v35 = vpop.xlane.xlu1 %3793 }
 0x7dc   :  { %v7809_v26 = vmul.f32 0.03125, %v3794_v35 }
 0x7dd   :  { %v3925_v5 = vsub.f32 %v3895_v30, %v3910_v51 }
 0x7de   :  { %v3797_v45 = vpop.xlane.xlu0 %3796  ;;  %v3911_v56 = vmul.f32 %v7809_v26, %v7809_v26 }
 0x7df   :  { %v3940_v31 = vmax.f32 %v3925_v5, 0.0  ;;  %v7805_v19 = vmul.f32 0.03125, %v3797_v45  ;;  %v3860_v0 = vpop.xlane.xlu1 %3859 }
 0x7e0   :  { %v3898_v16 = vmul.f32 0.03125, %v3860_v0  ;;  %v7832_v0 = vadd.f32 %v7627_v55, %v4020_v42 }
 0x7e1   :  { %v3970_v20 = vadd.f32 1e-05, %v3940_v31  ;;  %v3912_v43 = vmul.f32 %v7805_v19, %v7805_v19 }
 0x7e2   :  { %v3928_v15 = vsub.f32 %v3898_v16, %v3913_v1  ;;  %v3857_v40 = vpop.xlane.xlu0 %3856 }
 0x7e3   :  { %5771 = vrsqrt.f32 %v3970_v20  ;;  %v3897_v17 = vmul.f32 0.03125, %v3857_v40  ;;  %v3854_v63 = vpop.xlane.xlu1 %3853 }
 0x7e4   :  { %v3896_v6 = vmul.f32 0.03125, %v3854_v63  ;;  %v3943_v60 = vmax.f32 %v3928_v15, 0.0 }
 0x7e5   :  { %v3927_v61 = vsub.f32 %v3897_v17, %v3912_v43  ;;  %v3957_v43 = vsub.f32 %v7739_v58, %v7805_v19 }
 0x7e6   :  { %v3926_v48 = vsub.f32 %v3896_v6, %v3911_v56  ;;  %v3803_v46 = vpop.xlane.xlu0 %3802  ;;  %v3973_v8 = vadd.f32 1e-05, %v3943_v60  ;;  %v3956_v6 = vsub.f32 %v7732_v37, %v7809_v26 }
 0x7e7   :  { %v3942_v41 = vmax.f32 %v3927_v61, 0.0  ;;  %v7815_v28 = vmul.f32 0.03125, %v3803_v46  ;;  %v3812_v9 = vpop.xlane.xlu1 %3811 }
 0x7e8   :  { %v3941_v54 = vmax.f32 %v3926_v48, 0.0  ;;  %v7829_v2 = vmul.f32 0.03125, %v3812_v9 }
 0x7e9   :  { %v3972_v21 = vadd.f32 1e-05, %v3942_v41  ;;  %v3914_v38 = vmul.f32 %v7815_v28, %v7815_v28 }
 0x7ea   :  { %v3971_v24 = vadd.f32 1e-05, %v3941_v54  ;;  %v3863_v34 = vpop.xlane.xlu0 %3862  ;;  %v3917_v46 = vmul.f32 %v7829_v2, %v7829_v2 }
 0x7eb   :  { %5773 = vrsqrt.f32 %v3972_v21  ;;  %v3899_v47 = vmul.f32 0.03125, %v3863_v34  ;;  %v3806_v3 = vpop.xlane.xlu1 %3805 }
 0x7ec   :  { %5775 = vrsqrt.f32 %v3971_v24  ;;  %v7822_v39 = vmul.f32 0.03125, %v3806_v3 }
 0x7ed   :  { %v5772_v13 = vpop.eup %5771  ;;  %5777 = vrsqrt.f32 %v3973_v8  ;;  %v3929_v44 = vsub.f32 %v3899_v47, %v3914_v38  ;;  %v3958_v8 = vsub.f32 %v7718_v12, %v7803_v49  ;;  %v3959_v12 = vsub.f32 %v7760_v27, %v7815_v28 }
 0x7ee   :  { %v3809_v25 = vpop.xlane.xlu0 %3808  ;;  %v4000_v52 = vmul.f32 %v5772_v13, %v3955_v32  ;;  %v3915_v16 = vmul.f32 %v7822_v39, %v7822_v39 }
 0x7ef   :  { %v3944_v22 = vmax.f32 %v3929_v44, 0.0  ;;  %v7824_v51 = vmul.f32 0.03125, %v3809_v25  ;;  %v3869_v30 = vpop.xlane.xlu1 %3868 }
 0x7f0   :  { %v3901_v35 = vmul.f32 0.03125, %v3869_v30  ;;  %v4021_v5 = vmul.f32 %v7619_v18, %v4000_v52 }
 0x7f1   :  { %v3974_v45 = vadd.f32 1e-05, %v3944_v22  ;;  %v3916_v10 = vmul.f32 %v7824_v51, %v7824_v51  ;;  %v3961_v27 = vsub.f32 %v7782_v62, %v7824_v51 }
 0x7f2   :  { %v3866_v31 = vpop.xlane.xlu0 %3865  ;;  %v7835_v1 = vadd.f32 %v7627_v55, %v4021_v5 }
 0x7f3   :  { %5779 = vrsqrt.f32 %v3974_v45  ;;  %v3931_v20 = vsub.f32 %v3901_v35, %v3916_v10  ;;  %v3900_v15 = vmul.f32 0.03125, %v3866_v31  ;;  %v1942_v40 = vpop.xlane.xlu1 %1941 }
 0x7f4   :  { %v1943_v17 = vrot.slane %v1942_v40, 4  ;;  %v4053_v63 = vpack.c.bf16 %v7835_v1, %v7832_v0 }
 0x7f5   :  { %v5774_v56 = vpop.eup %5773  ;;  %v3946_v60 = vmax.f32 %v3931_v20, 0.0  ;;  %v3930_v61 = vsub.f32 %v3900_v15, %v3915_v16 }
 0x7f6   :  { %v5776_v48 = vpop.eup %5775  ;;  %v1944_v7 = vadd.f32 %v1943_v17, %v1942_v40  ;;  %5393 = vmatmul.mubr.msk.bf16.gmra.mrb[100].mxu0 %vm327_vm0, %v4053_v63  ;;  %v3872_v41 = vpop.xlane.xlu0 %3871  ;;  %v4002_v9 = vmul.f32 %v5774_v56, %v3957_v43  ;;  %v3960_v40 = vsub.f32 %v7777_v36, %v7822_v39 }
 0x7f7   :  { %v5778_v58 = vpop.eup %5777  ;;  %v3976_v19 = vadd.f32 1e-05, %v3946_v60  ;;  %v3945_v33 = vmax.f32 %v3930_v61, 0.0  ;;  %v3902_v29 = vmul.f32 0.03125, %v3872_v41  ;;  %v4001_v54 = vmul.f32 %v5776_v48, %v3956_v6 }
 0x7f8   :  { %v1945_v37 = vrot.slane %v1944_v7, 2  ;;  %v4023_v26 = vmul.f32 %v7619_v18, %v4002_v9  ;;  %v4003_v3 = vmul.f32 %v5778_v58, %v3958_v8  ;;  %v3962_v6 = vsub.f32 %v7766_v53, %v7829_v2 }
 0x7f9   :  { %5781 = vrsqrt.f32 %v3976_v19  ;;  %v3975_v21 = vadd.f32 1e-05, %v3945_v33  ;;  %v3932_v24 = vsub.f32 %v3902_v29, %v3917_v46  ;;  %v4022_v34 = vmul.f32 %v7619_v18, %v4001_v54 }
 0x7fa   :  { %v3273_v23 = vpop.xlane.xlu0 %3272  ;;  %v7853_v38 = vadd.f32 %v7627_v55, %v4023_v26  ;;  %v1946_v47 = vadd.f32 %v1945_v37, %v1944_v7  ;;  %v4024_v5 = vmul.f32 %v7619_v18, %v4003_v3 }
 0x7fb   :  { %5783 = vrsqrt.f32 %v3975_v21  ;;  %v3947_v32 = vmax.f32 %v3932_v24, 0.0  ;;  %v3274_v13 = vrot.slane %v3273_v23, 4  ;;  %v7856_v44 = vadd.f32 %v7627_v55, %v4022_v34 }
 0x7fc   :  { %v1947_v49 = vrot.slane %v1946_v47, 1  ;;  %v7868_v28 = vadd.f32 %v7627_v55, %v4024_v5 }
 0x7fd   :  { %v5780_v25 = vpop.eup %5779  ;;  %v3977_v52 = vadd.f32 1e-05, %v3947_v32  ;;  %v3275_v42 = vadd.f32 %v3274_v13, %v3273_v23  ;;  %v4054_v22 = vpack.c.bf16 %v7853_v38, %v7856_v44 }
 0x7fe   :  { %v1948_v30 = vadd.f32 %v1947_v49, %v1946_v47  ;;  %v4004_v35 = vmul.f32 %v5780_v25, %v3959_v12 }
 0x7ff   :  { %5785 = vrsqrt.f32 %v3977_v52  ;;  %v3276_v45 = vrot.slane %v3275_v42, 2  ;;  %5396 = vmatprep.mubr.msk.bf16.mxu0 %vm327_vm0, %v4054_v22 }
 0x800   :  { %5468 = vpush %v1948_v30  ;;  %v4025_v10 = vmul.f32 %v7619_v18, %v4004_v35 }
 0x801   :  { %v3277_v31 = vadd.f32 %v3276_v45, %v3275_v42 }
 0x802   :  { %v7871_v16 = vadd.f32 %v7627_v55, %v4025_v10 }
 0x803   :  { %v5782_v20 = vpop.eup %5781  ;;  %v3278_v15 = vrot.slane %v3277_v31, 1 }
 0x804   :  { %v4055_v43 = vpack.c.bf16 %v7871_v16, %v7868_v28  ;;  %v4006_v17 = vmul.f32 %v5782_v20, %v3961_v27 }
 0x805   :  { %v5784_v63 = vpop.eup %5783  ;;  %v3279_v56 = vadd.f32 %v3278_v15, %v3277_v31 }
 0x806   :  { %5397 = vmatmul.mubr.msk.bf16.gmra.mrb[104].mxu0 %vm327_vm0, %v4055_v43  ;;  %v4005_v62 = vmul.f32 %v5784_v63, %v3960_v40  ;;  %v4027_v51 = vmul.f32 %v7619_v18, %v4006_v17 }
 0x807   :  { %5470 = vpush %v3279_v56 }
 0x808   :  { %v4026_v60 = vmul.f32 %v7619_v18, %v4005_v62  ;;  %v7886_v39 = vadd.f32 %v7627_v55, %v4027_v51 }
 0x809   :  { %v5786_v61 = vpop.eup %5785 }
 0x80a   :  { %v7883_v36 = vadd.f32 %v7627_v55, %v4026_v60  ;;  %v4007_v48 = vmul.f32 %v5786_v61, %v3962_v6 }
 0x80c   :  { %v4056_v46 = vpack.c.bf16 %v7886_v39, %v7883_v36  ;;  %v4028_v7 = vmul.f32 %v7619_v18, %v4007_v48 }
 0x80e   :  { %5400 = vmatprep.mubr.msk.bf16.mxu0 %vm327_vm0, %v4056_v46  ;;  %v7893_v41 = vadd.f32 %v7627_v55, %v4028_v7 }
 0x810   :  { %v4057_v53 = vpack.c.bf16 %v7893_v41, %v7893_v41 }
 0x812   :  { %5401 = vmatmul.mubr.msk.bf16.gmra.mrb[108].mxu0 %vm327_vm0, %v4057_v53 }
 0x831   :  { %s5469_s0 = spop %5468 }
 0x838   :  { %s5471_s30 = spop %5470 }
 0x839   :  { %s3281_s11 = sadd.f32 %s5471_s30, %s5469_s0 }
 0x83b   :  { %4670 = sst [smem:[#allocation5]] %s3281_s11 }
 0x86f   :  { %v5414_v2 = vpop.f32.mrb[96].mxu1 }
 0x870   :  { %v7899_v9 = vadd.f32 %v5414_v2, %v7644_v57  ;;  %v4308_v58 = vpop.f32.mrb[97].mxu1 }
 0x871   :  { %v5415_v18 = vpop.f32.mrb[98].mxu1  ;;  %v7902_v19 = vadd.f32 %v4308_v58, %v7632_v14 }
 0x872   :  { %v7905_v55 = vadd.f32 %v5415_v18, %v7647_v50  ;;  %v4311_v33 = vpop.f32.mrb[99].mxu1  ;;  %v4378_v29 = vsel %vm327_vm0, %v7899_v9, 0.0  ;;  %v4419_v57 = vmul.f32 %v7899_v9, %v7899_v9 }
 0x873   :  { %4379 = vadd.xlane.f32.xlu1 %v4378_v29  ;;  %v7914_v8 = vadd.f32 %v4311_v33, %v7636_v4  ;;  %v4372_v14 = vsel %vm327_vm0, %v7902_v19, 0.0  ;;  %v4417_v24 = vmul.f32 %v7902_v19, %v7902_v19 }
 0x874   :  { %v4381_v54 = vsel %vm327_vm0, %v7905_v55, 0.0  ;;  %v4420_v50 = vmul.f32 %v7905_v55, %v7905_v55  ;;  %v4438_v37 = vsel %vm327_vm0, %v4419_v57, 0.0 }
 0x875   :  { %4382 = vadd.xlane.f32.xlu0 %v4381_v54  ;;  %v4418_v21 = vmul.f32 %v7914_v8, %v7914_v8  ;;  %v4375_v4 = vsel %vm327_vm0, %v7914_v8, 0.0  ;;  %v4432_v23 = vsel %vm327_vm0, %v4417_v24, 0.0 }
 0x876   :  { %v4441_v26 = vsel %vm327_vm0, %v4420_v50, 0.0 }
 0x877   :  { %4373 = vadd.xlane.f32.xlu1 %v4372_v14  ;;  %v4435_v34 = vsel %vm327_vm0, %v4418_v21, 0.0 }
 0x879   :  { %4439 = vadd.xlane.f32.xlu0 %v4438_v37 }
 0x87b   :  { %4442 = vadd.xlane.f32.xlu1 %v4441_v26 }
 0x87d   :  { %4376 = vadd.xlane.f32.xlu0 %v4375_v4 }
 0x87f   :  { %4436 = vadd.xlane.f32.xlu1 %v4435_v34 }
 0x881   :  { %4433 = vadd.xlane.f32.xlu0 %v4432_v23 }
 0x8c9   :  { %v5394_v47 = vpop.f32.mrb[100].mxu0 }
 0x8ca   :  { %v4148_v3 = vpop.f32.mrb[101].mxu0  ;;  %v4200_v13 = vmax.f32 %v5394_v47, 0.0 }
 0x8cb   :  { %v5395_v32 = vpop.f32.mrb[102].mxu0  ;;  %v4198_v25 = vmax.f32 %v4148_v3, 0.0 }
 0x8cc   :  { %v4201_v12 = vmax.f32 %v5395_v32, 0.0  ;;  %v4151_v49 = vpop.f32.mrb[103].mxu0 }
 0x8cd   :  { %v4199_v52 = vmax.f32 %v4151_v49, 0.0 }
 0x8ce   :  { %v4212_v42 = vpack.c.bf16 %v4201_v12, %v4200_v13 }
 0x8cf   :  { %v4211_v22 = vpack.c.bf16 %v4199_v52, %v4198_v25 }
 0x8d1   :  { %5416 = vmatprep.mubr.msk.bf16.mxu1 %vm4249_vm7, %v4211_v22 }
 0x8d2   :  { %5417 = vmatmul.mubr.msk.bf16.gmra.mrb[100].mxu1 %vm4249_vm7, %v4212_v42 }
 0x8d9   :  { %v5398_v30 = vpop.f32.mrb[104].mxu0 }
 0x8da   :  { %v4164_v35 = vpop.f32.mrb[105].mxu0  ;;  %v4204_v45 = vmax.f32 %v5398_v30, 0.0 }
 0x8db   :  { %v5399_v5 = vpop.f32.mrb[106].mxu0  ;;  %v4202_v27 = vmax.f32 %v4164_v35, 0.0 }
 0x8dc   :  { %v4205_v10 = vmax.f32 %v5399_v5, 0.0  ;;  %v4167_v31 = vpop.f32.mrb[107].mxu0 }
 0x8dd   :  { %v4203_v20 = vmax.f32 %v4167_v31, 0.0 }
 0x8de   :  { %v4214_v15 = vpack.c.bf16 %v4205_v10, %v4204_v45  ;;  %v7940_v10 = vld [vmem:[%s8188_s7] ss:$0 sm:$0xff] }
 0x8df   :  { %v4213_v40 = vpack.c.bf16 %v4203_v20, %v4202_v27 }
 0x8e1   :  { %5420 = vmatprep.mubr.msk.bf16.mxu1 %vm4249_vm7, %v4213_v40 }
 0x8e2   :  { %5421 = vmatmul.mubr.msk.bf16.gmra.mrb[104].mxu1 %vm4249_vm7, %v4214_v15  ;;  %v7946_v15 = vld [vmem:[%s8189_s8] ss:$0 sm:$0xff] }
 0x8e5   :  { %v5402_v43 = vpop.f32.mrb[108].mxu0 }
 0x8e6   :  { %v4180_v17 = vpop.f32.mrb[109].mxu0  ;;  %v4208_v56 = vmax.f32 %v5402_v43, 0.0 }
 0x8e7   :  { %v5403_v63 = vpop.f32.mrb[110].mxu0  ;;  %v4206_v51 = vmax.f32 %v4180_v17, 0.0 }
 0x8e8   :  { %v4183_v62 = vpop.f32.mrb[111].mxu0  ;;  %v4216_v61 = vpack.c.bf16 %v4208_v56, %v4208_v56 }
 0x8e9   :  { %v4207_v6 = vmax.f32 %v4183_v62, 0.0 }
 0x8eb   :  { %v4215_v60 = vpack.c.bf16 %v4207_v6, %v4206_v51 }
 0x8ed   :  { %5424 = vmatprep.mubr.msk.bf16.mxu1 %vm4249_vm7, %v4215_v60 }
 0x8ee   :  { %5425 = vmatmul.mubr.msk.bf16.gmra.mrb[108].mxu1 %vm4249_vm7, %v4216_v61 }
 0x900   :  { %v4380_v48 = vpop.xlane.xlu1 %4379 }
 0x901   :  { %v4479_v7 = vmul.f32 0.03125, %v4380_v48 }
 0x902   :  { %v4383_v46 = vpop.xlane.xlu0 %4382 }
 0x903   :  { %v4480_v2 = vmul.f32 0.03125, %v4383_v46  ;;  %v4509_v18 = vmul.f32 %v4479_v7, %v4479_v7  ;;  %v4554_v5 = vsub.f32 %v7899_v9, %v4479_v7 }
 0x904   :  { %v4374_v53 = vpop.xlane.xlu1 %4373 }
 0x905   :  { %v4510_v54 = vmul.f32 %v4480_v2, %v4480_v2  ;;  %v4477_v37 = vmul.f32 0.03125, %v4374_v53  ;;  %v4555_v31 = vsub.f32 %v7905_v55, %v4480_v2 }
 0x906   :  { %v4440_v58 = vpop.xlane.xlu0 %4439 }
 0x907   :  { %v4494_v33 = vmul.f32 0.03125, %v4440_v58  ;;  %v4507_v13 = vmul.f32 %v4477_v37, %v4477_v37  ;;  %v4552_v62 = vsub.f32 %v7902_v19, %v4477_v37 }
 0x908   :  { %v4443_v29 = vpop.xlane.xlu1 %4442 }
 0x909   :  { %v4524_v57 = vsub.f32 %v4494_v33, %v4509_v18  ;;  %v4495_v14 = vmul.f32 0.03125, %v4443_v29 }
 0x90a   :  { %v4377_v50 = vpop.xlane.xlu0 %4376 }
 0x90b   :  { %v4539_v26 = vmax.f32 %v4524_v57, 0.0  ;;  %v4525_v21 = vsub.f32 %v4495_v14, %v4510_v54  ;;  %v4478_v4 = vmul.f32 0.03125, %v4377_v50 }
 0x90c   :  { %v4437_v24 = vpop.xlane.xlu1 %4436 }
 0x90d   :  { %v4569_v34 = vadd.f32 1e-05, %v4539_v26  ;;  %v4540_v23 = vmax.f32 %v4525_v21, 0.0  ;;  %v4508_v47 = vmul.f32 %v4478_v4, %v4478_v4  ;;  %v4493_v3 = vmul.f32 0.03125, %v4437_v24 }
 0x90e   :  { %v4434_v32 = vpop.xlane.xlu0 %4433  ;;  %v4553_v63 = vsub.f32 %v7914_v8, %v4478_v4 }
 0x90f   :  { %5787 = vrsqrt.f32 %v4569_v34  ;;  %v4570_v12 = vadd.f32 1e-05, %v4540_v23  ;;  %v4492_v49 = vmul.f32 0.03125, %v4434_v32  ;;  %v4523_v25 = vsub.f32 %v4493_v3, %v4508_v47 }
 0x911   :  { %5789 = vrsqrt.f32 %v4570_v12  ;;  %v4522_v52 = vsub.f32 %v4492_v49, %v4507_v13  ;;  %v4538_v42 = vmax.f32 %v4523_v25, 0.0 }
 0x913   :  { %v4537_v22 = vmax.f32 %v4522_v52, 0.0  ;;  %v4568_v30 = vadd.f32 1e-05, %v4538_v42 }
 0x915   :  { %v4567_v35 = vadd.f32 1e-05, %v4537_v22  ;;  %5791 = vrsqrt.f32 %v4568_v30 }
 0x917   :  { %5793 = vrsqrt.f32 %v4567_v35 }
 0x919   :  { %v5788_v45 = vpop.eup %5787 }
 0x91a   :  { %v4599_v27 = vmul.f32 %v5788_v45, %v4554_v5 }
 0x91b   :  { %v5790_v20 = vpop.eup %5789 }
 0x91c   :  { %v4620_v40 = vmul.f32 %v7940_v10, %v4599_v27  ;;  %v4600_v43 = vmul.f32 %v5790_v20, %v4555_v31 }
 0x91e   :  { %v4641_v9 = vadd.f32 %v7946_v15, %v4620_v40  ;;  %v4621_v17 = vmul.f32 %v7940_v10, %v4600_v43 }
 0x91f   :  { %v5792_v56 = vpop.eup %5791 }
 0x920   :  { %4656 = vst.msk [vmem:[%s8190_s9 + $0x10] sm:$0xff] %vm327_vm0, %v4641_v9  ;;  %v4642_v55 = vadd.f32 %v7946_v15, %v4621_v17  ;;  %v4598_v6 = vmul.f32 %v5792_v56, %v4553_v63 }
 0x921   :  { %v5794_v51 = vpop.eup %5793 }
 0x922   :  { %4657 = vst.msk [vmem:[%s8190_s9 + $0x18] sm:$0xff] %vm327_vm0, %v4642_v55  ;;  %v4597_v60 = vmul.f32 %v5794_v51, %v4552_v62  ;;  %v4619_v8 = vmul.f32 %v7940_v10, %v4598_v6 }
 0x924   :  { %v4618_v61 = vmul.f32 %v7940_v10, %v4597_v60  ;;  %v4640_v19 = vadd.f32 %v7946_v15, %v4619_v8 }
 0x926   :  { %v4639_v48 = vadd.f32 %v7946_v15, %v4618_v61  ;;  %4655 = vst.msk [vmem:[%s8190_s9 + $0x8] sm:$0xff] %vm327_vm0, %v4640_v19 }
 0x928   :  { %4654 = vst.msk [vmem:[%s8190_s9] sm:$0xff] %vm327_vm0, %v4639_v48 }
 0x9a5   :  { %v5418_v46 = vpop.f32.mrb[100].mxu1 }
 0x9a6   :  { %v7975_v7 = vadd.f32 %v5418_v46, %v7832_v0  ;;  %v4324_v53 = vpop.f32.mrb[101].mxu1 }
 0x9a7   :  { %v5419_v2 = vpop.f32.mrb[102].mxu1  ;;  %v7978_v58 = vadd.f32 %v4324_v53, %v7657_v11 }
 0x9a8   :  { %v7981_v18 = vadd.f32 %v5419_v2, %v7835_v1  ;;  %v4327_v33 = vpop.f32.mrb[103].mxu1  ;;  %v4390_v29 = vsel %vm327_vm0, %v7975_v7, 0.0  ;;  %v4423_v0 = vmul.f32 %v7975_v7, %v7975_v7 }
 0x9a9   :  { %4391 = vadd.xlane.f32.xlu1 %v4390_v29  ;;  %v7990_v57 = vadd.f32 %v4327_v33, %v7660_v59  ;;  %v4384_v11 = vsel %vm327_vm0, %v7978_v58, 0.0  ;;  %v4421_v26 = vmul.f32 %v7978_v58, %v7978_v58 }
 0x9aa   :  { %v4393_v54 = vsel %vm327_vm0, %v7981_v18, 0.0  ;;  %v4424_v1 = vmul.f32 %v7981_v18, %v7981_v18  ;;  %v4450_v14 = vsel %vm327_vm0, %v4423_v0, 0.0 }
 0x9ab   :  { %4394 = vadd.xlane.f32.xlu0 %v4393_v54  ;;  %v4422_v37 = vmul.f32 %v7990_v57, %v7990_v57  ;;  %v4387_v59 = vsel %vm327_vm0, %v7990_v57, 0.0  ;;  %v4444_v23 = vsel %vm327_vm0, %v4421_v26, 0.0 }
 0x9ac   :  { %v4453_v50 = vsel %vm327_vm0, %v4424_v1, 0.0 }
 0x9ad   :  { %4385 = vadd.xlane.f32.xlu1 %v4384_v11  ;;  %v4447_v21 = vsel %vm327_vm0, %v4422_v37, 0.0 }
 0x9af   :  { %4451 = vadd.xlane.f32.xlu0 %v4450_v14 }
 0x9b1   :  { %4454 = vadd.xlane.f32.xlu1 %v4453_v50 }
 0x9b3   :  { %4388 = vadd.xlane.f32.xlu0 %v4387_v59 }
 0x9b5   :  { %4448 = vadd.xlane.f32.xlu1 %v4447_v21  ;;  %v5422_v4 = vpop.f32.mrb[104].mxu1 }
 0x9b6   :  { %v8006_v24 = vadd.f32 %v5422_v4, %v7868_v28  ;;  %v4340_v34 = vpop.f32.mrb[105].mxu1 }
 0x9b7   :  { %4445 = vadd.xlane.f32.xlu0 %v4444_v23  ;;  %v5423_v47 = vpop.f32.mrb[106].mxu1  ;;  %v8010_v3 = vadd.f32 %v4340_v34, %v7856_v44 }
 0x9b8   :  { %v8013_v32 = vadd.f32 %v5423_v47, %v7871_v16  ;;  %v4343_v13 = vpop.f32.mrb[107].mxu1  ;;  %v4402_v12 = vsel %vm327_vm0, %v8006_v24, 0.0  ;;  %v4427_v49 = vmul.f32 %v8006_v24, %v8006_v24 }
 0x9b9   :  { %4403 = vadd.xlane.f32.xlu1 %v4402_v12  ;;  %v8022_v25 = vadd.f32 %v4343_v13, %v7853_v38  ;;  %v4396_v44 = vsel %vm327_vm0, %v8010_v3, 0.0  ;;  %v4425_v5 = vmul.f32 %v8010_v3, %v8010_v3 }
 0x9ba   :  { %v4405_v28 = vsel %vm327_vm0, %v8013_v32, 0.0  ;;  %v4428_v16 = vmul.f32 %v8013_v32, %v8013_v32  ;;  %v4462_v52 = vsel %vm327_vm0, %v4427_v49, 0.0 }
 0x9bb   :  { %4406 = vadd.xlane.f32.xlu0 %v4405_v28  ;;  %v4426_v22 = vmul.f32 %v8022_v25, %v8022_v25  ;;  %v4399_v38 = vsel %vm327_vm0, %v8022_v25, 0.0  ;;  %v4456_v9 = vsel %vm327_vm0, %v4425_v5, 0.0 }
 0x9bc   :  { %v4465_v42 = vsel %vm327_vm0, %v4428_v16, 0.0 }
 0x9bd   :  { %4397 = vadd.xlane.f32.xlu1 %v4396_v44  ;;  %v4459_v20 = vsel %vm327_vm0, %v4426_v22, 0.0 }
 0x9bf   :  { %4463 = vadd.xlane.f32.xlu0 %v4462_v52 }
 0x9c1   :  { %4466 = vadd.xlane.f32.xlu1 %v4465_v42  ;;  %v5426_v30 = vpop.f32.mrb[108].mxu1 }
 0x9c2   :  { %v4356_v35 = vpop.f32.mrb[109].mxu1  ;;  %v8037_v31 = vadd.f32 %v5426_v30, %v7893_v41 }
 0x9c3   :  { %4400 = vadd.xlane.f32.xlu0 %v4399_v38  ;;  %v5427_v45 = vpop.f32.mrb[110].mxu1  ;;  %v8041_v40 = vadd.f32 %v4356_v35, %v7883_v36 }
 0x9c4   :  { %v4359_v27 = vpop.f32.mrb[111].mxu1  ;;  %v4414_v17 = vsel %vm327_vm0, %v8037_v31, 0.0  ;;  %v4431_v62 = vmul.f32 %v8037_v31, %v8037_v31 }
 0x9c5   :  { %4460 = vadd.xlane.f32.xlu1 %v4459_v20  ;;  %v8044_v43 = vadd.f32 %v4359_v27, %v7886_v39  ;;  %v4429_v63 = vmul.f32 %v8041_v40, %v8041_v40  ;;  %v4408_v36 = vsel %vm327_vm0, %v8041_v40, 0.0 }
 0x9c6   :  { %v4474_v51 = vsel %vm327_vm0, %v4431_v62, 0.0 }
 0x9c7   :  { %4457 = vadd.xlane.f32.xlu0 %v4456_v9  ;;  %v4411_v41 = vsel %vm327_vm0, %v8044_v43, 0.0  ;;  %v4430_v39 = vmul.f32 %v8044_v43, %v8044_v43  ;;  %v4468_v56 = vsel %vm327_vm0, %v4429_v63, 0.0 }
 0x9c9   :  { %4415 = vadd.xlane.f32.xlu1 %v4414_v17  ;;  %v4471_v55 = vsel %vm327_vm0, %v4430_v39, 0.0 }
 0x9cb   :  { %4412 = vadd.xlane.f32.xlu0 %v4411_v41 }
 0x9cd   :  { %4409 = vadd.xlane.f32.xlu1 %v4408_v36 }
 0x9cf   :  { %4469 = vadd.xlane.f32.xlu0 %v4468_v56 }
 0x9d1   :  { %4472 = vadd.xlane.f32.xlu1 %v4471_v55 }
 0x9d3   :  { %4475 = vadd.xlane.f32.xlu0 %v4474_v51 }
 0x9d4   :  { %5871 = shalt.err (!%p5868_p10)
}
 0x9d5   :  { %s5882_s25 = smov [#allocation5]  }
 0x9d6   :  { %4680 = dma.smem_to_hbm %s5882_s25, 16, %s8191_s10, [#allocation4]  }
 0xa36   :  { %v4392_v6 = vpop.xlane.xlu1 %4391 }
 0xa37   :  { %v4483_v8 = vmul.f32 0.03125, %v4392_v6 }
 0xa38   :  { %v4395_v60 = vpop.xlane.xlu0 %4394 }
 0xa39   :  { %v4484_v19 = vmul.f32 0.03125, %v4395_v60  ;;  %v4513_v46 = vmul.f32 %v4483_v8, %v4483_v8  ;;  %v4558_v20 = vsub.f32 %v7975_v7, %v4483_v8 }
 0xa3a   :  { %v4386_v61 = vpop.xlane.xlu1 %4385 }
 0xa3b   :  { %v4514_v33 = vmul.f32 %v4484_v19, %v4484_v19  ;;  %v8074_v11 = vmul.f32 0.03125, %v4386_v61  ;;  %v4559_v39 = vsub.f32 %v7981_v18, %v4484_v19 }
 0xa3c   :  { %v4452_v48 = vpop.xlane.xlu0 %4451 }
 0xa3d   :  { %v4498_v53 = vmul.f32 0.03125, %v4452_v48  ;;  %v4511_v23 = vmul.f32 %v8074_v11, %v8074_v11 }
 0xa3e   :  { %v4455_v2 = vpop.xlane.xlu1 %4454 }
 0xa3f   :  { %v4528_v29 = vsub.f32 %v4498_v53, %v4513_v46  ;;  %v4499_v54 = vmul.f32 0.03125, %v4455_v2 }
 0xa40   :  { %v4389_v0 = vpop.xlane.xlu0 %4388 }
 0xa41   :  { %v4543_v1 = vmax.f32 %v4528_v29, 0.0  ;;  %v4529_v14 = vsub.f32 %v4499_v54, %v4514_v33  ;;  %v8076_v50 = vmul.f32 0.03125, %v4389_v0 }
 0xa42   :  { %v4449_v37 = vpop.xlane.xlu1 %4448 }
 0xa43   :  { %v4573_v59 = vadd.f32 1e-05, %v4543_v1  ;;  %v4544_v26 = vmax.f32 %v4529_v14, 0.0  ;;  %v4512_v21 = vmul.f32 %v8076_v50, %v8076_v50  ;;  %v4497_v4 = vmul.f32 0.03125, %v4449_v37 }
 0xa44   :  { %v4446_v34 = vpop.xlane.xlu0 %4445  ;;  %v4557_v33 = vsub.f32 %v7990_v57, %v8076_v50 }
 0xa45   :  { %5795 = vrsqrt.f32 %v4573_v59  ;;  %v4574_v47 = vadd.f32 1e-05, %v4544_v26  ;;  %v4496_v13 = vmul.f32 0.03125, %v4446_v34  ;;  %v4527_v12 = vsub.f32 %v4497_v4, %v4512_v21 }
 0xa46   :  { %v4404_v28 = vpop.xlane.xlu1 %4403  ;;  %v4556_v59 = vsub.f32 %v7978_v58, %v8074_v11 }
 0xa47   :  { %5797 = vrsqrt.f32 %v4574_v47  ;;  %v4526_v49 = vsub.f32 %v4496_v13, %v4511_v23  ;;  %v4542_v44 = vmax.f32 %v4527_v12, 0.0  ;;  %v8082_v42 = vmul.f32 0.03125, %v4404_v28 }
 0xa48   :  { %v4407_v16 = vpop.xlane.xlu0 %4406 }
 0xa49   :  { %v4541_v52 = vmax.f32 %v4526_v49, 0.0  ;;  %v4572_v22 = vadd.f32 1e-05, %v4542_v44  ;;  %v8084_v38 = vmul.f32 0.03125, %v4407_v16  ;;  %v4517_v45 = vmul.f32 %v8082_v42, %v8082_v42 }
 0xa4a   :  { %v4398_v30 = vpop.xlane.xlu1 %4397 }
 0xa4b   :  { %v4571_v35 = vadd.f32 1e-05, %v4541_v52  ;;  %5799 = vrsqrt.f32 %v4572_v22  ;;  %v4518_v41 = vmul.f32 %v8084_v38, %v8084_v38  ;;  %v8092_v51 = vmul.f32 0.03125, %v4398_v30 }
 0xa4c   :  { %v4464_v5 = vpop.xlane.xlu0 %4463 }
 0xa4d   :  { %5801 = vrsqrt.f32 %v4571_v35  ;;  %v4502_v27 = vmul.f32 0.03125, %v4464_v5  ;;  %v4515_v0 = vmul.f32 %v8092_v51, %v8092_v51 }
 0xa4e   :  { %v4467_v9 = vpop.xlane.xlu1 %4466 }
 0xa4f   :  { %v5796_v17 = vpop.eup %5795  ;;  %v4532_v63 = vsub.f32 %v4502_v27, %v4517_v45  ;;  %v4503_v36 = vmul.f32 0.03125, %v4467_v9 }
 0xa50   :  { %v4603_v56 = vmul.f32 %v5796_v17, %v4558_v20  ;;  %v4401_v62 = vpop.xlane.xlu0 %4400  ;;  %v4562_v20 = vsub.f32 %v8006_v24, %v8082_v42 }
 0xa51   :  { %v5798_v55 = vpop.eup %5797  ;;  %v4547_v6 = vmax.f32 %v4532_v63, 0.0  ;;  %v4533_v60 = vsub.f32 %v4503_v36, %v4518_v41  ;;  %v8094_v61 = vmul.f32 0.03125, %v4401_v62 }
 0xa52   :  { %v4624_v7 = vmul.f32 %v7940_v10, %v4603_v56  ;;  %v4604_v8 = vmul.f32 %v5798_v55, %v4559_v39  ;;  %v4461_v48 = vpop.xlane.xlu1 %4460  ;;  %v4563_v39 = vsub.f32 %v8013_v32, %v8084_v38 }
 0xa53   :  { %v4577_v46 = vadd.f32 1e-05, %v4547_v6  ;;  %v4548_v53 = vmax.f32 %v4533_v60, 0.0  ;;  %v4516_v2 = vmul.f32 %v8094_v61, %v8094_v61  ;;  %v4501_v29 = vmul.f32 0.03125, %v4461_v48 }
 0xa54   :  { %v4645_v18 = vadd.f32 %v7946_v15, %v4624_v7  ;;  %v4625_v19 = vmul.f32 %v7940_v10, %v4604_v8  ;;  %v4458_v54 = vpop.xlane.xlu0 %4457  ;;  %v4561_v32 = vsub.f32 %v8022_v25, %v8094_v61 }
 0xa55   :  { %5803 = vrsqrt.f32 %v4577_v46  ;;  %v4578_v1 = vadd.f32 1e-05, %v4548_v53  ;;  %v4500_v14 = vmul.f32 0.03125, %v4458_v54  ;;  %v5800_v37 = vpop.eup %5799  ;;  %v4531_v57 = vsub.f32 %v4501_v29, %v4516_v2 }
 0xa56   :  { %4660 = vst.msk [vmem:[%s8190_s9 + $0x30] sm:$0xff] %vm327_vm0, %v4645_v18  ;;  %v4646_v26 = vadd.f32 %v7946_v15, %v4625_v19  ;;  %v4416_v50 = vpop.xlane.xlu1 %4415  ;;  %v4602_v4 = vmul.f32 %v5800_v37, %v4557_v33  ;;  %v4560_v29 = vsub.f32 %v8010_v3, %v8092_v51 }
 0xa57   :  { %v5802_v21 = vpop.eup %5801  ;;  %5805 = vrsqrt.f32 %v4578_v1  ;;  %v4530_v34 = vsub.f32 %v4500_v14, %v4515_v0  ;;  %v4546_v58 = vmax.f32 %v4531_v57, 0.0  ;;  %v4491_v5 = vmul.f32 0.03125, %v4416_v50 }
 0xa58   :  { %4661 = vst.msk [vmem:[%s8190_s9 + $0x38] sm:$0xff] %vm327_vm0, %v4646_v26  ;;  %v4601_v23 = vmul.f32 %v5802_v21, %v4556_v59  ;;  %v4413_v11 = vpop.xlane.xlu0 %4412  ;;  %v4623_v47 = vmul.f32 %v7940_v10, %v4602_v4 }
 0xa59   :  { %v4545_v13 = vmax.f32 %v4530_v34, 0.0  ;;  %v4576_v28 = vadd.f32 1e-05, %v4546_v58  ;;  %v4490_v52 = vmul.f32 0.03125, %v4413_v11  ;;  %v4521_v6 = vmul.f32 %v4491_v5, %v4491_v5 }
 0xa5a   :  { %v4622_v12 = vmul.f32 %v7940_v10, %v4601_v23  ;;  %v4410_v49 = vpop.xlane.xlu1 %4409  ;;  %v4644_v44 = vadd.f32 %v7946_v15, %v4623_v47  ;;  %v4566_v4 = vsub.f32 %v8037_v31, %v4491_v5 }
 0xa5b   :  { %v4575_v16 = vadd.f32 1e-05, %v4545_v13  ;;  %v4489_v22 = vmul.f32 0.03125, %v4410_v49  ;;  %5807 = vrsqrt.f32 %v4576_v28  ;;  %v4520_v41 = vmul.f32 %v4490_v52, %v4490_v52 }
 0xa5c   :  { %v4643_v30 = vadd.f32 %v7946_v15, %v4622_v12  ;;  %v4470_v35 = vpop.xlane.xlu0 %4469  ;;  %4659 = vst.msk [vmem:[%s8190_s9 + $0x28] sm:$0xff] %vm327_vm0, %v4644_v44  ;;  %v4565_v57 = vsub.f32 %v8044_v43, %v4490_v52 }
 0xa5d   :  { %5809 = vrsqrt.f32 %v4575_v16  ;;  %v4519_v45 = vmul.f32 %v4489_v22, %v4489_v22  ;;  %v4504_v27 = vmul.f32 0.03125, %v4470_v35  ;;  %v4564_v59 = vsub.f32 %v8041_v40, %v4489_v22 }
 0xa5e   :  { %4658 = vst.msk [vmem:[%s8190_s9 + $0x20] sm:$0xff] %vm327_vm0, %v4643_v30  ;;  %v4473_v9 = vpop.xlane.xlu1 %4472 }
 0xa5f   :  { %v5804_v17 = vpop.eup %5803  ;;  %v4534_v63 = vsub.f32 %v4504_v27, %v4519_v45  ;;  %v4505_v36 = vmul.f32 0.03125, %v4473_v9 }
 0xa60   :  { %v4607_v56 = vmul.f32 %v5804_v17, %v4562_v20  ;;  %v4476_v62 = vpop.xlane.xlu0 %4475 }
 0xa61   :  { %v5806_v55 = vpop.eup %5805  ;;  %v4549_v60 = vmax.f32 %v4534_v63, 0.0  ;;  %v4535_v7 = vsub.f32 %v4505_v36, %v4520_v41  ;;  %v4506_v8 = vmul.f32 0.03125, %v4476_v62 }
 0xa62   :  { %v4628_v48 = vmul.f32 %v7940_v10, %v4607_v56  ;;  %v4608_v46 = vmul.f32 %v5806_v55, %v4563_v39 }
 0xa63   :  { %v4579_v53 = vadd.f32 1e-05, %v4549_v60  ;;  %v4550_v24 = vmax.f32 %v4535_v7, 0.0  ;;  %v4536_v42 = vsub.f32 %v4506_v8, %v4521_v6 }
 0xa64   :  { %v4649_v2 = vadd.f32 %v7946_v15, %v4628_v48  ;;  %v4629_v18 = vmul.f32 %v7940_v10, %v4608_v46 }
 0xa65   :  { %5811 = vrsqrt.f32 %v4579_v53  ;;  %v4580_v38 = vadd.f32 1e-05, %v4550_v24  ;;  %v4551_v19 = vmax.f32 %v4536_v42, 0.0  ;;  %v5808_v33 = vpop.eup %5807 }
 0xa66   :  { %4664 = vst.msk [vmem:[%s8190_s9 + $0x50] sm:$0xff] %vm327_vm0, %v4649_v2  ;;  %v4650_v54 = vadd.f32 %v7946_v15, %v4629_v18  ;;  %v4606_v1 = vmul.f32 %v5808_v33, %v4561_v32 }
 0xa67   :  { %v5810_v0 = vpop.eup %5809  ;;  %5813 = vrsqrt.f32 %v4580_v38  ;;  %v4581_v14 = vadd.f32 1e-05, %v4551_v19 }
 0xa68   :  { %4665 = vst.msk [vmem:[%s8190_s9 + $0x58] sm:$0xff] %vm327_vm0, %v4650_v54  ;;  %v4605_v25 = vmul.f32 %v5810_v0, %v4560_v29  ;;  %v4627_v61 = vmul.f32 %v7940_v10, %v4606_v1 }
 0xa69   :  { %5815 = vrsqrt.f32 %v4581_v14 }
 0xa6a   :  { %v4626_v3 = vmul.f32 %v7940_v10, %v4605_v25  ;;  %v4648_v51 = vadd.f32 %v7946_v15, %v4627_v61 }
 0xa6c   :  { %v4647_v37 = vadd.f32 %v7946_v15, %v4626_v3  ;;  %4663 = vst.msk [vmem:[%s8190_s9 + $0x48] sm:$0xff] %vm327_vm0, %v4648_v51 }
 0xa6e   :  { %4662 = vst.msk [vmem:[%s8190_s9 + $0x40] sm:$0xff] %vm327_vm0, %v4647_v37 }
 0xa6f   :  { %v5812_v26 = vpop.eup %5811 }
 0xa70   :  { %v4609_v50 = vmul.f32 %v5812_v26, %v4564_v59 }
 0xa71   :  { %v5814_v21 = vpop.eup %5813 }
 0xa72   :  { %v4630_v34 = vmul.f32 %v7940_v10, %v4609_v50  ;;  %v4610_v23 = vmul.f32 %v5814_v21, %v4565_v57 }
 0xa73   :  { %v5816_v58 = vpop.eup %5815 }
 0xa74   :  { %v4651_v11 = vadd.f32 %v7946_v15, %v4630_v34  ;;  %v4631_v47 = vmul.f32 %v7940_v10, %v4610_v23  ;;  %v4611_v13 = vmul.f32 %v5816_v58, %v4566_v4 }
 0xa76   :  { %4666 = vst.msk [vmem:[%s8190_s9 + $0x60] sm:$0xff] %vm327_vm0, %v4651_v11  ;;  %v4652_v40 = vadd.f32 %v7946_v15, %v4631_v47  ;;  %v4632_v43 = vmul.f32 %v7940_v10, %v4611_v13 }
 0xa78   :  { %4667 = vst.msk [vmem:[%s8190_s9 + $0x68] sm:$0xff] %vm327_vm0, %v4652_v40  ;;  %v4653_v31 = vadd.f32 %v7946_v15, %v4632_v43 }
 0xa7a   :  { %4668 = vst.msk [vmem:[%s8190_s9 + $0x70] sm:$0xff] %vm327_vm0, %v4653_v31 }
 0xa7b   :  { %5874 = dma.done.wait [#allocation4], 16  }
 0xa7c   :  { %5875 = vsyncadd [#allocation4], 4294967280 }
 0xa7d   :  { %4686 = sfence }
 0xa7e   :  { %4687 = vsyncpa [#allocation3], 1 }
 0xa7f   :  { %4688 = vsyncpa [#allocation4], 1 }

</bundles_post_ra>
